<compile_context>
chip_gen: v6e
topology: v6e:2x2x1
jax: 0.10.0
libtpu: 0.0.40
codegen_flags: <defaults>
</compile_context>

<pallas_src>
import numpy as np
import jax
import jax.numpy as jnp
from jax.experimental import pallas as pl
from jax.experimental.pallas import tpu as pltpu

# ---- static network configuration (matches the PyTorch defaults) -----------
CIN, C1, C2 = 5, 8, 16          # conv channels
K1, K2 = 8, 4                   # conv kernel sizes
POOL = 4                        # both maxpools: kernel 4, stride 4
FC1, FC2, FC3 = 80, 32, 16      # adaptive-pool size / fc widths

# ---- parameter-slab row layout (all section starts 8-aligned, 128 lanes) ----
R_W1, R_B1 = 0, 40              # W1 (K1*CIN, C1) = (40, 8);  b1 (1, 8)
R_W2, R_B2 = 48, 80             # W2 (K2*C1, C2) = (32, 16);  b2 (1, 16)
R_FW1, R_FB1 = 88, 168          # FW1 (80, 32);               fb1 (1, 32)
R_FW2, R_FB2 = 176, 208         # FW2 (32, 16);               fb2 (1, 16)
R_FW3, R_FB3 = 216, 232         # FW3 (16, 1);                fb3 (1, 1)
SLAB_ROWS, SLAB_COLS = 240, 128


def promoter_kernel(x_ref, p_ref, out_ref):
    x = x_ref[...]                                     # (B, L, CIN) f32
    B, L, _ = x.shape
    L1 = L - K1 + 1                                    # 121
    P1 = (L1 - POOL) // POOL + 1                       # 30
    L2 = P1 - K2 + 1                                   # 27
    P2 = (L2 - POOL) // POOL + 1                       # 6

    # static slices of the single packed parameter slab (one DMA)
    W1  = p_ref[R_W1:R_W1 + K1 * CIN, 0:C1]            # (40, 8)
    b1  = p_ref[R_B1:R_B1 + 1, 0:C1]                   # (1, 8)
    W2  = p_ref[R_W2:R_W2 + K2 * C1, 0:C2]             # (32, 16)
    b2  = p_ref[R_B2:R_B2 + 1, 0:C2]                   # (1, 16)
    FW1 = p_ref[R_FW1:R_FW1 + FC1, 0:FC2]              # (80, 32)
    fb1 = p_ref[R_FB1:R_FB1 + 1, 0:FC2]                # (1, 32)
    FW2 = p_ref[R_FW2:R_FW2 + FC2, 0:FC3]              # (32, 16)
    fb2 = p_ref[R_FB2:R_FB2 + 1, 0:FC3]                # (1, 16)
    FW3 = p_ref[R_FW3:R_FW3 + FC3, 0:1]                # (16, 1)
    fb3 = p_ref[R_FB3:R_FB3 + 1, 0:1]                  # (1, 1)

    # ---- conv1 (k=8, s=1) as ONE im2col matmul + ReLU -----------------------
    cols1 = jnp.concatenate([x[:, k:k + L1, :] for k in range(K1)], axis=2)
    h1 = jnp.dot(cols1.reshape(B * L1, K1 * CIN), W1,
                 preferred_element_type=jnp.float32) + b1
    h1 = jnp.maximum(h1, 0.0).reshape(B, L1, C1)       # (B, 121, 8)

    # ---- maxpool1 (k=4, s=4): slices + VPU max (no XLU reduce) --------------
    r1 = h1[:, :P1 * POOL, :].reshape(B, P1, POOL, C1)
    p1 = jnp.maximum(jnp.maximum(r1[:, :, 0:1, :], r1[:, :, 1:2, :]),
                     jnp.maximum(r1[:, :, 2:3, :], r1[:, :, 3:4, :]))
    p1 = p1.reshape(B, P1, C1)                         # (B, 30, 8)

    # ---- conv2 (k=4, s=1) as ONE im2col matmul + ReLU -----------------------
    cols2 = jnp.concatenate([p1[:, k:k + L2, :] for k in range(K2)], axis=2)
    h2 = jnp.dot(cols2.reshape(B * L2, K2 * C1), W2,
                 preferred_element_type=jnp.float32) + b2
    h2 = jnp.maximum(h2, 0.0).reshape(B, L2, C2)       # (B, 27, 16)

    # ---- maxpool2 (k=4, s=4) ------------------------------------------------
    r2 = h2[:, :P2 * POOL, :].reshape(B, P2, POOL, C2)
    p2 = jnp.maximum(jnp.maximum(r2[:, :, 0:1, :], r2[:, :, 1:2, :]),
                     jnp.maximum(r2[:, :, 2:3, :], r2[:, :, 3:4, :]))
    p2 = p2.reshape(B, P2, C2)                         # (B, 6, 16)

    # ---- flatten + AdaptiveMaxPool1d(96 -> 80) ------------------------------
    # For L_in=96 -> 80 every PyTorch window [floor(1.2 i), ceil(1.2 (i+1)))
    # is exactly 2 adjacent channel-major-flat positions inside one channel,
    # so the adaptive pool is a shifted elementwise max over the length dim.
    # The PyTorch channel-major output ordering is folded into FW1 on the host.
    pooled = jnp.maximum(p2[:, 0:P2 - 1, :], p2[:, 1:P2, :]).reshape(B, (P2 - 1) * C2)

    # ---- fully-connected head (ReLU after every layer) ----------------------
    z1 = jnp.maximum(jnp.dot(pooled, FW1, preferred_element_type=jnp.float32) + fb1, 0.0)
    z2 = jnp.maximum(jnp.dot(z1, FW2, preferred_element_type=jnp.float32) + fb2, 0.0)
    z3 = jnp.maximum(jnp.dot(z2, FW3, preferred_element_type=jnp.float32) + fb3, 0.0)
    # NOTE: at B=2 this (B,1) store is negligible; for large B compute the FC
    # head batch-on-lanes and write a lane-dense padded output block instead.
    out_ref[...] = z3                                  # (B, 1)


def pack_params(params):
    """One-time host-side packing of all weights/biases into a single
    (240, 128) f32 slab (one DMA instead of 12), pre-transposed so the kernel
    only does plain matmuls on static slices."""
    slab = np.zeros((SLAB_ROWS, SLAB_COLS), np.float32)

    w1 = np.asarray(params['w1'], np.float32)                    # (C1, CIN, K1)
    slab[R_W1:R_W1 + K1 * CIN, 0:C1] = w1.transpose(2, 1, 0).reshape(K1 * CIN, C1)
    slab[R_B1, 0:C1] = np.asarray(params['b1'], np.float32)

    w2 = np.asarray(params['w2'], np.float32)                    # (C2, C1, K2)
    slab[R_W2:R_W2 + K2 * C1, 0:C2] = w2.transpose(2, 1, 0).reshape(K2 * C1, C2)
    slab[R_B2, 0:C2] = np.asarray(params['b2'], np.float32)

    # fc1 rows permuted from PyTorch channel-major flatten (i = 5*c + j) to the
    # kernel's channels-last flatten (row = j*C2 + c).
    fw1 = np.asarray(params['fw1'], np.float32)                  # (32, 80)
    fw1_re = fw1.reshape(FC2, C2, FC1 // C2).transpose(2, 1, 0).reshape(FC1, FC2)
    slab[R_FW1:R_FW1 + FC1, 0:FC2] = fw1_re
    slab[R_FB1, 0:FC2] = np.asarray(params['fb1'], np.float32)

    slab[R_FW2:R_FW2 + FC2, 0:FC3] = np.asarray(params['fw2'], np.float32).T
    slab[R_FB2, 0:FC3] = np.asarray(params['fb2'], np.float32)

    slab[R_FW3:R_FW3 + FC3, 0:1] = np.asarray(params['fw3'], np.float32).T
    slab[R_FB3, 0:1] = np.asarray(params['fb3'], np.float32)

    return jnp.asarray(slab)


def init_params(key):
    """Deterministic PyTorch-default-style (uniform +-1/sqrt(fan_in)) init."""
    ks = jax.random.split(key, 10)

    def u(k, shape, fan_in):
        b = 1.0 / np.sqrt(fan_in)
        return jax.random.uniform(k, shape, jnp.float32, -b, b)

    p = {}
    p['w1'] = u(ks[0], (C1, CIN, K1), CIN * K1)
    p['b1'] = u(ks[1], (C1,), CIN * K1)
    p['w2'] = u(ks[2], (C2, C1, K2), C1 * K2)
    p['b2'] = u(ks[3], (C2,), C1 * K2)
    p['fw1'] = u(ks[4], (FC2, FC1), FC1)
    p['fb1'] = u(ks[5], (FC2,), FC1)
    p['fw2'] = u(ks[6], (FC3, FC2), FC2)
    p['fb2'] = u(ks[7], (FC3,), FC2)
    p['fw3'] = u(ks[8], (1, FC3), FC3)
    p['fb3'] = u(ks[9], (1,), FC3)
    return p


@jax.jit
def promoter_forward(seq_ncl, slab):
    """seq_ncl: (B, CIN, L) float32, PyTorch NCL layout. Returns (B,)."""
    B = seq_ncl.shape[0]
    x = jnp.transpose(seq_ncl, (0, 2, 1)).astype(jnp.float32)    # (B, L, CIN)
    # Working set < 0.5 MiB -> gridless single invocation, everything in VMEM.
    out = pl.pallas_call(
        promoter_kernel,
        out_shape=jax.ShapeDtypeStruct((B, 1), jnp.float32),
        in_specs=[pl.BlockSpec(memory_space=pltpu.MemorySpace.VMEM),
                  pl.BlockSpec(memory_space=pltpu.MemorySpace.VMEM)],
        out_specs=pl.BlockSpec(memory_space=pltpu.MemorySpace.VMEM),
    )(x, slab)
    return out[:, 0]                                             # squeeze(1)


if __name__ == "__main__":
    key = jax.random.PRNGKey(0)
    k_x, k_p = jax.random.split(key)

    B, L = 2, 128                       # (batch, sequence length), channels = 5
    seq = jax.random.normal(k_x, (B, CIN, L), jnp.float32)
    params = init_params(k_p)
    slab = pack_params(params)          # hoisted one-time parameter packing

    result = jax.block_until_ready(promoter_forward(seq, slab))

    assert result.shape == (B,), result.shape
    assert bool(jnp.all(jnp.isfinite(result)))
    print("KERNEL_OK")
</pallas_src>

<mosaic_0001>
module attributes {stable_mosaic.version = 11 : i64} {
  func.func @promoter_kernel(%arg0: memref<2x128x5xf32, #tpu.memory_space<vmem>>, %arg1: memref<240x128xf32, #tpu.memory_space<vmem>>, %arg2: memref<2x1xf32, #tpu.memory_space<vmem>>) attributes {dimension_semantics = [], scalar_prefetch = 0 : i64, scratch_operands = 0 : i64, tpu.core_type = #tpu.core_type<tc>} {
    %c0 = arith.constant 0 : index
    %c0_0 = arith.constant 0 : index
    %c0_1 = arith.constant 0 : index
    %0 = vector.load %arg0[%c0, %c0_0, %c0_1] : memref<2x128x5xf32, #tpu.memory_space<vmem>>, vector<2x128x5xf32>
    %c0_2 = arith.constant 0 : index
    %c0_3 = arith.constant 0 : index
    %1 = vector.load %arg1[%c0_2, %c0_3] : memref<240x128xf32, #tpu.memory_space<vmem>>, vector<40x8xf32>
    %c40 = arith.constant 40 : index
    %c0_4 = arith.constant 0 : index
    %2 = vector.load %arg1[%c40, %c0_4] : memref<240x128xf32, #tpu.memory_space<vmem>>, vector<1x8xf32>
    %c48 = arith.constant 48 : index
    %c0_5 = arith.constant 0 : index
    %3 = vector.load %arg1[%c48, %c0_5] : memref<240x128xf32, #tpu.memory_space<vmem>>, vector<32x16xf32>
    %c80 = arith.constant 80 : index
    %c0_6 = arith.constant 0 : index
    %4 = vector.load %arg1[%c80, %c0_6] : memref<240x128xf32, #tpu.memory_space<vmem>>, vector<1x16xf32>
    %c88 = arith.constant 88 : index
    %c0_7 = arith.constant 0 : index
    %5 = vector.load %arg1[%c88, %c0_7] : memref<240x128xf32, #tpu.memory_space<vmem>>, vector<80x32xf32>
    %c168 = arith.constant 168 : index
    %c0_8 = arith.constant 0 : index
    %6 = vector.load %arg1[%c168, %c0_8] : memref<240x128xf32, #tpu.memory_space<vmem>>, vector<1x32xf32>
    %c176 = arith.constant 176 : index
    %c0_9 = arith.constant 0 : index
    %7 = vector.load %arg1[%c176, %c0_9] : memref<240x128xf32, #tpu.memory_space<vmem>>, vector<32x16xf32>
    %c208 = arith.constant 208 : index
    %c0_10 = arith.constant 0 : index
    %8 = vector.load %arg1[%c208, %c0_10] : memref<240x128xf32, #tpu.memory_space<vmem>>, vector<1x16xf32>
    %c216 = arith.constant 216 : index
    %c0_11 = arith.constant 0 : index
    %9 = vector.load %arg1[%c216, %c0_11] : memref<240x128xf32, #tpu.memory_space<vmem>>, vector<16x1xf32>
    %c232 = arith.constant 232 : index
    %c0_12 = arith.constant 0 : index
    %10 = vector.load %arg1[%c232, %c0_12] : memref<240x128xf32, #tpu.memory_space<vmem>>, vector<1x1xf32>
    %11 = vector.extract_strided_slice %0 {offsets = [0, 0, 0], sizes = [2, 121, 5], strides = [1, 1, 1]} : vector<2x128x5xf32> to vector<2x121x5xf32>
    %12 = vector.extract_strided_slice %0 {offsets = [0, 1, 0], sizes = [2, 121, 5], strides = [1, 1, 1]} : vector<2x128x5xf32> to vector<2x121x5xf32>
    %13 = vector.extract_strided_slice %0 {offsets = [0, 2, 0], sizes = [2, 121, 5], strides = [1, 1, 1]} : vector<2x128x5xf32> to vector<2x121x5xf32>
    %14 = vector.extract_strided_slice %0 {offsets = [0, 3, 0], sizes = [2, 121, 5], strides = [1, 1, 1]} : vector<2x128x5xf32> to vector<2x121x5xf32>
    %15 = vector.extract_strided_slice %0 {offsets = [0, 4, 0], sizes = [2, 121, 5], strides = [1, 1, 1]} : vector<2x128x5xf32> to vector<2x121x5xf32>
    %16 = vector.extract_strided_slice %0 {offsets = [0, 5, 0], sizes = [2, 121, 5], strides = [1, 1, 1]} : vector<2x128x5xf32> to vector<2x121x5xf32>
    %17 = vector.extract_strided_slice %0 {offsets = [0, 6, 0], sizes = [2, 121, 5], strides = [1, 1, 1]} : vector<2x128x5xf32> to vector<2x121x5xf32>
    %18 = vector.extract_strided_slice %0 {offsets = [0, 7, 0], sizes = [2, 121, 5], strides = [1, 1, 1]} : vector<2x128x5xf32> to vector<2x121x5xf32>
    %19 = tpu.concatenate %11, %12, %13, %14, %15, %16, %17, %18 in 2 : vector<2x121x5xf32>, vector<2x121x5xf32>, vector<2x121x5xf32>, vector<2x121x5xf32>, vector<2x121x5xf32>, vector<2x121x5xf32>, vector<2x121x5xf32>, vector<2x121x5xf32> -> vector<2x121x40xf32>
    %20 = vector.shape_cast %19 : vector<2x121x40xf32> to vector<242x40xf32>
    %cst = arith.constant dense<0.000000e+00> : vector<242x8xf32>
    %21 = tpu.matmul %20, %1, %cst {dimension_numbers = #tpu.dot_dimension_numbers<[1], [0], [0], [1], [0, 0, 1, 1], [], []>} : vector<242x40xf32>, vector<40x8xf32>, vector<242x8xf32> -> vector<242x8xf32>
    %22 = vector.broadcast %2 : vector<1x8xf32> to vector<242x8xf32>
    %23 = arith.addf %21, %22 : vector<242x8xf32>
    %cst_13 = arith.constant 0.000000e+00 : f32
    %24 = vector.broadcast %cst_13 : f32 to vector<242x8xf32>
    %25 = arith.maximumf %23, %24 : vector<242x8xf32>
    %26 = vector.shape_cast %25 : vector<242x8xf32> to vector<2x121x8xf32>
    %27 = vector.extract_strided_slice %26 {offsets = [0, 0, 0], sizes = [2, 120, 8], strides = [1, 1, 1]} : vector<2x121x8xf32> to vector<2x120x8xf32>
    %28 = vector.shape_cast %27 : vector<2x120x8xf32> to vector<2x30x4x8xf32>
    %29 = vector.extract_strided_slice %28 {offsets = [0, 0, 0, 0], sizes = [2, 30, 1, 8], strides = [1, 1, 1, 1]} : vector<2x30x4x8xf32> to vector<2x30x1x8xf32>
    %30 = vector.extract_strided_slice %28 {offsets = [0, 0, 1, 0], sizes = [2, 30, 1, 8], strides = [1, 1, 1, 1]} : vector<2x30x4x8xf32> to vector<2x30x1x8xf32>
    %31 = arith.maximumf %29, %30 : vector<2x30x1x8xf32>
    %32 = vector.extract_strided_slice %28 {offsets = [0, 0, 2, 0], sizes = [2, 30, 1, 8], strides = [1, 1, 1, 1]} : vector<2x30x4x8xf32> to vector<2x30x1x8xf32>
    %33 = vector.extract_strided_slice %28 {offsets = [0, 0, 3, 0], sizes = [2, 30, 1, 8], strides = [1, 1, 1, 1]} : vector<2x30x4x8xf32> to vector<2x30x1x8xf32>
    %34 = arith.maximumf %32, %33 : vector<2x30x1x8xf32>
    %35 = arith.maximumf %31, %34 : vector<2x30x1x8xf32>
    %36 = vector.shape_cast %35 : vector<2x30x1x8xf32> to vector<2x30x8xf32>
    %37 = vector.extract_strided_slice %36 {offsets = [0, 0, 0], sizes = [2, 27, 8], strides = [1, 1, 1]} : vector<2x30x8xf32> to vector<2x27x8xf32>
    %38 = vector.extract_strided_slice %36 {offsets = [0, 1, 0], sizes = [2, 27, 8], strides = [1, 1, 1]} : vector<2x30x8xf32> to vector<2x27x8xf32>
    %39 = vector.extract_strided_slice %36 {offsets = [0, 2, 0], sizes = [2, 27, 8], strides = [1, 1, 1]} : vector<2x30x8xf32> to vector<2x27x8xf32>
    %40 = vector.extract_strided_slice %36 {offsets = [0, 3, 0], sizes = [2, 27, 8], strides = [1, 1, 1]} : vector<2x30x8xf32> to vector<2x27x8xf32>
    %41 = tpu.concatenate %37, %38, %39, %40 in 2 : vector<2x27x8xf32>, vector<2x27x8xf32>, vector<2x27x8xf32>, vector<2x27x8xf32> -> vector<2x27x32xf32>
    %42 = vector.shape_cast %41 : vector<2x27x32xf32> to vector<54x32xf32>
    %cst_14 = arith.constant dense<0.000000e+00> : vector<54x16xf32>
    %43 = tpu.matmul %42, %3, %cst_14 {dimension_numbers = #tpu.dot_dimension_numbers<[1], [0], [0], [1], [0, 0, 1, 1], [], []>} : vector<54x32xf32>, vector<32x16xf32>, vector<54x16xf32> -> vector<54x16xf32>
    %44 = vector.broadcast %4 : vector<1x16xf32> to vector<54x16xf32>
    %45 = arith.addf %43, %44 : vector<54x16xf32>
    %cst_15 = arith.constant 0.000000e+00 : f32
    %46 = vector.broadcast %cst_15 : f32 to vector<54x16xf32>
    %47 = arith.maximumf %45, %46 : vector<54x16xf32>
    %48 = vector.shape_cast %47 : vector<54x16xf32> to vector<2x27x16xf32>
    %49 = vector.extract_strided_slice %48 {offsets = [0, 0, 0], sizes = [2, 24, 16], strides = [1, 1, 1]} : vector<2x27x16xf32> to vector<2x24x16xf32>
    %50 = vector.shape_cast %49 : vector<2x24x16xf32> to vector<2x6x4x16xf32>
    %51 = vector.extract_strided_slice %50 {offsets = [0, 0, 0, 0], sizes = [2, 6, 1, 16], strides = [1, 1, 1, 1]} : vector<2x6x4x16xf32> to vector<2x6x1x16xf32>
    %52 = vector.extract_strided_slice %50 {offsets = [0, 0, 1, 0], sizes = [2, 6, 1, 16], strides = [1, 1, 1, 1]} : vector<2x6x4x16xf32> to vector<2x6x1x16xf32>
    %53 = arith.maximumf %51, %52 : vector<2x6x1x16xf32>
    %54 = vector.extract_strided_slice %50 {offsets = [0, 0, 2, 0], sizes = [2, 6, 1, 16], strides = [1, 1, 1, 1]} : vector<2x6x4x16xf32> to vector<2x6x1x16xf32>
    %55 = vector.extract_strided_slice %50 {offsets = [0, 0, 3, 0], sizes = [2, 6, 1, 16], strides = [1, 1, 1, 1]} : vector<2x6x4x16xf32> to vector<2x6x1x16xf32>
    %56 = arith.maximumf %54, %55 : vector<2x6x1x16xf32>
    %57 = arith.maximumf %53, %56 : vector<2x6x1x16xf32>
    %58 = vector.shape_cast %57 : vector<2x6x1x16xf32> to vector<2x6x16xf32>
    %59 = vector.extract_strided_slice %58 {offsets = [0, 0, 0], sizes = [2, 5, 16], strides = [1, 1, 1]} : vector<2x6x16xf32> to vector<2x5x16xf32>
    %60 = vector.extract_strided_slice %58 {offsets = [0, 1, 0], sizes = [2, 5, 16], strides = [1, 1, 1]} : vector<2x6x16xf32> to vector<2x5x16xf32>
    %61 = arith.maximumf %59, %60 : vector<2x5x16xf32>
    %62 = vector.shape_cast %61 : vector<2x5x16xf32> to vector<2x80xf32>
    %cst_16 = arith.constant dense<0.000000e+00> : vector<2x32xf32>
    %63 = tpu.matmul %62, %5, %cst_16 {dimension_numbers = #tpu.dot_dimension_numbers<[1], [0], [0], [1], [0, 0, 1, 1], [], []>} : vector<2x80xf32>, vector<80x32xf32>, vector<2x32xf32> -> vector<2x32xf32>
    %64 = vector.broadcast %6 : vector<1x32xf32> to vector<2x32xf32>
    %65 = arith.addf %63, %64 : vector<2x32xf32>
    %cst_17 = arith.constant 0.000000e+00 : f32
    %66 = vector.broadcast %cst_17 : f32 to vector<2x32xf32>
    %67 = arith.maximumf %65, %66 : vector<2x32xf32>
    %cst_18 = arith.constant dense<0.000000e+00> : vector<2x16xf32>
    %68 = tpu.matmul %67, %7, %cst_18 {dimension_numbers = #tpu.dot_dimension_numbers<[1], [0], [0], [1], [0, 0, 1, 1], [], []>} : vector<2x32xf32>, vector<32x16xf32>, vector<2x16xf32> -> vector<2x16xf32>
    %69 = vector.broadcast %8 : vector<1x16xf32> to vector<2x16xf32>
    %70 = arith.addf %68, %69 : vector<2x16xf32>
    %cst_19 = arith.constant 0.000000e+00 : f32
    %71 = vector.broadcast %cst_19 : f32 to vector<2x16xf32>
    %72 = arith.maximumf %70, %71 : vector<2x16xf32>
    %cst_20 = arith.constant dense<0.000000e+00> : vector<2x1xf32>
    %73 = tpu.matmul %72, %9, %cst_20 {dimension_numbers = #tpu.dot_dimension_numbers<[1], [0], [0], [1], [0, 0, 1, 1], [], []>} : vector<2x16xf32>, vector<16x1xf32>, vector<2x1xf32> -> vector<2x1xf32>
    %74 = vector.broadcast %10 : vector<1x1xf32> to vector<2x1xf32>
    %75 = arith.addf %73, %74 : vector<2x1xf32>
    %cst_21 = arith.constant 0.000000e+00 : f32
    %76 = vector.broadcast %cst_21 : f32 to vector<2x1xf32>
    %77 = arith.maximumf %75, %76 : vector<2x1xf32>
    %c0_22 = arith.constant 0 : index
    %c0_23 = arith.constant 0 : index
    %78 = vector.load %arg2[%c0_22, %c0_23] : memref<2x1xf32, #tpu.memory_space<vmem>>, vector<2x1xf32>
    tpu.vector_store %arg2[%c0_22, %c0_23], %77 {strides = array<i32>} : memref<2x1xf32, #tpu.memory_space<vmem>>, vector<2x1xf32>,
    return
  }
}

</mosaic_0001>

<bundles_post_ra>
// kernel: promoter_forward.1
= control target key start
LH: loop header
LB: loop body
LE: loop exit
PB: predicated region body
PF: predicated region fallthrough
CT: control target
= control target key end

     0   :  { %vm423_vm0 = vcmask 1044480   ;;  %vm105_vm1 = vcmask 1046528   ;;  %vm582_vm2 = vcmask 1043456   ;;  %vm264_vm3 = vcmask 1045504   ;;  %s9798_s15 = smov 15   ;;  %s9799_s16 = smov 5   ;;  %s13841_s0 = inlined_call_operand.vmem [shape: f32[2,128,5], index: 0, kind: input, shape index: {}]   ;;  %s13842_s1 = inlined_call_operand.vmem [shape: f32[240,128], index: 1, kind: input, shape index: {}]   ;;  %s13843_s2 = inlined_call_operand.vmem [shape: f32[2,1], index: 2, kind: output, shape index: {}]  }
   0x1   :  { %v9832_v0 = vld [vmem:[%s13841_s0] sm:$0xff]  ;;  %v9837_v1 = vld [vmem:[%s13841_s0 + $0x8] sm:$0xff]  ;;  %v9850_v10 = vld [vmem:[%s13841_s0 + $0x10] sm:$0xff]  ;;  %vm741_vm4 = vcmask 1042432   ;;  %s9800_s17 = smov 20   ;;  %s9801_s18 = smov 10  }
   0x2   :  { %v424_v2 = vrot.slane %v9832_v0, 3  ;;  %v425_v3 = vrot.slane %v9837_v1, 3  ;;  %v106_v4 = vrot.slane %v9832_v0, 1  ;;  %v107_v5 = vrot.slane %v9837_v1, 1  ;;  %s9802_s19 = smov 25   ;;  %v9878_v28 = vld [vmem:[%s13841_s0 + $0x18] sm:$0xff] }
   0x3   :  { %v583_v6 = vrot.slane %v9832_v0, 4  ;;  %v584_v7 = vrot.slane %v9837_v1, 4  ;;  %v265_v8 = vrot.slane %v9832_v0, 2  ;;  %v266_v9 = vrot.slane %v9837_v1, 2  ;;  %s9803_s22 = smov 30   ;;  %s9804_s23 = smov 35  }
   0x4   :  { %v426_v11 = vsel %vm423_vm0, %v424_v2, %v425_v3  ;;  %v108_v12 = vsel %vm105_vm1, %v106_v4, %v107_v5  ;;  %v742_v13 = vrot.slane %v9832_v0, 5  ;;  %v743_v14 = vrot.slane %v9837_v1, 5  ;;  %v9907_v45 = vld [vmem:[%s13841_s0 + $0x20] sm:$0xff]  ;;  %v9935_v60 = vld [vmem:[%s13841_s0 + $0x28] sm:$0xff]  ;;  %v46_v61 = vld [vmem:[%s13842_s1 + $0x18] sm:$0xff]  ;;  %s9810_s20 = smov 24  }
   0x5   :  { %486 = vrot.lane.b32.xlu1 %v426_v11, %s9798_s15  ;;  %168 = vrot.lane.b32.xlu0 %v108_v12, %s9799_s16  ;;  %v585_v15 = vsel %vm582_vm2, %v583_v6, %v584_v7  ;;  %v267_v16 = vsel %vm264_vm3, %v265_v8, %v266_v9  ;;  %v109_v17 = vrot.slane %v9850_v10, 1  ;;  %v901_v20 = vrot.slane %v9832_v0, 6  ;;  %v47_v54 = vld [vmem:[%s13842_s1 + $0x20] sm:$0xff]  ;;  %v45_v62 = vld [vmem:[%s13842_s1 + $0x10] sm:$0xff]  ;;  %s9811_s12 = smov 32   ;;  %s9812_s13 = smov 48  }
   0x6   :  { %v744_v18 = vsel %vm741_vm4, %v742_v13, %v743_v14  ;;  %v902_v21 = vrot.slane %v9837_v1, 6  ;;  %v268_v22 = vrot.slane %v9850_v10, 2  ;;  %vm900_vm5 = vcmask 1041408   ;;  %v43_v11 = vld [vmem:[%s13842_s1] sm:$0xff] }
   0x7   :  { %v110_v19 = vsel %vm105_vm1, %v107_v5, %v109_v17  ;;  %v1060_v23 = vrot.slane %v9832_v0, 7  ;;  %v1061_v26 = vrot.slane %v9837_v1, 7  ;;  %v427_v27 = vrot.slane %v9850_v10, 3  ;;  %v44_v5 = vld [vmem:[%s13842_s1 + $0x8] sm:$0xff] }
   0x8   :  { %v903_v24 = vsel %vm900_vm5, %v901_v20, %v902_v21  ;;  %v269_v25 = vsel %vm264_vm3, %v266_v9, %v268_v22  ;;  %vm1059_vm6 = vcmask 1040384   ;;  %v111_v31 = vrot.slane %v9878_v28, 1  ;;  %v9989_v20 = vld [vmem:[%s13841_s0 + $0x30] sm:$0xff] }
   0x9   :  { %645 = vrot.lane.b32.xlu1 %v585_v15, %s9800_s17  ;;  %327 = vrot.lane.b32.xlu0 %v267_v16, %s9801_s18  ;;  %v1062_v29 = vsel %vm1059_vm6, %v1060_v23, %v1061_v26  ;;  %v428_v30 = vsel %vm423_vm0, %v425_v3, %v427_v27  ;;  %v586_v32 = vrot.slane %v9850_v10, 4  ;;  %v270_v35 = vrot.slane %v9878_v28, 2 }
   0xa   :  { %v112_v33 = vsel %vm105_vm1, %v109_v17, %v111_v31  ;;  %v745_v36 = vrot.slane %v9850_v10, 5  ;;  %v429_v39 = vrot.slane %v9878_v28, 3  ;;  %v904_v40 = vrot.slane %v9850_v10, 6 }
   0xb   :  { %v587_v34 = vsel %vm582_vm2, %v584_v7, %v586_v32  ;;  %v271_v37 = vsel %vm264_vm3, %v268_v22, %v270_v35  ;;  %v588_v43 = vrot.slane %v9878_v28, 4  ;;  %v1063_v44 = vrot.slane %v9850_v10, 7 }
   0xc   :  { %v746_v38 = vsel %vm741_vm4, %v743_v14, %v745_v36  ;;  %v430_v41 = vsel %vm423_vm0, %v427_v27, %v429_v39  ;;  %v905_v42 = vsel %vm900_vm5, %v902_v21, %v904_v40  ;;  %v747_v48 = vrot.slane %v9878_v28, 5 }
   0xd   :  { %804 = vrot.lane.b32.xlu1 %v744_v18, %s9802_s19  ;;  %170 = vrot.lane.b32.xlu0 %v110_v19, %s9799_s16  ;;  %v589_v46 = vsel %vm582_vm2, %v586_v32, %v588_v43  ;;  %v1064_v47 = vsel %vm1059_vm6, %v1061_v26, %v1063_v44  ;;  %v113_v49 = vrot.slane %v9907_v45, 1  ;;  %v906_v52 = vrot.slane %v9878_v28, 6 }
   0xe   :  { %v748_v50 = vsel %vm741_vm4, %v745_v36, %v747_v48  ;;  %v272_v53 = vrot.slane %v9907_v45, 2  ;;  %v1065_v57 = vrot.slane %v9878_v28, 7  ;;  %v431_v58 = vrot.slane %v9907_v45, 3 }
   0xf   :  { %v114_v51 = vsel %vm105_vm1, %v111_v31, %v113_v49  ;;  %v907_v55 = vsel %vm900_vm5, %v904_v40, %v906_v52  ;;  %v13844_v59 = vmov 0.0   ;;  %v115_v3 = vrot.slane %v9935_v60, 1 }
  0x10   :  { %v273_v56 = vsel %vm264_vm3, %v270_v35, %v272_v53  ;;  %9571 = vmatprep.subr.mxu0 %v13844_v59  ;;  %9744 = vmatprep.subr.mxu1 %v13844_v59  ;;  %v1066_v63 = vsel %vm1059_vm6, %v1063_v44, %v1065_v57  ;;  %v432_v2 = vsel %vm423_vm0, %v429_v39, %v431_v58  ;;  %v590_v4 = vrot.slane %v9907_v45, 4 }
  0x11   :  { %963 = vrot.lane.b32.xlu1 %v903_v24, %s9803_s22  ;;  %329 = vrot.lane.b32.xlu0 %v269_v25, %s9801_s18  ;;  %vm9806_vm7 = vmmov 0   ;;  %v116_v6 = vsel %vm105_vm1, %v113_v49, %v115_v3  ;;  %v274_v8 = vrot.slane %v9935_v60, 2  ;;  %v749_v9 = vrot.slane %v9907_v45, 5 }
  0x12   :  { %9572 = vmatpush3.msra.mxu0 %v47_v54  ;;  %9749 = vmatpush3.msra.mxu1 %v47_v54  ;;  %v591_v7 = vsel %vm582_vm2, %v588_v43, %v590_v4  ;;  %v433_v14 = vrot.slane %v9935_v60, 3  ;;  %v908_v15 = vrot.slane %v9907_v45, 6  ;;  %v592_v18 = vrot.slane %v9935_v60, 4 }
  0x13   :  { %9573 = vmatprep.subr.mxu0 %v13844_v59  ;;  %9745 = vmatprep.subr.mxu1 %v13844_v59  ;;  %v275_v12 = vsel %vm264_vm3, %v272_v53, %v274_v8  ;;  %v750_v13 = vsel %vm741_vm4, %v747_v48, %v749_v9  ;;  %v1067_v19 = vrot.slane %v9907_v45, 7  ;;  %v751_v23 = vrot.slane %v9935_v60, 5 }
  0x14   :  { %9574 = vmatpush3.msra.mxu0 %v46_v61  ;;  %9581 = vmatprep.mubr.msk.f32.mxu0 %vm9806_vm7, %v13844_v59  ;;  %v434_v16 = vsel %vm423_vm0, %v431_v58, %v433_v14  ;;  %v909_v17 = vsel %vm900_vm5, %v906_v52, %v908_v15  ;;  %v593_v21 = vsel %vm582_vm2, %v590_v4, %v592_v18  ;;  %v117_v24 = vrot.slane %v9989_v20, 1  ;;  %v10041_v52 = vld [vmem:[%s13841_s0 + $0x40] sm:$0xff] }
  0x15   :  { %1122 = vrot.lane.b32.xlu1 %v1062_v29, %s9804_s23  ;;  %488 = vrot.lane.b32.xlu0 %v428_v30, %s9798_s15  ;;  %v1068_v22 = vsel %vm1059_vm6, %v1065_v57, %v1067_v19  ;;  %v752_v25 = vsel %vm741_vm4, %v749_v9, %v751_v23  ;;  %v910_v27 = vrot.slane %v9935_v60, 6  ;;  %v276_v29 = vrot.slane %v9989_v20, 2 }
  0x16   :  { %9575 = vmatprep.subr.mxu0 %v13844_v59  ;;  %9750 = vmatpush3.msra.mxu1 %v46_v61  ;;  %v118_v26 = vsel %vm105_vm1, %v115_v3, %v117_v24  ;;  %v1069_v32 = vrot.slane %v9935_v60, 7  ;;  %v439_v4 = vrot.slane %v10041_v52, 3  ;;  %v598_v9 = vrot.slane %v10041_v52, 4 }
  0x17   :  { %9576 = vmatpush3.msra.mxu0 %v45_v62  ;;  %9746 = vmatprep.subr.mxu1 %v13844_v59  ;;  %v911_v30 = vsel %vm900_vm5, %v908_v15, %v910_v27  ;;  %v277_v31 = vsel %vm264_vm3, %v274_v8, %v276_v29  ;;  %vm1218_vm8 = vcmask 39936   ;;  %vm1251_vm9 = vcmask 80896  }
  0x18   :  { %9577 = vmatprep.subr.mxu0 %v13844_v59  ;;  %9751 = vmatpush3.msra.mxu1 %v45_v62  ;;  %v1070_v35 = vsel %vm1059_vm6, %v1067_v19, %v1069_v32  ;;  %v280_v62 = vrot.slane %v10041_v52, 2  ;;  %vm1284_vm10 = vcmask 121856   ;;  %vm1317_vm11 = vcmask 162816  }
  0x19   :  { %172 = vrot.lane.b32.xlu1 %v112_v33, %s9799_s16  ;;  %647 = vrot.lane.b32.xlu0 %v587_v34, %s9800_s17  ;;  %v435_v33 = vrot.slane %v9989_v20, 3  ;;  %v10012_v34 = vld [vmem:[%s13841_s0 + $0x38] sm:$0xff]  ;;  %vm1350_vm12 = vcmask 203776   ;;  %vm1383_vm13 = vcmask 244736   ;;  %vm1416_vm14 = vcmask 285696  }
  0x1a   :  { %9578 = vmatpush3.msra.mxu0 %v44_v5  ;;  %9747 = vmatprep.subr.mxu1 %v13844_v59  ;;  %v914_v61 = vrot.slane %v10012_v34, 6  ;;  %v1073_v3 = vrot.slane %v10012_v34, 7  ;;  %vm4468_vm15 = vcmask 326656  }
  0x1b   :  { %9579 = vmatprep.subr.mxu0 %v13844_v59  ;;  %9752 = vmatpush3.msra.mxu1 %v44_v5  ;;  %v436_v36 = vsel %vm423_vm0, %v433_v14, %v435_v33  ;;  %v10064_v5 = vld [vmem:[%s13841_s0 + $0x48] sm:$0xff]  ;;  %v757_v14 = vrot.slane %v10041_v52, 5 }
  0x1c   :  { %9580 = vmatpush3.msra.mxu0 %v43_v11  ;;  %9748 = vmatprep.subr.mxu1 %v13844_v59  ;;  %v123_v8 = vrot.slane %v10064_v5, 1 }
  0x1d   :  { %331 = vrot.lane.b32.xlu1 %v271_v37, %s9801_s18  ;;  %806 = vrot.lane.b32.xlu0 %v746_v38, %s9802_s19  ;;  %v119_v37 = vrot.slane %v10012_v34, 1  ;;  %v594_v38 = vrot.slane %v9989_v20, 4 }
  0x1e   :  { %9753 = vmatpush3.msra.mxu1 %v43_v11  ;;  %9644 = vmatprep.mubr.msk.f32.mxu1 %vm9806_vm7, %v13844_v59 }
  0x1f   :  { %9674 = vmatprep.subr.mxu1 %v13844_v59  ;;  %v120_v39 = vsel %vm105_vm1, %v117_v24, %v119_v37  ;;  %v595_v40 = vsel %vm582_vm2, %v592_v18, %v594_v38  ;;  %v916_v18 = vrot.slane %v10041_v52, 6  ;;  %v10093_v24 = vld [vmem:[%s13841_s0 + $0x50] sm:$0xff] }
  0x21   :  { %490 = vrot.lane.b32.xlu1 %v430_v41, %s9798_s15  ;;  %965 = vrot.lane.b32.xlu0 %v905_v42, %s9803_s22  ;;  %v278_v41 = vrot.slane %v10012_v34, 2  ;;  %v753_v42 = vrot.slane %v9989_v20, 5 }
  0x23   :  { %v279_v43 = vsel %vm264_vm3, %v276_v29, %v278_v41  ;;  %v754_v44 = vsel %vm741_vm4, %v751_v23, %v753_v42  ;;  %v1075_v23 = vrot.slane %v10041_v52, 7  ;;  %v125_v29 = vrot.slane %v10093_v24, 1 }
  0x25   :  { %649 = vrot.lane.b32.xlu1 %v589_v46, %s9800_s17  ;;  %1124 = vrot.lane.b32.xlu0 %v1064_v47, %s9804_s23  ;;  %v437_v46 = vrot.slane %v10012_v34, 3  ;;  %v912_v47 = vrot.slane %v9989_v20, 6 }
  0x27   :  { %v438_v48 = vsel %vm423_vm0, %v435_v33, %v437_v46  ;;  %v913_v49 = vsel %vm900_vm5, %v910_v27, %v912_v47  ;;  %v1076_v27 = vsel %vm1059_vm6, %v1073_v3, %v1075_v23  ;;  %v126_v33 = vsel %vm105_vm1, %v123_v8, %v125_v29 }
  0x29   :  { %808 = vrot.lane.b32.xlu1 %v748_v50, %s9802_s19  ;;  %174 = vrot.lane.b32.xlu0 %v114_v51, %s9799_s16  ;;  %v596_v50 = vrot.slane %v10012_v34, 4  ;;  %v1071_v51 = vrot.slane %v9989_v20, 7 }
  0x2b   :  { %v597_v53 = vsel %vm582_vm2, %v594_v38, %v596_v50  ;;  %v1072_v54 = vsel %vm1059_vm6, %v1069_v32, %v1071_v51 }
  0x2d   :  { %967 = vrot.lane.b32.xlu1 %v907_v55, %s9803_s22  ;;  %333 = vrot.lane.b32.xlu0 %v273_v56, %s9801_s18  ;;  %v755_v55 = vrot.slane %v10012_v34, 5  ;;  %v121_v56 = vrot.slane %v10041_v52, 1  ;;  %v918_v34 = vrot.slane %v10064_v5, 6 }
  0x2f   :  { %v756_v57 = vsel %vm741_vm4, %v753_v42, %v755_v55  ;;  %v122_v58 = vsel %vm105_vm1, %v119_v37, %v121_v56  ;;  %v124_v11 = vsel %vm105_vm1, %v121_v56, %v123_v8  ;;  %v1485_v42 = vlaneseq }
  0x30   :  { %v602_v56 = vrot.slane %v10093_v24, 4 }
  0x31   :  { %1126 = vrot.lane.b32.xlu1 %v1066_v63, %s9804_s23  ;;  %492 = vrot.lane.b32.xlu0 %v432_v2, %s9798_s15  ;;  %v915_v63 = vsel %vm900_vm5, %v912_v47, %v914_v61  ;;  %v281_v2 = vsel %vm264_vm3, %v278_v41, %v280_v62  ;;  %v1486_v52 = vshrl.u32 %v1485_v42, 7 }
  0x35   :  { %176 = vrot.lane.b32.xlu1 %v116_v6, %s9799_s16  ;;  %651 = vrot.lane.b32.xlu0 %v591_v7, %s9800_s17  ;;  %v1074_v6 = vsel %vm1059_vm6, %v1071_v51, %v1073_v3  ;;  %v440_v7 = vsel %vm423_vm0, %v437_v46, %v439_v4  ;;  %v1077_v46 = vrot.slane %v10064_v5, 7 }
  0x39   :  { %335 = vrot.lane.b32.xlu1 %v275_v12, %s9801_s18  ;;  %810 = vrot.lane.b32.xlu0 %v750_v13, %s9802_s19  ;;  %v599_v12 = vsel %vm582_vm2, %v596_v50, %v598_v9  ;;  %v282_v13 = vrot.slane %v10064_v5, 2 }
  0x3b   :  { %v283_v15 = vsel %vm264_vm3, %v280_v62, %v282_v13 }
  0x3d   :  { %494 = vrot.lane.b32.xlu1 %v434_v16, %s9798_s15  ;;  %969 = vrot.lane.b32.xlu0 %v909_v17, %s9803_s22  ;;  %v758_v16 = vsel %vm741_vm4, %v755_v55, %v757_v14  ;;  %v441_v17 = vrot.slane %v10064_v5, 3 }
  0x3f   :  { %v442_v19 = vsel %vm423_vm0, %v439_v4, %v441_v17 }
  0x41   :  { %653 = vrot.lane.b32.xlu1 %v593_v21, %s9800_s17  ;;  %1128 = vrot.lane.b32.xlu0 %v1068_v22, %s9804_s23  ;;  %v917_v21 = vsel %vm900_vm5, %v914_v61, %v916_v18  ;;  %v600_v22 = vrot.slane %v10064_v5, 4 }
  0x43   :  { %v603_v4 = vsel %vm582_vm2, %v600_v22, %v602_v56 }
  0x45   :  { %812 = vrot.lane.b32.xlu1 %v752_v25, %s9802_s19  ;;  %178 = vrot.lane.b32.xlu0 %v118_v26, %s9799_s16  ;;  %v759_v25 = vrot.slane %v10064_v5, 5  ;;  %v601_v26 = vsel %vm582_vm2, %v598_v9, %v600_v22 }
  0x47   :  { %v760_v32 = vsel %vm741_vm4, %v757_v14, %v759_v25 }
  0x49   :  { %971 = vrot.lane.b32.xlu1 %v911_v30, %s9803_s22  ;;  %337 = vrot.lane.b32.xlu0 %v277_v31, %s9801_s18 }
  0x4d   :  { %1130 = vrot.lane.b32.xlu1 %v1070_v35, %s9804_s23  ;;  %496 = vrot.lane.b32.xlu0 %v436_v36, %s9798_s15  ;;  %v284_v35 = vrot.slane %v10093_v24, 2 }
  0x51   :  { %180 = vrot.lane.b32.xlu1 %v120_v39, %s9799_s16  ;;  %655 = vrot.lane.b32.xlu0 %v595_v40, %s9800_s17  ;;  %v9807_v40 = vmov 1966171168  }
  0x52   :  { %v1483_v41 = vunpack.c.l.s4 %v9807_v40 }
  0x54   :  { %v1484_v51 = vunpack.c.0.s8 %v1483_v41 }
  0x55   :  { %339 = vrot.lane.b32.xlu1 %v279_v43, %s9801_s18  ;;  %814 = vrot.lane.b32.xlu0 %v754_v44, %s9802_s19  ;;  %v919_v43 = vsel %vm900_vm5, %v916_v18, %v918_v34  ;;  %v285_v44 = vsel %vm264_vm3, %v282_v13, %v284_v35 }
  0x56   :  { %v10139_v62 = vsub.s32 %v1484_v51, %v1486_v52 }
  0x59   :  { %498 = vrot.lane.b32.xlu1 %v438_v48, %s9798_s15  ;;  %973 = vrot.lane.b32.xlu0 %v913_v49, %s9803_s22  ;;  %v10125_v49 = vld [vmem:[%s13841_s0 + $0x58] sm:$0xff] }
  0x5a   :  { %v127_v55 = vrot.slane %v10125_v49, 1  ;;  %v763_v40 = vrot.slane %v10125_v49, 5 }
  0x5c   :  { %v128_v3 = vsel %vm105_vm1, %v125_v29, %v127_v55 }
  0x5d   :  { %657 = vrot.lane.b32.xlu1 %v597_v53, %s9800_s17  ;;  %1132 = vrot.lane.b32.xlu0 %v1072_v54, %s9804_s23  ;;  %v1078_v53 = vsel %vm1059_vm6, %v1075_v23, %v1077_v46 }
  0x61   :  { %816 = vrot.lane.b32.xlu1 %v756_v57, %s9802_s19  ;;  %182 = vrot.lane.b32.xlu0 %v122_v58, %s9799_s16 }
  0x65   :  { %975 = vrot.lane.b32.xlu1 %v915_v63, %s9803_s22  ;;  %341 = vrot.lane.b32.xlu0 %v281_v2, %s9801_s18  ;;  %v286_v63 = vrot.slane %v10125_v49, 2 }
  0x67   :  { %v287_v14 = vsel %vm264_vm3, %v284_v35, %v286_v63 }
  0x69   :  { %1134 = vrot.lane.b32.xlu1 %v1074_v6, %s9804_s23  ;;  %500 = vrot.lane.b32.xlu0 %v440_v7, %s9798_s15  ;;  %v761_v6 = vrot.slane %v10093_v24, 5 }
  0x6d   :  { %184 = vrot.lane.b32.xlu1 %v124_v11, %s9799_s16  ;;  %659 = vrot.lane.b32.xlu0 %v599_v12, %s9800_s17 }
  0x71   :  { %343 = vrot.lane.b32.xlu1 %v283_v15, %s9801_s18  ;;  %818 = vrot.lane.b32.xlu0 %v758_v16, %s9802_s19  ;;  %v762_v15 = vsel %vm741_vm4, %v759_v25, %v761_v6  ;;  %v445_v16 = vrot.slane %v10125_v49, 3 }
  0x75   :  { %502 = vrot.lane.b32.xlu1 %v442_v19, %s9798_s15  ;;  %977 = vrot.lane.b32.xlu0 %v917_v21, %s9803_s22 }
  0x77   :  { %v487_v30 = vpop.permute.xlu1 %486  ;;  %v169_v31 = vpop.permute.xlu0 %168 }
  0x78   :  { %v1219_v38 = vsel %vm1218_vm8, %v9832_v0, %v169_v31  ;;  %v443_v0 = vrot.slane %v10093_v24, 3  ;;  %v1079_v31 = vrot.slane %v10093_v24, 7 }
  0x79   :  { %661 = vrot.lane.b32.xlu1 %v601_v26, %s9800_s17  ;;  %1136 = vrot.lane.b32.xlu0 %v1076_v27, %s9804_s23 }
  0x7a   :  { %v444_v54 = vsel %vm423_vm0, %v441_v17, %v443_v0  ;;  %v920_v17 = vrot.slane %v10093_v24, 6  ;;  %v446_v25 = vsel %vm423_vm0, %v443_v0, %v445_v16 }
  0x7b   :  { %v646_v36 = vpop.permute.xlu1 %645  ;;  %v328_v37 = vpop.permute.xlu0 %327 }
  0x7c   :  { %v1252_v39 = vsel %vm1251_vm9, %v1219_v38, %v328_v37  ;;  %v921_v29 = vsel %vm900_vm5, %v918_v34, %v920_v17 }
  0x7d   :  { %820 = vrot.lane.b32.xlu1 %v760_v32, %s9802_s19  ;;  %186 = vrot.lane.b32.xlu0 %v126_v33, %s9799_s16  ;;  %v1285_v50 = vsel %vm1284_vm10, %v1252_v39, %v487_v30  ;;  %v604_v30 = vrot.slane %v10125_v49, 4  ;;  %v10181_v39 = vld [vmem:[%s13841_s0 + $0x60] sm:$0xff] }
  0x7e   :  { %v1318_v57 = vsel %vm1317_vm11, %v1285_v50, %v646_v36  ;;  %v129_v50 = vrot.slane %v10181_v39, 1 }
  0x7f   :  { %v805_v47 = vpop.permute.xlu1 %804  ;;  %v10120_v48 = vpop.permute.xlu0 %170  ;;  %v605_v0 = vsel %vm582_vm2, %v602_v56, %v604_v30 }
  0x80   :  { %v1351_v2 = vsel %vm1350_vm12, %v1318_v57, %v805_v47  ;;  %v1080_v47 = vsel %vm1059_vm6, %v1077_v46, %v1079_v31 }
  0x81   :  { %979 = vrot.lane.b32.xlu1 %v919_v43, %s9803_s22  ;;  %345 = vrot.lane.b32.xlu0 %v285_v44, %s9801_s18  ;;  %v1220_v44 = vsel %vm1218_vm8, %v9837_v1, %v10120_v48 }
  0x83   :  { %v964_v58 = vpop.permute.xlu1 %963  ;;  %v330_v61 = vpop.permute.xlu0 %329 }
  0x84   :  { %v1384_v7 = vsel %vm1383_vm13, %v1351_v2, %v964_v58  ;;  %v1253_v51 = vsel %vm1251_vm9, %v1220_v44, %v330_v61  ;;  %v764_v58 = vsel %vm741_vm4, %v761_v6, %v763_v40  ;;  %v130_v61 = vsel %vm105_vm1, %v127_v55, %v129_v50 }
  0x85   :  { %1138 = vrot.lane.b32.xlu1 %v1078_v53, %s9804_s23  ;;  %504 = vrot.lane.b32.xlu0 %v444_v54, %s9798_s15  ;;  %v922_v2 = vrot.slane %v10125_v49, 6 }
  0x87   :  { %v1123_v8 = vpop.permute.xlu1 %1122  ;;  %v489_v9 = vpop.permute.xlu0 %488 }
  0x88   :  { %v1417_v11 = vsel %vm1416_vm14, %v1384_v7, %v1123_v8  ;;  %v1286_v57 = vsel %vm1284_vm10, %v1253_v51, %v489_v9 }
  0x89   :  { %v1481_v12 = vcombine.high %v1417_v11, %v1417_v11  ;;  %v1488_v13 = vrot.slane %v1417_v11, %v10139_v62  ;;  %188 = vrot.lane.b32.xlu1 %v128_v3, %s9799_s16  ;;  %663 = vrot.lane.b32.xlu0 %v603_v4, %s9800_s17  ;;  %v288_v11 = vrot.slane %v10181_v39, 2 }
  0x8b   :  { %v1495_v18 = vrot.slane %v1481_v12, %v10139_v62  ;;  %v1496_v19 = vcombine.high %v1488_v13, %v1488_v13  ;;  %v173_v21 = vpop.permute.xlu1 %172  ;;  %v648_v22 = vpop.permute.xlu0 %647  ;;  %v1504_v26 = vrot.slane %v1488_v13, %v10139_v62 }
  0x8c   :  { %v1319_v56 = vsel %vm1317_vm11, %v1286_v57, %v648_v22  ;;  %v447_v22 = vrot.slane %v10181_v39, 3 }
  0x8d   :  { %v1497_v23 = vcombine.high %v1495_v18, %v1495_v18  ;;  %v1518_v27 = vrot.slane %v1496_v19, %v10139_v62  ;;  %347 = vrot.lane.b32.xlu1 %v287_v14, %s9801_s18  ;;  %822 = vrot.lane.b32.xlu0 %v762_v15, %s9802_s19  ;;  %v1511_v32 = vrot.slane %v1495_v18, %v10139_v62  ;;  %v10227_v14 = vld [vmem:[%s13841_s0 + $0x68] sm:$0xff]  ;;  %v1081_v19 = vrot.slane %v10125_v49, 7 }
  0x8e   :  { %v1221_v15 = vsel %vm1218_vm8, %v9850_v10, %v173_v21  ;;  %v923_v18 = vsel %vm900_vm5, %v920_v17, %v922_v2  ;;  %v289_v10 = vsel %vm264_vm3, %v286_v63, %v288_v11  ;;  %v131_v21 = vrot.slane %v10227_v14, 1 }
  0x8f   :  { %v1525_v33 = vrot.slane %v1497_v23, %v10139_v62  ;;  %v2983_v35 = vcombine.low %v1504_v26, %v1518_v27  ;;  %v9424_v36 = vcombine.high %v1504_v26, %v1518_v27  ;;  %v332_v37 = vpop.permute.xlu1 %331  ;;  %v807_v38 = vpop.permute.xlu0 %806  ;;  %v1082_v63 = vsel %vm1059_vm6, %v1079_v31, %v1081_v19 }
  0x90   :  { %v1352_v46 = vsel %vm1350_vm12, %v1319_v56, %v807_v38  ;;  %v1254_v17 = vsel %vm1251_vm9, %v1221_v15, %v332_v37  ;;  %v606_v37 = vrot.slane %v10181_v39, 4  ;;  %v290_v31 = vrot.slane %v10227_v14, 2 }
  0x91   :  { %v2985_v34 = vcombine.low %v1511_v32, %v1525_v33  ;;  %v9425_v41 = vcombine.high %v1511_v32, %v1525_v33  ;;  %v2993_v42 = vrot.slane %v2983_v35, %v10139_v62  ;;  %v3000_v43 = vrot.slane %v9424_v36, %v10139_v62  ;;  %506 = vrot.lane.b32.xlu1 %v446_v25, %s9798_s15 }
  0x92   :  { %981 = vrot.lane.b32.xlu0 %v921_v29, %s9803_s22  ;;  %v448_v36 = vsel %vm423_vm0, %v445_v16, %v447_v22 }
  0x93   :  { %v3007_v52 = vrot.slane %v2985_v34, %v10139_v62  ;;  %v3014_v1 = vrot.slane %v9425_v41, %v10139_v62  ;;  %v3015_v48 = vcombine.low %v2993_v42, %v3000_v43  ;;  %v491_v53 = vpop.permute.xlu1 %490  ;;  %v966_v54 = vpop.permute.xlu0 %965 }
  0x94   :  { %v1385_v3 = vsel %vm1383_vm13, %v1352_v46, %v966_v54  ;;  %v1287_v35 = vsel %vm1284_vm10, %v1254_v17, %v491_v53  ;;  %v765_v53 = vrot.slane %v10181_v39, 5  ;;  %v608_v17 = vrot.slane %v10227_v14, 4 }
  0x95   :  { %665 = vrot.lane.b32.xlu1 %v605_v0, %s9800_s17  ;;  %v3016_v5 = vcombine.low %v3007_v52, %v3014_v1  ;;  %v3023_v8 = vrot.slane %v3015_v48, %v10139_v62  ;;  %v132_v1 = vsel %vm105_vm1, %v129_v50, %v131_v21  ;;  %v607_v48 = vsel %vm582_vm2, %v604_v30, %v606_v37 }
  0x96   :  { %1140 = vrot.lane.b32.xlu0 %v1080_v47, %s9804_s23  ;;  %v291_v30 = vsel %vm264_vm3, %v288_v11, %v290_v31 }
  0x97   :  { %v650_v4 = vpop.permute.xlu1 %649  ;;  %v1125_v7 = vpop.permute.xlu0 %1124  ;;  %v3030_v9 = vrot.slane %v3016_v5, %v10139_v62 }
  0x98   :  { %v1418_v6 = vsel %vm1416_vm14, %v1385_v3, %v1125_v7  ;;  %v1320_v24 = vsel %vm1317_vm11, %v1287_v35, %v650_v4  ;;  %v766_v7 = vsel %vm741_vm4, %v763_v40, %v765_v53 }
  0x99   :  { %v1530_v12 = vcombine.high %v1418_v6, %v1418_v6  ;;  %v1537_v13 = vrot.slane %v1418_v6, %v10139_v62  ;;  %824 = vrot.lane.b32.xlu1 %v764_v58, %s9802_s19  ;;  %v3031_v55 = vcombine.low %v3023_v8, %v3030_v9  ;;  %v449_v8 = vrot.slane %v10227_v14, 3 }
  0x9a   :  { %190 = vrot.lane.b32.xlu0 %v130_v61, %s9799_s16  ;;  %v924_v9 = vrot.slane %v10181_v39, 6 }
  0x9b   :  { %v1544_v23 = vrot.slane %v1530_v12, %v10139_v62  ;;  %v1545_v26 = vcombine.high %v1537_v13, %v1537_v13  ;;  %v809_v27 = vpop.permute.xlu1 %808  ;;  %9582 = vmatmul.mubr.msk.f32.vlgmr.msra.gmra.mxu0 %vm4468_vm15, %v3031_v55  ;;  %v10241_v25 = vpop.permute.xlu0 %174  ;;  %v1553_v32 = vrot.slane %v1537_v13, %v10139_v62 }
  0x9c   :  { %9584 = vmatprep.mubr.msk.f32.mxu0 %vm9806_vm7, %v13844_v59  ;;  %v1353_v52 = vsel %vm1350_vm12, %v1320_v24, %v809_v27  ;;  %v450_v27 = vsel %vm423_vm0, %v447_v22, %v449_v8  ;;  %v1222_v24 = vsel %vm1218_vm8, %v9878_v28, %v10241_v25 }
  0x9d   :  { %v1546_v29 = vcombine.high %v1544_v23, %v1544_v23  ;;  %v1567_v33 = vrot.slane %v1545_v26, %v10139_v62  ;;  %983 = vrot.lane.b32.xlu1 %v923_v18, %s9803_s22  ;;  %v1560_v38 = vrot.slane %v1544_v23, %v10139_v62 }
  0x9e   :  { %349 = vrot.lane.b32.xlu0 %v289_v10, %s9801_s18  ;;  %v925_v10 = vsel %vm900_vm5, %v922_v2, %v924_v9  ;;  %v767_v2 = vrot.slane %v10227_v14, 5 }
  0x9f   :  { %v1574_v34 = vrot.slane %v1546_v29, %v10139_v62  ;;  %v3032_v41 = vcombine.low %v1553_v32, %v1567_v33  ;;  %v9426_v42 = vcombine.high %v1553_v32, %v1567_v33  ;;  %v968_v43 = vpop.permute.xlu1 %967  ;;  %v10268_v44 = vpop.permute.xlu0 %333  ;;  %v1083_v29 = vrot.slane %v10181_v39, 7  ;;  %v10398_v39 = vld [vmem:[%s13841_s0 + $0x78] sm:$0xff] }
  0xa0   :  { %v1386_v5 = vsel %vm1383_vm13, %v1353_v52, %v968_v43 }
  0xa1   :  { %v3034_v0 = vcombine.low %v1560_v38, %v1574_v34  ;;  %v9427_v47 = vcombine.high %v1560_v38, %v1574_v34  ;;  %v3042_v51 = vrot.slane %v3032_v41, %v10139_v62  ;;  %v3049_v16 = vrot.slane %v9426_v42, %v10139_v62  ;;  %1142 = vrot.lane.b32.xlu1 %v1082_v63, %s9804_s23  ;;  %v10330_v38 = vld [vmem:[%s13841_s0 + $0x70] sm:$0xff] }
  0xa2   :  { %508 = vrot.lane.b32.xlu0 %v448_v36, %s9798_s15 }
  0xa3   :  { %v3056_v54 = vrot.slane %v3034_v0, %v10139_v62  ;;  %v3063_v57 = vrot.slane %v9427_v47, %v10139_v62  ;;  %v3064_v56 = vcombine.low %v3042_v51, %v3049_v16  ;;  %v1127_v46 = vpop.permute.xlu1 %1126  ;;  %v493_v58 = vpop.permute.xlu0 %492  ;;  %v609_v0 = vsel %vm582_vm2, %v606_v37, %v608_v17 }
  0xa4   :  { %v1419_v61 = vsel %vm1416_vm14, %v1386_v5, %v1127_v46  ;;  %v1084_v47 = vsel %vm1059_vm6, %v1081_v19, %v1083_v29  ;;  %v133_v51 = vrot.slane %v10330_v38, 1  ;;  %v1255_v16 = vsel %vm1251_vm9, %v1222_v24, %v10268_v44 }
  0xa5   :  { %v1579_v50 = vcombine.high %v1419_v61, %v1419_v61  ;;  %v1586_v3 = vrot.slane %v1419_v61, %v10139_v62  ;;  %192 = vrot.lane.b32.xlu1 %v132_v1, %s9799_s16  ;;  %v3065_v4 = vcombine.low %v3056_v54, %v3063_v57  ;;  %v3072_v15 = vrot.slane %v3064_v56, %v10139_v62 }
  0xa6   :  { %667 = vrot.lane.b32.xlu0 %v607_v48, %s9800_s17  ;;  %v1288_v54 = vsel %vm1284_vm10, %v1255_v16, %v493_v58  ;;  %v768_v44 = vsel %vm741_vm4, %v765_v53, %v767_v2  ;;  %v134_v57 = vsel %vm105_vm1, %v131_v21, %v133_v51  ;;  %v926_v56 = vrot.slane %v10227_v14, 6 }
  0xa7   :  { %v1593_v6 = vrot.slane %v1579_v50, %v10139_v62  ;;  %v1594_v12 = vcombine.high %v1586_v3, %v1586_v3  ;;  %v177_v13 = vpop.permute.xlu1 %176  ;;  %v652_v55 = vpop.permute.xlu0 %651  ;;  %v3079_v18 = vrot.slane %v3065_v4, %v10139_v62  ;;  %v1602_v23 = vrot.slane %v1586_v3, %v10139_v62 }
  0xa8   :  { %v1321_v37 = vsel %vm1317_vm11, %v1288_v54, %v652_v55  ;;  %v292_v3 = vrot.slane %v10330_v38, 2  ;;  %v1085_v4 = vrot.slane %v10227_v14, 7  ;;  %v451_v55 = vrot.slane %v10330_v38, 3 }
  0xa9   :  { %v1595_v11 = vcombine.high %v1593_v6, %v1593_v6  ;;  %v1616_v26 = vrot.slane %v1594_v12, %v10139_v62  ;;  %351 = vrot.lane.b32.xlu1 %v291_v30, %s9801_s18  ;;  %v3080_v40 = vcombine.low %v3072_v15, %v3079_v18  ;;  %v1609_v32 = vrot.slane %v1593_v6, %v10139_v62 }
  0xaa   :  { %826 = vrot.lane.b32.xlu0 %v766_v7, %s9802_s19  ;;  %v1223_v6 = vsel %vm1218_vm8, %v9907_v45, %v177_v13  ;;  %v927_v12 = vsel %vm900_vm5, %v924_v9, %v926_v56  ;;  %v293_v45 = vsel %vm264_vm3, %v290_v31, %v292_v3  ;;  %v1086_v9 = vsel %vm1059_vm6, %v1083_v29, %v1085_v4 }
  0xab   :  { %v1623_v33 = vrot.slane %v1595_v11, %v10139_v62  ;;  %v3081_v35 = vcombine.low %v1602_v23, %v1616_v26  ;;  %v9428_v63 = vcombine.high %v1602_v23, %v1616_v26  ;;  %v336_v36 = vpop.permute.xlu1 %335  ;;  %9585 = vmatmul.mubr.msk.f32.gmra.mxu0 %vm4468_vm15, %v3080_v40  ;;  %v811_v22 = vpop.permute.xlu0 %810  ;;  %v135_v29 = vrot.slane %v10398_v39, 1 }
  0xac   :  { %9587 = vmatprep.mubr.msk.f32.mxu0 %vm9806_vm7, %v13844_v59  ;;  %v1354_v19 = vsel %vm1350_vm12, %v1321_v37, %v811_v22  ;;  %v1256_v13 = vsel %vm1251_vm9, %v1223_v6, %v336_v36 }
  0xad   :  { %v3083_v34 = vcombine.low %v1609_v32, %v1623_v33  ;;  %v9429_v41 = vcombine.high %v1609_v32, %v1623_v33  ;;  %v3091_v42 = vrot.slane %v3081_v35, %v10139_v62  ;;  %v3098_v43 = vrot.slane %v9428_v63, %v10139_v62  ;;  %510 = vrot.lane.b32.xlu1 %v450_v27, %s9798_s15 }
  0xae   :  { %985 = vrot.lane.b32.xlu0 %v925_v10, %s9803_s22  ;;  %v452_v10 = vsel %vm423_vm0, %v449_v8, %v451_v55  ;;  %v610_v32 = vrot.slane %v10330_v38, 4  ;;  %v136_v16 = vsel %vm105_vm1, %v133_v51, %v135_v29  ;;  %v10446_v51 = vld [vmem:[%s13841_s0 + $0xa8] sm:$0xff] }
  0xaf   :  { %v3105_v52 = vrot.slane %v3083_v34, %v10139_v62  ;;  %v3112_v28 = vrot.slane %v9429_v41, %v10139_v62  ;;  %v3113_v25 = vcombine.low %v3091_v42, %v3098_v43  ;;  %v495_v1 = vpop.permute.xlu1 %494  ;;  %v970_v48 = vpop.permute.xlu0 %969  ;;  %v294_v42 = vrot.slane %v10398_v39, 2 }
  0xb0   :  { %v1387_v5 = vsel %vm1383_vm13, %v1354_v19, %v970_v48  ;;  %v1289_v31 = vsel %vm1284_vm10, %v1256_v13, %v495_v1 }
  0xb1   :  { %669 = vrot.lane.b32.xlu1 %v609_v0, %s9800_s17  ;;  %v3114_v49 = vcombine.low %v3105_v52, %v3112_v28  ;;  %v3121_v61 = vrot.slane %v3113_v25, %v10139_v62  ;;  %v611_v52 = vsel %vm582_vm2, %v608_v17, %v610_v32  ;;  %v769_v28 = vrot.slane %v10330_v38, 5  ;;  %v10451_v17 = vld [vmem:[%s13841_s0 + $0xb0] sm:$0xff] }
  0xb2   :  { %1144 = vrot.lane.b32.xlu0 %v1084_v47, %s9804_s23 }
  0xb3   :  { %v654_v46 = vpop.permute.xlu1 %653  ;;  %v1129_v58 = vpop.permute.xlu0 %1128  ;;  %v3128_v50 = vrot.slane %v3114_v49, %v10139_v62 }
  0xb4   :  { %v1420_v53 = vsel %vm1416_vm14, %v1387_v5, %v1129_v58  ;;  %v1322_v41 = vsel %vm1317_vm11, %v1289_v31, %v654_v46  ;;  %v295_v5 = vsel %vm264_vm3, %v292_v3, %v294_v42  ;;  %v770_v58 = vsel %vm741_vm4, %v767_v2, %v769_v28 }
  0xb5   :  { %v1628_v30 = vcombine.high %v1420_v53, %v1420_v53  ;;  %v1635_v7 = vrot.slane %v1420_v53, %v10139_v62  ;;  %828 = vrot.lane.b32.xlu1 %v768_v44, %s9802_s19  ;;  %v3129_v21 = vcombine.low %v3121_v61, %v3128_v50  ;;  %v146_v61 = vrot.slane %v10446_v51, 1 }
  0xb6   :  { %194 = vrot.lane.b32.xlu0 %v134_v57, %s9799_s16  ;;  %v148_v50 = vrot.slane %v10451_v17, 1  ;;  %v928_v53 = vrot.slane %v10330_v38, 6 }
  0xb7   :  { %v1642_v15 = vrot.slane %v1628_v30, %v10139_v62  ;;  %v1643_v18 = vcombine.high %v1635_v7, %v1635_v7  ;;  %v813_v11 = vpop.permute.xlu1 %812  ;;  %9588 = vmatmul.mubr.msk.f32.gmra.mxu0 %vm4468_vm15, %v3129_v21  ;;  %v10390_v23 = vpop.permute.xlu0 %178  ;;  %v1651_v40 = vrot.slane %v1635_v7, %v10139_v62 }
  0xb8   :  { %9590 = vmatprep.mubr.msk.f32.mxu0 %vm9806_vm7, %v13844_v59  ;;  %v1355_v47 = vsel %vm1350_vm12, %v1322_v41, %v813_v11  ;;  %v929_v13 = vsel %vm900_vm5, %v926_v56, %v928_v53  ;;  %v612_v56 = vrot.slane %v10398_v39, 4 }
  0xb9   :  { %v1644_v26 = vcombine.high %v1642_v15, %v1642_v15  ;;  %v1665_v27 = vrot.slane %v1643_v18, %v10139_v62  ;;  %987 = vrot.lane.b32.xlu1 %v927_v12, %s9803_s22  ;;  %v1658_v33 = vrot.slane %v1642_v15, %v10139_v62  ;;  %v1087_v15 = vrot.slane %v10330_v38, 7  ;;  %v9770_v38 = vld [vmem:[%s13841_s0 + $0x38] sm:$0xff] }
  0xba   :  { %353 = vrot.lane.b32.xlu0 %v293_v45, %s9801_s18 }
  0xbb   :  { %v1672_v35 = vrot.slane %v1644_v26, %v10139_v62  ;;  %v3130_v63 = vcombine.low %v1651_v40, %v1665_v27  ;;  %v9430_v36 = vcombine.high %v1651_v40, %v1665_v27  ;;  %v972_v22 = vpop.permute.xlu1 %971  ;;  %v10420_v34 = vpop.permute.xlu0 %337  ;;  %v453_v26 = vrot.slane %v10398_v39, 3 }
  0xbc   :  { %v1388_v54 = vsel %vm1383_vm13, %v1355_v47, %v972_v22 }
  0xbd   :  { %v3132_v43 = vcombine.low %v1658_v33, %v1672_v35  ;;  %v9431_v24 = vcombine.high %v1658_v33, %v1672_v35  ;;  %v3140_v8 = vrot.slane %v3130_v63, %v10139_v62  ;;  %v3147_v0 = vrot.slane %v9430_v36, %v10139_v62  ;;  %1146 = vrot.lane.b32.xlu1 %v1086_v9, %s9804_s23 }
  0xbe   :  { %512 = vrot.lane.b32.xlu0 %v452_v10, %s9798_s15  ;;  %v149_v9 = vsel %vm105_vm1, %v146_v61, %v148_v50  ;;  %v1088_v63 = vsel %vm1059_vm6, %v1085_v4, %v1087_v15  ;;  %v454_v14 = vsel %vm423_vm0, %v451_v55, %v453_v26  ;;  %v305_v4 = vrot.slane %v10446_v51, 2  ;;  %v10526_v55 = vld [vmem:[%s13841_s0 + $0x80] sm:$0xff] }
  0xbf   :  { %v3154_v25 = vrot.slane %v3132_v43, %v10139_v62  ;;  %v3161_v1 = vrot.slane %v9431_v24, %v10139_v62  ;;  %v3162_v48 = vcombine.low %v3140_v8, %v3147_v0  ;;  %v1131_v37 = vpop.permute.xlu1 %1130  ;;  %v497_v49 = vpop.permute.xlu0 %496  ;;  %v1224_v24 = vsel %vm1218_vm8, %v9935_v60, %v10390_v23 }
  0xc0   :  { %v1421_v19 = vsel %vm1416_vm14, %v1388_v54, %v1131_v37  ;;  %v307_v8 = vrot.slane %v10451_v17, 2  ;;  %v1257_v0 = vsel %vm1251_vm9, %v1224_v24, %v10420_v34  ;;  %v10532_v34 = vld [vmem:[%s13841_s0 + $0x88] sm:$0xff]  ;;  %v613_v54 = vsel %vm582_vm2, %v610_v32, %v612_v56 }
  0xc1   :  { %v1677_v44 = vcombine.high %v1421_v19, %v1421_v19  ;;  %v1684_v57 = vrot.slane %v1421_v19, %v10139_v62  ;;  %196 = vrot.lane.b32.xlu1 %v136_v16, %s9799_s16  ;;  %v3163_v46 = vcombine.low %v3154_v25, %v3161_v1  ;;  %v3170_v6 = vrot.slane %v3162_v48, %v10139_v62  ;;  %v10521_v25 = vld [vmem:[%s13841_s0 + $0xb8] sm:$0xff] }
  0xc2   :  { %671 = vrot.lane.b32.xlu0 %v611_v52, %s9800_s17  ;;  %v1290_v1 = vsel %vm1284_vm10, %v1257_v0, %v497_v49  ;;  %v308_v49 = vsel %vm264_vm3, %v305_v4, %v307_v8 }
  0xc3   :  { %v1691_v30 = vrot.slane %v1677_v44, %v10139_v62  ;;  %v1692_v7 = vcombine.high %v1684_v57, %v1684_v57  ;;  %v10469_v21 = vpop.permute.xlu1 %180  ;;  %v656_v3 = vpop.permute.xlu0 %655  ;;  %v3177_v12 = vrot.slane %v3163_v46, %v10139_v62  ;;  %v1700_v2 = vrot.slane %v1684_v57, %v10139_v62 }
  0xc4   :  { %v1323_v48 = vsel %vm1317_vm11, %v1290_v1, %v656_v3  ;;  %v150_v44 = vrot.slane %v10521_v25, 1  ;;  %v137_v57 = vrot.slane %v10526_v55, 1  ;;  %v930_v1 = vrot.slane %v10398_v39, 6 }
  0xc5   :  { %v1693_v18 = vcombine.high %v1691_v30, %v1691_v30  ;;  %v1714_v11 = vrot.slane %v1692_v7, %v10139_v62  ;;  %355 = vrot.lane.b32.xlu1 %v295_v5, %s9801_s18  ;;  %v3178_v45 = vcombine.low %v3170_v6, %v3177_v12  ;;  %v1707_v40 = vrot.slane %v1691_v30, %v10139_v62 }
  0xc6   :  { %830 = vrot.lane.b32.xlu0 %v770_v58, %s9802_s19  ;;  %v138_v7 = vrot.slane %v10532_v34, 1  ;;  %v771_v6 = vrot.slane %v10398_v39, 5 }
  0xc7   :  { %v1721_v27 = vrot.slane %v1693_v18, %v10139_v62  ;;  %v3179_v31 = vcombine.low %v1700_v2, %v1714_v11  ;;  %v9432_v10 = vcombine.high %v1700_v2, %v1714_v11  ;;  %v340_v33 = vpop.permute.xlu1 %339  ;;  %9591 = vmatmul.mubr.msk.f32.gmra.mxu0 %vm4468_vm15, %v3178_v45  ;;  %v815_v35 = vpop.permute.xlu0 %814  ;;  %v1225_v11 = vsel %vm1218_vm8, %v9989_v20, %v10469_v21 }
  0xc8   :  { %9593 = vmatprep.mubr.msk.f32.mxu0 %vm9806_vm7, %v13844_v59  ;;  %v1356_v19 = vsel %vm1350_vm12, %v1323_v48, %v815_v35  ;;  %v151_v45 = vsel %vm105_vm1, %v148_v50, %v150_v44  ;;  %v139_v20 = vsel %vm105_vm1, %v137_v57, %v138_v7  ;;  %v772_v50 = vsel %vm741_vm4, %v769_v28, %v771_v6 }
  0xc9   :  { %v3181_v36 = vcombine.low %v1707_v40, %v1721_v27  ;;  %v9433_v22 = vcombine.high %v1707_v40, %v1721_v27  ;;  %v3189_v41 = vrot.slane %v3179_v31, %v10139_v62  ;;  %v3196_v43 = vrot.slane %v9432_v10, %v10139_v62  ;;  %210 = vrot.lane.b32.xlu1 %v149_v9, %s9799_s16 }
  0xca   :  { %989 = vrot.lane.b32.xlu0 %v929_v13, %s9803_s22  ;;  %v464_v9 = vrot.slane %v10446_v51, 3  ;;  %v466_v13 = vrot.slane %v10451_v17, 3  ;;  %v309_v21 = vrot.slane %v10521_v25, 2  ;;  %v1258_v35 = vsel %vm1251_vm9, %v1225_v11, %v340_v33 }
  0xcb   :  { %v3203_v47 = vrot.slane %v3181_v36, %v10139_v62  ;;  %v3210_v16 = vrot.slane %v9433_v22, %v10139_v62  ;;  %v3211_v60 = vcombine.low %v3189_v41, %v3196_v43  ;;  %v499_v23 = vpop.permute.xlu1 %498  ;;  %v974_v52 = vpop.permute.xlu0 %973  ;;  %v296_v43 = vrot.slane %v10526_v55, 2 }
  0xcc   :  { %v1389_v5 = vsel %vm1383_vm13, %v1356_v19, %v974_v52  ;;  %v1291_v41 = vsel %vm1284_vm10, %v1258_v35, %v499_v23  ;;  %v467_v28 = vsel %vm423_vm0, %v464_v9, %v466_v13  ;;  %v297_v33 = vrot.slane %v10532_v34, 2 }
  0xcd   :  { %1148 = vrot.lane.b32.xlu1 %v1088_v63, %s9804_s23  ;;  %v3212_v37 = vcombine.low %v3203_v47, %v3210_v16  ;;  %v3219_v32 = vrot.slane %v3211_v60, %v10139_v62  ;;  %v310_v52 = vsel %vm264_vm3, %v307_v8, %v309_v21  ;;  %v623_v8 = vrot.slane %v10446_v51, 4 }
  0xce   :  { %514 = vrot.lane.b32.xlu0 %v454_v14, %s9798_s15  ;;  %v298_v57 = vsel %vm264_vm3, %v296_v43, %v297_v33  ;;  %v782_v43 = vrot.slane %v10446_v51, 5 }
  0xcf   :  { %v658_v46 = vpop.permute.xlu1 %657  ;;  %v1133_v58 = vpop.permute.xlu0 %1132  ;;  %v3226_v30 = vrot.slane %v3212_v37, %v10139_v62 }
  0xd0   :  { %v1422_v3 = vsel %vm1416_vm14, %v1389_v5, %v1133_v58  ;;  %v1324_v23 = vsel %vm1317_vm11, %v1291_v41, %v658_v46  ;;  %v625_v5 = vrot.slane %v10451_v17, 4 }
  0xd1   :  { %v1726_v12 = vcombine.high %v1422_v3, %v1422_v3  ;;  %v1733_v18 = vrot.slane %v1422_v3, %v10139_v62  ;;  %673 = vrot.lane.b32.xlu1 %v613_v54, %s9800_s17  ;;  %v3227_v2 = vcombine.low %v3219_v32, %v3226_v30 }
  0xd2   :  { %369 = vrot.lane.b32.xlu0 %v308_v49, %s9801_s18 }
  0xd3   :  { %v1740_v40 = vrot.slane %v1726_v12, %v10139_v62  ;;  %v1741_v27 = vcombine.high %v1733_v18, %v1733_v18  ;;  %v817_v31 = vpop.permute.xlu1 %816  ;;  %9594 = vmatmul.mubr.msk.f32.gmra.mxu0 %vm4468_vm15, %v3227_v2  ;;  %v10571_v10 = vpop.permute.xlu0 %182  ;;  %v1749_v36 = vrot.slane %v1733_v18, %v10139_v62 }
  0xd4   :  { %9596 = vmatprep.mubr.msk.f32.mxu0 %vm9806_vm7, %v13844_v59  ;;  %v1357_v49 = vsel %vm1350_vm12, %v1324_v23, %v817_v31  ;;  %v468_v31 = vrot.slane %v10521_v25, 3 }
  0xd5   :  { %v1742_v63 = vcombine.high %v1740_v40, %v1740_v40  ;;  %v1763_v22 = vrot.slane %v1741_v27, %v10139_v62  ;;  %212 = vrot.lane.b32.xlu1 %v151_v45, %s9799_s16  ;;  %v1756_v24 = vrot.slane %v1740_v40, %v10139_v62  ;;  %v931_v45 = vsel %vm900_vm5, %v928_v53, %v930_v1 }
  0xd6   :  { %200 = vrot.lane.b32.xlu0 %v139_v20, %s9799_s16  ;;  %v626_v27 = vsel %vm582_vm2, %v623_v8, %v625_v5  ;;  %v455_v20 = vrot.slane %v10526_v55, 3  ;;  %v469_v23 = vsel %vm423_vm0, %v466_v13, %v468_v31 }
  0xd7   :  { %v1770_v14 = vrot.slane %v1742_v63, %v10139_v62  ;;  %v3228_v0 = vcombine.low %v1749_v36, %v1763_v22  ;;  %v9434_v47 = vcombine.high %v1749_v36, %v1763_v22  ;;  %v976_v16 = vpop.permute.xlu1 %975  ;;  %v10599_v60 = vpop.permute.xlu0 %341 }
  0xd8   :  { %v1390_v30 = vsel %vm1383_vm13, %v1357_v49, %v976_v16 }
  0xd9   :  { %v3230_v48 = vcombine.low %v1756_v24, %v1770_v14  ;;  %v9435_v54 = vcombine.high %v1756_v24, %v1770_v14  ;;  %v3238_v37 = vrot.slane %v3228_v0, %v10139_v62  ;;  %v3245_v19 = vrot.slane %v9434_v47, %v10139_v62  ;;  %832 = vrot.lane.b32.xlu1 %v772_v50, %s9802_s19 }
  0xda   :  { %528 = vrot.lane.b32.xlu0 %v467_v28, %s9798_s15  ;;  %v456_v50 = vrot.slane %v10532_v34, 3  ;;  %v1089_v28 = vrot.slane %v10398_v39, 7  ;;  %v784_v24 = vrot.slane %v10451_v17, 5 }
  0xdb   :  { %v3252_v46 = vrot.slane %v3230_v48, %v10139_v62  ;;  %v3259_v58 = vrot.slane %v9435_v54, %v10139_v62  ;;  %v3260_v32 = vcombine.low %v3238_v37, %v3245_v19  ;;  %v1135_v3 = vpop.permute.xlu1 %1134  ;;  %v501_v12 = vpop.permute.xlu0 %500 }
  0xdc   :  { %v1423_v18 = vsel %vm1416_vm14, %v1390_v30, %v1135_v3  ;;  %v1090_v13 = vsel %vm1059_vm6, %v1087_v15, %v1089_v28  ;;  %v1226_v15 = vsel %vm1218_vm8, %v9770_v38, %v10571_v10 }
  0xdd   :  { %v1775_v2 = vcombine.high %v1423_v18, %v1423_v18  ;;  %v1782_v11 = vrot.slane %v1423_v18, %v10139_v62  ;;  %371 = vrot.lane.b32.xlu1 %v310_v52, %s9801_s18  ;;  %v3261_v40 = vcombine.low %v3252_v46, %v3259_v58  ;;  %v3268_v22 = vrot.slane %v3260_v32, %v10139_v62 }
  0xde   :  { %359 = vrot.lane.b32.xlu0 %v298_v57, %s9801_s18  ;;  %v457_v52 = vsel %vm423_vm0, %v455_v20, %v456_v50  ;;  %v785_v46 = vsel %vm741_vm4, %v782_v43, %v784_v24  ;;  %v627_v18 = vrot.slane %v10521_v25, 4 }
  0xdf   :  { %v1789_v35 = vrot.slane %v1775_v2, %v10139_v62  ;;  %v1790_v63 = vcombine.high %v1782_v11, %v1782_v11  ;;  %v10639_v36 = vpop.permute.xlu1 %184  ;;  %v660_v53 = vpop.permute.xlu0 %659  ;;  %v3275_v41 = vrot.slane %v3261_v40, %v10139_v62  ;;  %v1798_v0 = vrot.slane %v1782_v11, %v10139_v62 }
  0xe0   :  { %v614_v2 = vrot.slane %v10526_v55, 4  ;;  %v615_v11 = vrot.slane %v10532_v34, 4 }
  0xe1   :  { %v1791_v14 = vcombine.high %v1789_v35, %v1789_v35  ;;  %v1812_v47 = vrot.slane %v1790_v63, %v10139_v62  ;;  %991 = vrot.lane.b32.xlu1 %v931_v45, %s9803_s22  ;;  %v3276_v16 = vcombine.low %v3268_v22, %v3275_v41  ;;  %v1805_v48 = vrot.slane %v1789_v35, %v10139_v62 }
  0xe2   :  { %687 = vrot.lane.b32.xlu0 %v626_v27, %s9800_s17  ;;  %v1259_v45 = vsel %vm1251_vm9, %v1226_v15, %v10599_v60 }
  0xe3   :  { %v1819_v54 = vrot.slane %v1791_v14, %v10139_v62  ;;  %v3277_v37 = vcombine.low %v1798_v0, %v1812_v47  ;;  %v9436_v19 = vcombine.high %v1798_v0, %v1812_v47  ;;  %v344_v49 = vpop.permute.xlu1 %343  ;;  %9597 = vmatmul.mubr.msk.f32.gmra.mxu0 %vm4468_vm15, %v3276_v16  ;;  %v819_v57 = vpop.permute.xlu0 %818  ;;  %v1292_v10 = vsel %vm1284_vm10, %v1259_v45, %v501_v12  ;;  %v10695_v14 = vld [vmem:[%s13841_s0 + $0xc0] sm:$0xff] }
  0xe4   :  { %9599 = vmatprep.mubr.msk.f32.mxu0 %vm9806_vm7, %v13844_v59  ;;  %v1325_v22 = vsel %vm1317_vm11, %v1292_v10, %v660_v53  ;;  %v628_v12 = vsel %vm582_vm2, %v625_v5, %v627_v18  ;;  %v616_v53 = vsel %vm582_vm2, %v614_v2, %v615_v11  ;;  %v941_v0 = vrot.slane %v10446_v51, 6  ;;  %v10715_v5 = vld [vmem:[%s13841_s0 + $0x90] sm:$0xff] }
  0xe5   :  { %v3279_v58 = vcombine.low %v1805_v48, %v1819_v54  ;;  %v9437_v32 = vcombine.high %v1805_v48, %v1819_v54  ;;  %v3287_v30 = vrot.slane %v3277_v37, %v10139_v62  ;;  %v3294_v3 = vrot.slane %v9436_v19, %v10139_v62  ;;  %530 = vrot.lane.b32.xlu1 %v469_v23, %s9798_s15 }
  0xe6   :  { %518 = vrot.lane.b32.xlu0 %v457_v52, %s9798_s15  ;;  %v1358_v60 = vsel %vm1350_vm12, %v1325_v22, %v819_v57  ;;  %v943_v54 = vrot.slane %v10451_v17, 6  ;;  %v152_v19 = vrot.slane %v10695_v14, 1 }
  0xe7   :  { %v3301_v40 = vrot.slane %v3279_v58, %v10139_v62  ;;  %v3308_v27 = vrot.slane %v9437_v32, %v10139_v62  ;;  %v3309_v20 = vcombine.low %v3287_v30, %v3294_v3  ;;  %v503_v35 = vpop.permute.xlu1 %502  ;;  %v978_v63 = vpop.permute.xlu0 %977  ;;  %v9771_v58 = vld [vmem:[%s13841_s0 + $0x40] sm:$0xff]  ;;  %v140_v30 = vrot.slane %v10715_v5, 1 }
  0xe8   :  { %v1391_v47 = vsel %vm1383_vm13, %v1358_v60, %v978_v63  ;;  %v1227_v32 = vsel %vm1218_vm8, %v9771_v58, %v10639_v36  ;;  %v944_v45 = vsel %vm900_vm5, %v941_v0, %v943_v54  ;;  %v153_v36 = vsel %vm105_vm1, %v150_v44, %v152_v19 }
  0xe9   :  { %1150 = vrot.lane.b32.xlu1 %v1090_v13, %s9804_s23  ;;  %v3310_v41 = vcombine.low %v3301_v40, %v3308_v27  ;;  %v3317_v52 = vrot.slane %v3309_v20, %v10139_v62  ;;  %v786_v40 = vrot.slane %v10521_v25, 5  ;;  %v1260_v27 = vsel %vm1251_vm9, %v1227_v32, %v344_v49 }
  0xea   :  { %846 = vrot.lane.b32.xlu0 %v785_v46, %s9802_s19  ;;  %v1293_v22 = vsel %vm1284_vm10, %v1260_v27, %v503_v35  ;;  %v141_v44 = vsel %vm105_vm1, %v138_v7, %v140_v30  ;;  %v773_v49 = vrot.slane %v10526_v55, 5  ;;  %v311_v27 = vrot.slane %v10695_v14, 2 }
  0xeb   :  { %v662_v16 = vpop.permute.xlu1 %661  ;;  %v1137_v23 = vpop.permute.xlu0 %1136  ;;  %v3324_v48 = vrot.slane %v3310_v41, %v10139_v62  ;;  %v774_v41 = vrot.slane %v10532_v34, 5  ;;  %v787_v7 = vsel %vm741_vm4, %v784_v24, %v786_v40  ;;  %v1102_v24 = vrot.slane %v10451_v17, 7 }
  0xec   :  { %v1424_v37 = vsel %vm1416_vm14, %v1391_v47, %v1137_v23  ;;  %v1326_v23 = vsel %vm1317_vm11, %v1293_v22, %v662_v16 }
  0xed   :  { %v1824_v57 = vcombine.high %v1424_v37, %v1424_v37  ;;  %v1831_v13 = vrot.slane %v1424_v37, %v10139_v62  ;;  %689 = vrot.lane.b32.xlu1 %v628_v12, %s9800_s17  ;;  %v3325_v46 = vcombine.low %v3317_v52, %v3324_v48  ;;  %v775_v16 = vsel %vm741_vm4, %v773_v49, %v774_v41 }
  0xee   :  { %677 = vrot.lane.b32.xlu0 %v616_v53, %s9800_s17 }
  0xef   :  { %v1838_v3 = vrot.slane %v1824_v57, %v10139_v62  ;;  %v1839_v38 = vcombine.high %v1831_v13, %v1831_v13  ;;  %v821_v15 = vpop.permute.xlu1 %820  ;;  %9600 = vmatmul.mubr.msk.f32.gmra.mxu0 %vm4468_vm15, %v3325_v46  ;;  %v10730_v2 = vpop.permute.xlu0 %186  ;;  %v1847_v63 = vrot.slane %v1831_v13, %v10139_v62  ;;  %v1100_v46 = vrot.slane %v10446_v51, 7 }
  0xf0   :  { %9602 = vmatprep.mubr.msk.f32.mxu0 %vm9806_vm7, %v13844_v59  ;;  %v1359_v13 = vsel %vm1350_vm12, %v1326_v23, %v821_v15  ;;  %v312_v23 = vsel %vm264_vm3, %v309_v21, %v311_v27  ;;  %v945_v21 = vrot.slane %v10521_v25, 6 }
  0xf1   :  { %v1840_v20 = vcombine.high %v1838_v3, %v1838_v3  ;;  %v1861_v10 = vrot.slane %v1839_v38, %v10139_v62  ;;  %198 = vrot.lane.b32.xlu1 %v135_v29, %s9799_s16  ;;  %v1854_v60 = vrot.slane %v1838_v3, %v10139_v62  ;;  %v1103_v22 = vsel %vm1059_vm6, %v1100_v46, %v1102_v24 }
  0xf2   :  { %1005 = vrot.lane.b32.xlu0 %v944_v45, %s9803_s22 }
  0xf3   :  { %v1868_v12 = vrot.slane %v1840_v20, %v10139_v62  ;;  %v3326_v53 = vcombine.low %v1847_v63, %v1861_v10  ;;  %v9438_v29 = vcombine.high %v1847_v63, %v1861_v10  ;;  %v980_v47 = vpop.permute.xlu1 %979  ;;  %v10762_v35 = vpop.permute.xlu0 %345 }
  0xf4   :  { %v1392_v38 = vsel %vm1383_vm13, %v1359_v13, %v980_v47  ;;  %v932_v13 = vrot.slane %v10526_v55, 6 }
  0xf5   :  { %v3328_v52 = vcombine.low %v1854_v60, %v1868_v12  ;;  %v9439_v48 = vcombine.high %v1854_v60, %v1868_v12  ;;  %v3336_v37 = vrot.slane %v3326_v53, %v10139_v62  ;;  %v3343_v57 = vrot.slane %v9438_v29, %v10139_v62  ;;  %214 = vrot.lane.b32.xlu1 %v153_v36, %s9799_s16 }
  0xf6   :  { %202 = vrot.lane.b32.xlu0 %v141_v44, %s9799_s16  ;;  %v299_v44 = vrot.slane %v10715_v5, 2 }
  0xf7   :  { %v3350_v58 = vrot.slane %v3328_v52, %v10139_v62  ;;  %v3357_v32 = vrot.slane %v9439_v48, %v10139_v62  ;;  %v3358_v3 = vcombine.low %v3336_v37, %v3343_v57  ;;  %v1139_v45 = vpop.permute.xlu1 %1138  ;;  %v505_v36 = vpop.permute.xlu0 %504 }
  0xf8   :  { %v1425_v15 = vsel %vm1416_vm14, %v1392_v38, %v1139_v45  ;;  %v300_v57 = vsel %vm264_vm3, %v297_v33, %v299_v44 }
  0xf9   :  { %v1873_v20 = vcombine.high %v1425_v15, %v1425_v15  ;;  %v1880_v63 = vrot.slane %v1425_v15, %v10139_v62  ;;  %848 = vrot.lane.b32.xlu1 %v787_v7, %s9802_s19  ;;  %v3359_v10 = vcombine.low %v3350_v58, %v3357_v32  ;;  %v3366_v29 = vrot.slane %v3358_v3, %v10139_v62 }
  0xfa   :  { %836 = vrot.lane.b32.xlu0 %v775_v16, %s9802_s19  ;;  %v933_v16 = vrot.slane %v10532_v34, 6 }
  0xfb   :  { %v1887_v49 = vrot.slane %v1873_v20, %v10139_v62  ;;  %v1888_v60 = vcombine.high %v1880_v63, %v1880_v63  ;;  %v189_v12 = vpop.permute.xlu1 %188  ;;  %v664_v53 = vpop.permute.xlu0 %663  ;;  %v3373_v47 = vrot.slane %v3359_v10, %v10139_v62  ;;  %v1896_v52 = vrot.slane %v1880_v63, %v10139_v62 }
  0xfc   :  { %v946_v10 = vsel %vm900_vm5, %v943_v54, %v945_v21 }
  0xfd   :  { %v1889_v7 = vcombine.high %v1887_v49, %v1887_v49  ;;  %v1910_v48 = vrot.slane %v1888_v60, %v10139_v62  ;;  %357 = vrot.lane.b32.xlu1 %v294_v42, %s9801_s18  ;;  %v3374_v37 = vcombine.low %v3366_v29, %v3373_v47  ;;  %v1903_v58 = vrot.slane %v1887_v49, %v10139_v62  ;;  %v9772_v60 = vld [vmem:[%s13841_s0 + $0x48] sm:$0xff] }
  0xfe   :  { %1164 = vrot.lane.b32.xlu0 %v1103_v22, %s9804_s23  ;;  %v934_v22 = vsel %vm900_vm5, %v932_v13, %v933_v16  ;;  %v458_v49 = vrot.slane %v10715_v5, 3  ;;  %v1228_v29 = vsel %vm1218_vm8, %v9772_v60, %v10730_v2 }
  0xff   :  { %v1917_v32 = vrot.slane %v1889_v7, %v10139_v62  ;;  %v3375_v42 = vcombine.low %v1896_v52, %v1910_v48  ;;  %v9440_v3 = vcombine.high %v1896_v52, %v1910_v48  ;;  %v348_v38 = vpop.permute.xlu1 %347  ;;  %9603 = vmatmul.mubr.msk.f32.gmra.mxu0 %vm4468_vm15, %v3374_v37  ;;  %v823_v45 = vpop.permute.xlu0 %822  ;;  %v1261_v54 = vsel %vm1251_vm9, %v1228_v29, %v10762_v35 }
 0x100   :  { %9605 = vmatprep.mubr.msk.f32.mxu0 %vm9806_vm7, %v13844_v59  ;;  %v1294_v37 = vsel %vm1284_vm10, %v1261_v54, %v505_v36  ;;  %v459_v2 = vsel %vm423_vm0, %v456_v50, %v458_v49  ;;  %v1092_v35 = vrot.slane %v10532_v34, 7  ;;  %v1104_v29 = vrot.slane %v10521_v25, 7  ;;  %v11075_v34 = vld [vmem:[%s13841_s0 + $0xa0] sm:$0xff] }
 0x101   :  { %v3377_v33 = vcombine.low %v1903_v58, %v1917_v32  ;;  %v9441_v15 = vcombine.high %v1903_v58, %v1917_v32  ;;  %v3385_v20 = vrot.slane %v3375_v42, %v10139_v62  ;;  %v3392_v63 = vrot.slane %v9440_v3, %v10139_v62  ;;  %373 = vrot.lane.b32.xlu1 %v312_v23, %s9801_s18 }
 0x102   :  { %361 = vrot.lane.b32.xlu0 %v300_v57, %s9801_s18  ;;  %v1327_v13 = vsel %vm1317_vm11, %v1294_v37, %v664_v53  ;;  %v1091_v58 = vrot.slane %v10526_v55, 7  ;;  %v470_v53 = vrot.slane %v10695_v14, 3  ;;  %v9773_v55 = vld [vmem:[%s13841_s0 + $0x50] sm:$0xff]  ;;  %v629_v54 = vrot.slane %v10695_v14, 4 }
 0x103   :  { %v3399_v47 = vrot.slane %v3377_v33, %v10139_v62  ;;  %v3406_v23 = vrot.slane %v9441_v15, %v10139_v62  ;;  %v3407_v7 = vcombine.low %v3385_v20, %v3392_v63  ;;  %v507_v52 = vpop.permute.xlu1 %506  ;;  %v1360_v32 = vsel %vm1350_vm12, %v1327_v13, %v823_v45  ;;  %v10894_v13 = vld [vmem:[%s13841_s0 + $0xc8] sm:$0xff] }
 0x104   :  { %v982_v48 = vpop.permute.xlu0 %981  ;;  %v1229_v45 = vsel %vm1218_vm8, %v9773_v55, %v189_v12  ;;  %v471_v12 = vsel %vm423_vm0, %v468_v31, %v470_v53  ;;  %v630_v17 = vsel %vm582_vm2, %v627_v18, %v629_v54 }
 0x105   :  { %1007 = vrot.lane.b32.xlu1 %v946_v10, %s9803_s22  ;;  %v3408_v57 = vcombine.low %v3399_v47, %v3406_v23  ;;  %v3415_v42 = vrot.slane %v3407_v7, %v10139_v62  ;;  %v1393_v33 = vsel %vm1383_vm13, %v1360_v32, %v982_v48 }
 0x106   :  { %995 = vrot.lane.b32.xlu0 %v934_v22, %s9803_s22  ;;  %v1093_v22 = vsel %vm1059_vm6, %v1091_v58, %v1092_v35  ;;  %v617_v58 = vrot.slane %v10715_v5, 4 }
 0x107   :  { %v666_v36 = vpop.permute.xlu1 %665  ;;  %v3422_v3 = vrot.slane %v3408_v57, %v10139_v62 }
 0x108   :  { %v1141_v15 = vpop.permute.xlu0 %1140 }
 0x109   :  { %v1426_v20 = vsel %vm1416_vm14, %v1393_v33, %v1141_v15  ;;  %520 = vrot.lane.b32.xlu1 %v459_v2, %s9798_s15  ;;  %v3423_v50 = vcombine.low %v3415_v42, %v3422_v3 }
 0x10a   :  { %v1922_v63 = vcombine.high %v1426_v20, %v1426_v20  ;;  %v1929_v10 = vrot.slane %v1426_v20, %v10139_v62  ;;  %516 = vrot.lane.b32.xlu0 %v453_v26, %s9798_s15  ;;  %v1262_v26 = vsel %vm1251_vm9, %v1229_v45, %v348_v38 }
 0x10b   :  { %v825_v60 = vpop.permute.xlu1 %824  ;;  %9606 = vmatmul.mubr.msk.f32.gmra.mxu0 %vm4468_vm15, %v3423_v50  ;;  %v1295_v48 = vsel %vm1284_vm10, %v1262_v26, %v507_v52  ;;  %v1105_v52 = vsel %vm1059_vm6, %v1102_v24, %v1104_v29  ;;  %v154_v24 = vrot.slane %v10894_v13, 1 }
 0x10c   :  { %v1936_v47 = vrot.slane %v1922_v63, %v10139_v62  ;;  %v1937_v23 = vcombine.high %v1929_v10, %v1929_v10  ;;  %v10880_v7 = vpop.permute.xlu0 %190  ;;  %9608 = vmatprep.mubr.msk.f32.mxu0 %vm9806_vm7, %v13844_v59  ;;  %v1945_v31 = vrot.slane %v1929_v10, %v10139_v62  ;;  %v1328_v38 = vsel %vm1317_vm11, %v1295_v48, %v666_v36  ;;  %v10910_v36 = vld [vmem:[%s13841_s0 + $0x98] sm:$0xff] }
 0x10d   :  { %1154 = vrot.lane.b32.xlu1 %v1093_v22, %s9804_s23  ;;  %v1361_v20 = vsel %vm1350_vm12, %v1328_v38, %v825_v60  ;;  %v142_v18 = vrot.slane %v10910_v36, 1 }
 0x10e   :  { %v1938_v37 = vcombine.high %v1936_v47, %v1936_v47  ;;  %v1959_v57 = vrot.slane %v1937_v23, %v10139_v62  ;;  %532 = vrot.lane.b32.xlu0 %v471_v12, %s9798_s15  ;;  %v1952_v32 = vrot.slane %v1936_v47, %v10139_v62 }
 0x10f   :  { %v984_v2 = vpop.permute.xlu1 %983 }
 0x110   :  { %v1966_v42 = vrot.slane %v1938_v37, %v10139_v62  ;;  %v3424_v3 = vcombine.low %v1945_v31, %v1959_v57  ;;  %v9442_v33 = vcombine.high %v1945_v31, %v1959_v57  ;;  %v10905_v15 = vpop.permute.xlu0 %349  ;;  %v1394_v10 = vsel %vm1383_vm13, %v1361_v20, %v984_v2 }
 0x111   :  { %675 = vrot.lane.b32.xlu1 %v612_v56, %s9800_s17  ;;  %v618_v56 = vsel %vm582_vm2, %v615_v11, %v617_v58  ;;  %v155_v11 = vsel %vm105_vm1, %v152_v19, %v154_v24  ;;  %v776_v57 = vrot.slane %v10715_v5, 5 }
 0x112   :  { %v3426_v50 = vcombine.low %v1952_v32, %v1966_v42  ;;  %v9443_v55 = vcombine.high %v1952_v32, %v1966_v42  ;;  %v3434_v45 = vrot.slane %v3424_v3, %v10139_v62  ;;  %v3441_v63 = vrot.slane %v9442_v33, %v10139_v62  ;;  %1166 = vrot.lane.b32.xlu0 %v1105_v52, %s9804_s23 }
 0x113   :  { %v1143_v22 = vpop.permute.xlu1 %1142  ;;  %v143_v32 = vsel %vm105_vm1, %v140_v30, %v142_v18  ;;  %v777_v30 = vsel %vm741_vm4, %v774_v41, %v776_v57 }
 0x114   :  { %v3448_v60 = vrot.slane %v3426_v50, %v10139_v62  ;;  %v3455_v12 = vrot.slane %v9443_v55, %v10139_v62  ;;  %v3456_v47 = vcombine.low %v3434_v45, %v3441_v63  ;;  %v1427_v23 = vsel %vm1416_vm14, %v1394_v10, %v1143_v22  ;;  %v509_v26 = vpop.permute.xlu0 %508 }
 0x115   :  { %v1971_v48 = vcombine.high %v1427_v23, %v1427_v23  ;;  %v1978_v37 = vrot.slane %v1427_v23, %v10139_v62  ;;  %691 = vrot.lane.b32.xlu1 %v630_v17, %s9800_s17  ;;  %v301_v55 = vrot.slane %v10910_v36, 2  ;;  %v788_v45 = vrot.slane %v10695_v14, 5 }
 0x116   :  { %679 = vrot.lane.b32.xlu0 %v618_v56, %s9800_s17  ;;  %v3457_v31 = vcombine.low %v3448_v60, %v3455_v12  ;;  %v3464_v3 = vrot.slane %v3456_v47, %v10139_v62 }
 0x117   :  { %v1985_v38 = vrot.slane %v1971_v48, %v10139_v62  ;;  %v1986_v2 = vcombine.high %v1978_v37, %v1978_v37  ;;  %v193_v52 = vpop.permute.xlu1 %192  ;;  %v1994_v19 = vrot.slane %v1978_v37, %v10139_v62  ;;  %v302_v37 = vsel %vm264_vm3, %v299_v44, %v301_v55 }
 0x118   :  { %v668_v42 = vpop.permute.xlu0 %667  ;;  %v3471_v33 = vrot.slane %v3457_v31, %v10139_v62  ;;  %v313_v31 = vrot.slane %v10894_v13, 2 }
 0x119   :  { %v1987_v20 = vcombine.high %v1985_v38, %v1985_v38  ;;  %v2008_v17 = vrot.slane %v1986_v2, %v10139_v62  ;;  %216 = vrot.lane.b32.xlu1 %v155_v11, %s9799_s16  ;;  %v2001_v63 = vrot.slane %v1985_v38, %v10139_v62  ;;  %v789_v11 = vsel %vm741_vm4, %v786_v40, %v788_v45 }
 0x11a   :  { %204 = vrot.lane.b32.xlu0 %v143_v32, %s9799_s16  ;;  %v3472_v50 = vcombine.low %v3464_v3, %v3471_v33 }
 0x11b   :  { %v2015_v10 = vrot.slane %v1987_v20, %v10139_v62  ;;  %v3473_v22 = vcombine.low %v1994_v19, %v2008_v17  ;;  %v9444_v56 = vcombine.high %v1994_v19, %v2008_v17  ;;  %v352_v60 = vpop.permute.xlu1 %351 }
 0x11c   :  { %9609 = vmatmul.mubr.msk.f32.gmra.mxu0 %vm4468_vm15, %v3472_v50  ;;  %v827_v12 = vpop.permute.xlu0 %826  ;;  %v947_v50 = vrot.slane %v10695_v14, 6 }
 0x11d   :  { %v3475_v47 = vcombine.low %v2001_v63, %v2015_v10  ;;  %v9445_v23 = vcombine.high %v2001_v63, %v2015_v10  ;;  %v3483_v48 = vrot.slane %v3473_v22, %v10139_v62  ;;  %v3490_v41 = vrot.slane %v9444_v56, %v10139_v62  ;;  %838 = vrot.lane.b32.xlu1 %v777_v30, %s9802_s19 }
 0x11e   :  { %834 = vrot.lane.b32.xlu0 %v771_v6, %s9802_s19  ;;  %9611 = vmatprep.mubr.msk.f32.mxu0 %vm9806_vm7, %v13844_v59  ;;  %v9774_v6 = vld [vmem:[%s13841_s0 + $0x58] sm:$0xff]  ;;  %v935_v10 = vrot.slane %v10715_v5, 6 }
 0x11f   :  { %v1230_v38 = vsel %vm1218_vm8, %v9774_v6, %v10880_v7  ;;  %v3497_v44 = vrot.slane %v3475_v47, %v10139_v62  ;;  %v3504_v2 = vrot.slane %v9445_v23, %v10139_v62  ;;  %v3505_v32 = vcombine.low %v3483_v48, %v3490_v41  ;;  %v511_v3 = vpop.permute.xlu1 %510 }
 0x120   :  { %v1263_v40 = vsel %vm1251_vm9, %v1230_v38, %v10905_v15  ;;  %v986_v33 = vpop.permute.xlu0 %985  ;;  %v314_v7 = vsel %vm264_vm3, %v311_v27, %v313_v31  ;;  %v472_v47 = vrot.slane %v10894_v13, 3 }
 0x121   :  { %v1296_v20 = vsel %vm1284_vm10, %v1263_v40, %v509_v26  ;;  %363 = vrot.lane.b32.xlu1 %v302_v37, %s9801_s18  ;;  %v3506_v19 = vcombine.low %v3497_v44, %v3504_v2  ;;  %v3513_v26 = vrot.slane %v3505_v32, %v10139_v62  ;;  %v1094_v2 = vrot.slane %v10715_v5, 7 }
 0x122   :  { %v1329_v17 = vsel %vm1317_vm11, %v1296_v20, %v668_v42  ;;  %850 = vrot.lane.b32.xlu0 %v789_v11, %s9802_s19  ;;  %v460_v11 = vrot.slane %v10910_v36, 3 }
 0x123   :  { %v1362_v15 = vsel %vm1350_vm12, %v1329_v17, %v827_v12  ;;  %v670_v30 = vpop.permute.xlu1 %669  ;;  %v3520_v63 = vrot.slane %v3506_v19, %v10139_v62  ;;  %v9775_v12 = vld [vmem:[%s13841_s0 + $0x60] sm:$0xff] }
 0x124   :  { %v1395_v42 = vsel %vm1383_vm13, %v1362_v15, %v986_v33  ;;  %v1145_v22 = vpop.permute.xlu0 %1144  ;;  %v1231_v23 = vsel %vm1218_vm8, %v9775_v12, %v193_v52  ;;  %v936_v52 = vsel %vm900_vm5, %v933_v16, %v935_v10  ;;  %v473_v16 = vsel %vm423_vm0, %v470_v53, %v472_v47 }
 0x125   :  { %v1428_v56 = vsel %vm1416_vm14, %v1395_v42, %v1145_v22  ;;  %993 = vrot.lane.b32.xlu1 %v930_v1, %s9803_s22  ;;  %v3521_v27 = vcombine.low %v3513_v26, %v3520_v63  ;;  %v948_v1 = vsel %vm900_vm5, %v945_v21, %v947_v50  ;;  %v1264_v21 = vsel %vm1251_vm9, %v1231_v23, %v352_v60 }
 0x126   :  { %v2020_v48 = vcombine.high %v1428_v56, %v1428_v56  ;;  %v2027_v41 = vrot.slane %v1428_v56, %v10139_v62  ;;  %375 = vrot.lane.b32.xlu0 %v314_v7, %s9801_s18  ;;  %v1297_v32 = vsel %vm1284_vm10, %v1264_v21, %v511_v3  ;;  %v461_v53 = vsel %vm423_vm0, %v458_v49, %v460_v11 }
 0x127   :  { %v829_v37 = vpop.permute.xlu1 %828  ;;  %9612 = vmatmul.mubr.msk.f32.gmra.mxu0 %vm4468_vm15, %v3521_v27  ;;  %v1330_v60 = vsel %vm1317_vm11, %v1297_v32, %v670_v30  ;;  %v1095_v30 = vsel %vm1059_vm6, %v1092_v35, %v1094_v2  ;;  %v619_v49 = vrot.slane %v10910_v36, 4  ;;  %v144_v32 = vrot.slane %v11075_v34, 1 }
 0x128   :  { %v2034_v6 = vrot.slane %v2020_v48, %v10139_v62  ;;  %v2035_v38 = vcombine.high %v2027_v41, %v2027_v41  ;;  %v11033_v44 = vpop.permute.xlu0 %194  ;;  %9614 = vmatprep.mubr.msk.f32.mxu0 %vm9806_vm7, %v13844_v59  ;;  %v2043_v33 = vrot.slane %v2027_v41, %v10139_v62  ;;  %v1363_v63 = vsel %vm1350_vm12, %v1330_v60, %v829_v37 }
 0x129   :  { %1009 = vrot.lane.b32.xlu1 %v948_v1, %s9803_s22  ;;  %v1106_v48 = vrot.slane %v10695_v14, 7  ;;  %v620_v21 = vsel %vm582_vm2, %v617_v58, %v619_v49 }
 0x12a   :  { %v2036_v40 = vcombine.high %v2034_v6, %v2034_v6  ;;  %v2057_v20 = vrot.slane %v2035_v38, %v10139_v62  ;;  %997 = vrot.lane.b32.xlu0 %v936_v52, %s9803_s22  ;;  %v2050_v17 = vrot.slane %v2034_v6, %v10139_v62 }
 0x12b   :  { %v988_v19 = vpop.permute.xlu1 %987  ;;  %v1107_v39 = vsel %vm1059_vm6, %v1104_v29, %v1106_v48  ;;  %v145_v29 = vsel %vm105_vm1, %v142_v18, %v144_v32 }
 0x12c   :  { %v2064_v3 = vrot.slane %v2036_v40, %v10139_v62  ;;  %v3522_v7 = vcombine.low %v2043_v33, %v2057_v20  ;;  %v9446_v15 = vcombine.high %v2043_v33, %v2057_v20  ;;  %v11057_v26 = vpop.permute.xlu0 %353  ;;  %v1396_v12 = vsel %vm1383_vm13, %v1363_v63, %v988_v19 }
 0x12d   :  { %534 = vrot.lane.b32.xlu1 %v473_v16, %s9798_s15  ;;  %v631_v40 = vrot.slane %v10894_v13, 4 }
 0x12e   :  { %v3524_v42 = vcombine.low %v2050_v17, %v2064_v3  ;;  %v9447_v22 = vcombine.high %v2050_v17, %v2064_v3  ;;  %v3532_v56 = vrot.slane %v3522_v7, %v10139_v62  ;;  %v3539_v27 = vrot.slane %v9446_v15, %v10139_v62  ;;  %522 = vrot.lane.b32.xlu0 %v461_v53, %s9798_s15 }
 0x12f   :  { %v1147_v23 = vpop.permute.xlu1 %1146  ;;  %v778_v17 = vrot.slane %v10910_v36, 5  ;;  %v632_v63 = vsel %vm582_vm2, %v629_v54, %v631_v40 }
 0x130   :  { %v3546_v35 = vrot.slane %v3524_v42, %v10139_v62  ;;  %v3553_v41 = vrot.slane %v9447_v22, %v10139_v62  ;;  %v3554_v1 = vcombine.low %v3532_v56, %v3539_v27  ;;  %v1429_v37 = vsel %vm1416_vm14, %v1396_v12, %v1147_v23  ;;  %v513_v52 = vpop.permute.xlu0 %512 }
 0x131   :  { %v2069_v6 = vcombine.high %v1429_v37, %v1429_v37  ;;  %v2076_v38 = vrot.slane %v1429_v37, %v10139_v62  ;;  %1156 = vrot.lane.b32.xlu1 %v1095_v30, %s9804_s23  ;;  %v779_v18 = vsel %vm741_vm4, %v776_v57, %v778_v17  ;;  %v9776_v37 = vld [vmem:[%s13841_s0 + $0x68] sm:$0xff] }
 0x132   :  { %1152 = vrot.lane.b32.xlu0 %v1089_v28, %s9804_s23  ;;  %v3555_v16 = vcombine.low %v3546_v35, %v3553_v41  ;;  %v11103_v28 = vld [vmem:[%s13841_s0 + $0xd0] sm:$0xff]  ;;  %v3562_v19 = vrot.slane %v3554_v1, %v10139_v62 }
 0x133   :  { %v2083_v33 = vrot.slane %v2069_v6, %v10139_v62  ;;  %v2084_v20 = vcombine.high %v2076_v38, %v2076_v38  ;;  %v11093_v60 = vpop.permute.xlu1 %196  ;;  %v2092_v7 = vrot.slane %v2076_v38, %v10139_v62  ;;  %v156_v30 = vrot.slane %v11103_v28, 1 }
 0x134   :  { %v672_v58 = vpop.permute.xlu0 %671  ;;  %v3569_v53 = vrot.slane %v3555_v16, %v10139_v62  ;;  %v1232_v6 = vsel %vm1218_vm8, %v9776_v37, %v11033_v44  ;;  %v303_v38 = vrot.slane %v11075_v34, 2 }
 0x135   :  { %v2085_v3 = vcombine.high %v2083_v33, %v2083_v33  ;;  %v2106_v15 = vrot.slane %v2084_v20, %v10139_v62  ;;  %681 = vrot.lane.b32.xlu1 %v620_v21, %s9800_s17  ;;  %v2099_v42 = vrot.slane %v2083_v33, %v10139_v62  ;;  %v157_v57 = vsel %vm105_vm1, %v154_v24, %v156_v30 }
 0x136   :  { %1168 = vrot.lane.b32.xlu0 %v1107_v39, %s9804_s23  ;;  %v3570_v25 = vcombine.low %v3562_v19, %v3569_v53  ;;  %v790_v21 = vrot.slane %v10894_v13, 5  ;;  %v1265_v16 = vsel %vm1251_vm9, %v1232_v6, %v11057_v26  ;;  %v304_v26 = vsel %vm264_vm3, %v301_v55, %v303_v38 }
 0x137   :  { %v2113_v22 = vrot.slane %v2085_v3, %v10139_v62  ;;  %v3571_v56 = vcombine.low %v2092_v7, %v2106_v15  ;;  %v9448_v27 = vcombine.high %v2092_v7, %v2106_v15  ;;  %v11125_v12 = vpop.permute.xlu1 %355  ;;  %v1298_v19 = vsel %vm1284_vm10, %v1265_v16, %v513_v52 }
 0x138   :  { %9615 = vmatmul.mubr.msk.f32.gmra.mxu0 %vm4468_vm15, %v3570_v25  ;;  %v831_v23 = vpop.permute.xlu0 %830  ;;  %v1331_v53 = vsel %vm1317_vm11, %v1298_v19, %v672_v58  ;;  %v791_v52 = vsel %vm741_vm4, %v788_v45, %v790_v21  ;;  %v937_v58 = vrot.slane %v10910_v36, 6 }
 0x139   :  { %v3573_v54 = vcombine.low %v2099_v42, %v2113_v22  ;;  %v9449_v35 = vcombine.high %v2099_v42, %v2113_v22  ;;  %v3581_v41 = vrot.slane %v3571_v56, %v10139_v62  ;;  %v3588_v1 = vrot.slane %v9448_v27, %v10139_v62  ;;  %206 = vrot.lane.b32.xlu1 %v145_v29, %s9799_s16 }
 0x13a   :  { %693 = vrot.lane.b32.xlu0 %v632_v63, %s9800_s17  ;;  %9617 = vmatprep.mubr.msk.f32.mxu0 %vm9806_vm7, %v13844_v59  ;;  %v1364_v7 = vsel %vm1350_vm12, %v1331_v53, %v831_v23  ;;  %v315_v42 = vrot.slane %v11103_v28, 2  ;;  %v938_v23 = vsel %vm900_vm5, %v935_v10, %v937_v58 }
 0x13b   :  { %v3595_v44 = vrot.slane %v3573_v54, %v10139_v62  ;;  %v3602_v33 = vrot.slane %v9449_v35, %v10139_v62  ;;  %v3603_v20 = vcombine.low %v3581_v41, %v3588_v1  ;;  %v11155_v39 = vpop.permute.xlu1 %210  ;;  %v949_v54 = vrot.slane %v10894_v13, 6 }
 0x13c   :  { %v990_v24 = vpop.permute.xlu0 %989  ;;  %v316_v37 = vsel %vm264_vm3, %v313_v31, %v315_v42 }
 0x13d   :  { %840 = vrot.lane.b32.xlu1 %v779_v18, %s9802_s19  ;;  %v3604_v3 = vcombine.low %v3595_v44, %v3602_v33  ;;  %v1397_v15 = vsel %vm1383_vm13, %v1364_v7, %v990_v24  ;;  %v3611_v29 = vrot.slane %v3603_v20, %v10139_v62  ;;  %v462_v18 = vrot.slane %v11075_v34, 3 }
 0x13e   :  { %218 = vrot.lane.b32.xlu0 %v157_v57, %s9799_s16  ;;  %v950_v44 = vsel %vm900_vm5, %v947_v50, %v949_v54  ;;  %v1096_v33 = vrot.slane %v10910_v36, 7  ;;  %v474_v20 = vrot.slane %v11103_v28, 3  ;;  %v621_v50 = vrot.slane %v11075_v34, 4 }
 0x13f   :  { %v1149_v25 = vpop.permute.xlu1 %1148  ;;  %v3618_v63 = vrot.slane %v3604_v3, %v10139_v62  ;;  %v463_v31 = vsel %vm423_vm0, %v460_v11, %v462_v18  ;;  %v11226_v11 = vld [vmem:[%s13841_s0 + $0xd8] sm:$0xff] }
 0x140   :  { %v1430_v22 = vsel %vm1416_vm14, %v1397_v15, %v1149_v25  ;;  %v11178_v55 = vpop.permute.xlu0 %514  ;;  %v633_v15 = vrot.slane %v11103_v28, 4  ;;  %v780_v25 = vrot.slane %v11075_v34, 5 }
 0x141   :  { %v2118_v56 = vcombine.high %v1430_v22, %v1430_v22  ;;  %v2125_v27 = vrot.slane %v1430_v22, %v10139_v62  ;;  %365 = vrot.lane.b32.xlu1 %v304_v26, %s9801_s18  ;;  %v3619_v45 = vcombine.low %v3611_v29, %v3618_v63 }
 0x142   :  { %852 = vrot.lane.b32.xlu0 %v791_v52, %s9802_s19  ;;  %v1108_v52 = vrot.slane %v10894_v13, 7  ;;  %v634_v14 = vsel %vm582_vm2, %v631_v40, %v633_v15 }
 0x143   :  { %v2132_v35 = vrot.slane %v2118_v56, %v10139_v62  ;;  %v2133_v41 = vcombine.high %v2125_v27, %v2125_v27  ;;  %v11191_v1 = vpop.permute.xlu1 %673  ;;  %9618 = vmatmul.mubr.msk.f32.gmra.mxu0 %vm4468_vm15, %v3619_v45  ;;  %v2141_v57 = vrot.slane %v2125_v27, %v10139_v62  ;;  %v1097_v27 = vsel %vm1059_vm6, %v1094_v2, %v1096_v33 }
 0x144   :  { %v11199_v6 = vpop.permute.xlu0 %369  ;;  %9620 = vmatprep.mubr.msk.f32.mxu0 %vm9806_vm7, %v13844_v59  ;;  %v158_v45 = vrot.slane %v11226_v11, 1  ;;  %v622_v2 = vsel %vm582_vm2, %v619_v49, %v621_v50  ;;  %v11282_v49 = vsel %vm741_vm4, %v778_v17, %v780_v25  ;;  %v951_v17 = vrot.slane %v11103_v28, 6 }
 0x145   :  { %v2134_v10 = vcombine.high %v2132_v35, %v2132_v35  ;;  %v2155_v16 = vrot.slane %v2133_v41, %v10139_v62  ;;  %999 = vrot.lane.b32.xlu1 %v938_v23, %s9803_s22  ;;  %v2148_v19 = vrot.slane %v2132_v35, %v10139_v62  ;;  %v792_v23 = vrot.slane %v11103_v28, 5 }
 0x146   :  { %377 = vrot.lane.b32.xlu0 %v316_v37, %s9801_s18 }
 0x147   :  { %v2162_v24 = vrot.slane %v2134_v10, %v10139_v62  ;;  %v3620_v53 = vcombine.low %v2141_v57, %v2155_v16  ;;  %v9450_v3 = vcombine.high %v2141_v57, %v2155_v16  ;;  %v11221_v7 = vpop.permute.xlu1 %212  ;;  %v475_v57 = vsel %vm423_vm0, %v472_v47, %v474_v20 }
 0x148   :  { %v11228_v26 = vpop.permute.xlu0 %200  ;;  %v1109_v16 = vsel %vm1059_vm6, %v1106_v48, %v1108_v52  ;;  %v147_v47 = vsel %vm105_vm1, %v144_v32, %v146_v61  ;;  %v11287_v48 = vld [vmem:[%s13841_s0 + $0xe0] sm:$0xff]  ;;  %v11293_v61 = vsel %vm105_vm1, %v156_v30, %v158_v45  ;;  %v11300_v32 = vsel %vm264_vm3, %v303_v38, %v305_v4 }
 0x149   :  { %v3622_v29 = vcombine.low %v2148_v19, %v2162_v24  ;;  %v9451_v63 = vcombine.high %v2148_v19, %v2162_v24  ;;  %v3630_v22 = vrot.slane %v3620_v53, %v10139_v62  ;;  %v3637_v56 = vrot.slane %v9450_v3, %v10139_v62  ;;  %524 = vrot.lane.b32.xlu1 %v463_v31, %s9798_s15 }
 0x14a   :  { %1011 = vrot.lane.b32.xlu0 %v950_v44, %s9803_s22  ;;  %v939_v31 = vrot.slane %v11075_v34, 6  ;;  %v317_v44 = vrot.slane %v11226_v11, 2  ;;  %v11305_v40 = vsel %vm741_vm4, %v790_v21, %v792_v23  ;;  %v1098_v3 = vrot.slane %v11075_v34, 7 }
 0x14b   :  { %v3644_v35 = vrot.slane %v3622_v29, %v10139_v62  ;;  %v3651_v41 = vrot.slane %v9451_v63, %v10139_v62  ;;  %v3652_v37 = vcombine.low %v3630_v22, %v3637_v56  ;;  %v11247_v10 = vpop.permute.xlu1 %832  ;;  %v476_v29 = vrot.slane %v11226_v11, 3 }
 0x14c   :  { %v11254_v5 = vpop.permute.xlu0 %528  ;;  %v11319_v4 = vsel %vm900_vm5, %v937_v58, %v939_v31  ;;  %v11324_v38 = vsel %vm264_vm3, %v315_v42, %v317_v44  ;;  %v1110_v21 = vrot.slane %v11103_v28, 7  ;;  %v160_v22 = vrot.slane %v11287_v48, 1  ;;  %v11341_v42 = vld [vmem:[%s13841_s0 + $0xe8] sm:$0xff] }
 0x14d   :  { %1158 = vrot.lane.b32.xlu1 %v1097_v27, %s9804_s23  ;;  %v3653_v19 = vcombine.low %v3644_v35, %v3651_v41  ;;  %v3660_v53 = vrot.slane %v3652_v37, %v10139_v62  ;;  %v11334_v27 = vsel %vm423_vm0, %v462_v18, %v464_v9  ;;  %v635_v58 = vrot.slane %v11226_v11, 4 }
 0x14e   :  { %536 = vrot.lane.b32.xlu0 %v475_v57, %s9798_s15  ;;  %v794_v35 = vrot.slane %v11226_v11, 5  ;;  %v11347_v41 = vsel %vm900_vm5, %v949_v54, %v951_v17  ;;  %v319_v37 = vrot.slane %v11287_v48, 2  ;;  %v478_v9 = vrot.slane %v11287_v48, 3 }
 0x14f   :  { %v11308_v24 = vpop.permute.xlu1 %371  ;;  %v3667_v30 = vrot.slane %v3653_v19, %v10139_v62  ;;  %v953_v18 = vrot.slane %v11226_v11, 6  ;;  %v11366_v54 = vsel %vm582_vm2, %v621_v50, %v623_v8  ;;  %v1112_v19 = vrot.slane %v11226_v11, 7 }
 0x150   :  { %v11314_v63 = vpop.permute.xlu0 %359  ;;  %v11384_v8 = vsel %vm105_vm1, %v158_v45, %v160_v22  ;;  %v162_v11 = vrot.slane %v11341_v42, 1  ;;  %v11394_v13 = vsel %vm741_vm4, %v792_v23, %v794_v35  ;;  %v11401_v50 = vsel %vm741_vm4, %v780_v25, %v782_v43 }
 0x151   :  { %683 = vrot.lane.b32.xlu1 %v622_v2, %s9800_s17  ;;  %v3668_v56 = vcombine.low %v3660_v53, %v3667_v30  ;;  %v11356_v2 = vsel %vm1059_vm6, %v1096_v33, %v1098_v3  ;;  %v9777_v53 = vld [vmem:[%s13841_s0 + $0x70] sm:$0xff]  ;;  %v11408_v28 = vsel %vm900_vm5, %v939_v31, %v941_v0  ;;  %v11414_v45 = vsel %vm423_vm0, %v476_v29, %v478_v9  ;;  %v11453_v30 = vld [vmem:[%s13842_s1 + $0x28] ss:$0 sm:$0xff] }
 0x152   :  { %1170 = vrot.lane.b32.xlu0 %v1109_v16, %s9804_s23  ;;  %v11361_v16 = vsel %vm423_vm0, %v474_v20, %v476_v29  ;;  %v1233_v36 = vsel %vm1218_vm8, %v9777_v53, %v11093_v60  ;;  %v11379_v20 = vsel %vm1059_vm6, %v1108_v52, %v1110_v21  ;;  %v11391_v60 = vsel %vm582_vm2, %v633_v15, %v635_v58 }
 0x153   :  { %v992_v57 = vpop.permute.xlu1 %991  ;;  %9621 = vmatmul.mubr.msk.f32.gmra.mxu0 %vm4468_vm15, %v3668_v56  ;;  %v637_v52 = vrot.slane %v11287_v48, 4  ;;  %v11411_v15 = vsel %vm264_vm3, %v317_v44, %v319_v37  ;;  %v11417_v34 = vsel %vm900_vm5, %v951_v17, %v953_v18  ;;  %v1266_v43 = vsel %vm1251_vm9, %v1233_v36, %v11125_v12  ;;  %v11435_v44 = vld [vmem:[%s13841_s0 + $0xf0] sm:$0xff] }
 0x154   :  { %v11374_v33 = vpop.permute.xlu0 %687  ;;  %9623 = vmatprep.mubr.msk.f32.mxu0 %vm9806_vm7, %v13844_v59  ;;  %v11424_v23 = vsel %vm1059_vm6, %v1110_v21, %v1112_v19  ;;  %v11429_v0 = vsel %vm1059_vm6, %v1098_v3, %v1100_v46  ;;  %v321_v31 = vrot.slane %v11341_v42, 2  ;;  %v1299_v12 = vsel %vm1284_vm10, %v1266_v43, %v11178_v55 }
 0x155   :  { %208 = vrot.lane.b32.xlu1 %v147_v47, %s9799_s16  ;;  %v796_v51 = vrot.slane %v11287_v48, 5  ;;  %v13850_v46 = vrot.slane %v11341_v42, 3  ;;  %v1332_v17 = vsel %vm1317_vm11, %v1299_v12, %v11191_v1  ;;  %v11456_v55 = vsel %vm582_vm2, %v635_v58, %v637_v52 }
 0x156   :  { %695 = vrot.lane.b32.xlu0 %v634_v14, %s9800_s17  ;;  %v11442_v14 = vsel %vm105_vm1, %v160_v22, %v162_v11  ;;  %v955_v3 = vrot.slane %v11287_v48, 6  ;;  %v13847_v29 = vrot.slane %v11341_v42, 4  ;;  %v1365_v21 = vsel %vm1350_vm12, %v1332_v17, %v11247_v10 }
 0x157   :  { %v11421_v25 = vpop.permute.xlu1 %530  ;;  %v13851_v1 = vrot.slane %v11287_v48, 7  ;;  %v13846_v22 = vrot.slane %v11435_v44, 1  ;;  %v1398_v56 = vsel %vm1383_vm13, %v1365_v21, %v992_v57  ;;  %v11469_v36 = vsel %vm264_vm3, %v319_v37, %v321_v31 }
 0x158   :  { %v11439_v47 = vpop.permute.xlu0 %518  ;;  %v13849_v43 = vrot.slane %v11341_v42, 6  ;;  %v11478_v59 = vsel %vm741_vm4, %v794_v35, %v796_v51  ;;  %v11483_v57 = vsel %vm423_vm0, %v478_v9, %v13850_v46  ;;  %v11494_v35 = vsel %vm582_vm2, %v637_v52, %v13847_v29 }
 0x159   :  { %842 = vrot.lane.b32.xlu1 %v11282_v49, %s9802_s19  ;;  %v13848_v49 = vrot.slane %v11341_v42, 5  ;;  %v11501_v9 = vsel %vm1059_vm6, %v1112_v19, %v13851_v1  ;;  %v13865_v19 = vrot.slane %v11435_v44, 2 }
 0x15a   :  { %220 = vrot.lane.b32.xlu0 %v11293_v61, %s9799_s16  ;;  %13861 = vst [vmem:[#allocation2_spill] sm:$0xff] %v11501_v9  ;;  %v959_v9 = vrot.slane %v11435_v44, 6 }
 0x15b   :  { %v1151_v58 = vpop.permute.xlu1 %1150  ;;  %v4597_v53 = vpop.f32.mrf.mxu0 }
 0x15c   :  { %v1431_v12 = vsel %vm1416_vm14, %v1398_v56, %v1151_v58  ;;  %v4598_v61 = vadd.f32 %v11453_v30, %v4597_v53  ;;  %v11475_v17 = vpop.permute.xlu0 %846  ;;  %v11489_v56 = vsel %vm900_vm5, %v953_v18, %v955_v3  ;;  %v11511_v18 = vsel %vm105_vm1, %v162_v11, %v13846_v22 }
 0x15d   :  { %v2167_v37 = vcombine.high %v1431_v12, %v1431_v12  ;;  %v2174_v21 = vrot.slane %v1431_v12, %v10139_v62  ;;  %367 = vrot.lane.b32.xlu1 %v11300_v32, %s9801_s18  ;;  %v9583_v10 = vpop.f32.mrf.mxu0  ;;  %v11506_v32 = vsel %vm741_vm4, %v796_v51, %v13848_v49  ;;  %13863 = vst [vmem:[#allocation4_spill] sm:$0xff] %v11511_v18 }
 0x15e   :  { %v4751_v58 = vmax.f32 %v4598_v61, 0.0  ;;  %854 = vrot.lane.b32.xlu0 %v11305_v40, %s9802_s19  ;;  %13862 = vst [vmem:[#allocation3_spill] sm:$0xff] %v11506_v32  ;;  %v11519_v40 = vsel %vm900_vm5, %v955_v3, %v13849_v43  ;;  %v11524_v51 = vsel %vm264_vm3, %v321_v31, %v13865_v19 }
 0x15f   :  { %v2181_v52 = vrot.slane %v2167_v37, %v10139_v62  ;;  %v2182_v53 = vcombine.high %v2174_v21, %v2174_v21  ;;  %v11514_v10 = vpop.permute.xlu1 %689  ;;  %13864 = vst [vmem:[#allocation5_spill] sm:$0xff] %v11519_v40  ;;  %13866 = vst [vmem:[#allocation6_spill] sm:$0xff] %v11524_v51  ;;  %v1116_v37 = vrot.slane %v11341_v42, 7  ;;  %v2190_v49 = vrot.slane %v2174_v21, %v10139_v62 }
 0x160   :  { %v4813_v12 = vcombine.high %v4751_v58, %v4751_v58  ;;  %v4820_v61 = vrot.slane %v4751_v58, %v10139_v62  ;;  %v11527_v11 = vpop.permute.xlu0 %677 }
 0x161   :  { %v2183_v29 = vcombine.high %v2181_v52, %v2181_v52  ;;  %v2204_v3 = vrot.slane %v2182_v53, %v10139_v62  ;;  %1001 = vrot.lane.b32.xlu1 %v11319_v4, %s9803_s22  ;;  %v2197_v22 = vrot.slane %v2181_v52, %v10139_v62 }
 0x162   :  { %v4827_v19 = vrot.slane %v4813_v12, %v10139_v62  ;;  %v4828_v43 = vcombine.high %v4820_v61, %v4820_v61  ;;  %v4836_v58 = vrot.slane %v4820_v61, %v10139_v62  ;;  %379 = vrot.lane.b32.xlu0 %v11324_v38, %s9801_s18 }
 0x163   :  { %v2211_v21 = vrot.slane %v2183_v29, %v10139_v62  ;;  %v3669_v53 = vcombine.low %v2190_v49, %v2204_v3  ;;  %v9452_v1 = vcombine.high %v2190_v49, %v2204_v3  ;;  %v11543_v51 = vpop.permute.xlu1 %198 }
 0x164   :  { %v4829_v4 = vcombine.high %v4827_v19, %v4827_v19  ;;  %v4843_v31 = vrot.slane %v4827_v19, %v10139_v62  ;;  %v4850_v12 = vrot.slane %v4828_v43, %v10139_v62  ;;  %v11547_v40 = vpop.permute.xlu0 %1005  ;;  %v4858_v49 = vcombine.high %v4836_v58, %v4836_v58 }
 0x165   :  { %v3671_v38 = vcombine.low %v2197_v22, %v2211_v21  ;;  %v9453_v18 = vcombine.high %v2197_v22, %v2211_v21  ;;  %v3679_v46 = vrot.slane %v3669_v53, %v10139_v62  ;;  %v3686_v52 = vrot.slane %v9452_v1, %v10139_v62  ;;  %526 = vrot.lane.b32.xlu1 %v11334_v27, %s9798_s15 }
 0x166   :  { %v4857_v29 = vrot.slane %v4829_v4, %v10139_v62  ;;  %v4860_v3 = vcombine.high %v4850_v12, %v4850_v12  ;;  %1013 = vrot.lane.b32.xlu0 %v11347_v41, %s9803_s22  ;;  %v13867_v43 = vrot.slane %v11287_v48, 7  ;;  %v13869_v27 = vrot.slane %v11435_v44, 3  ;;  %v11576_v48 = vld [vmem:[%s13841_s0 + $0xf8] sm:$0xff] }
 0x167   :  { %v3693_v22 = vrot.slane %v3671_v38, %v10139_v62  ;;  %v3700_v21 = vrot.slane %v9453_v18, %v10139_v62  ;;  %v3701_v1 = vcombine.low %v3679_v46, %v3686_v52  ;;  %v11564_v53 = vpop.permute.xlu1 %214  ;;  %v13870_v4 = vrot.slane %v11341_v42, 3  ;;  %13872 = vst [vmem:[#allocation9_spill] sm:$0xff] %v11576_v48 }
 0x168   :  { %v11560_v19 = vsel %vm1059_vm6, %v13867_v43, %v1116_v37  ;;  %v4859_v41 = vcombine.high %v4843_v31, %v4843_v31  ;;  %v4861_v43 = vcombine.high %v4857_v29, %v4857_v29  ;;  %v6597_v38 = vmax.f32 %v4858_v49, %v4860_v3 }
 0x169   :  { %13868 = vst [vmem:[#allocation7_spill] sm:$0xff] %v11560_v19  ;;  %v11571_v61 = vsel %vm423_vm0, %v13870_v4, %v13869_v27  ;;  %v11578_v19 = vpop.permute.xlu0 %202  ;;  %v13873_v46 = vrot.slane %v11435_v44, 5  ;;  %v13874_v18 = vrot.slane %v11341_v42, 5  ;;  %1160 = vrot.lane.b32.xlu1 %v11356_v2, %s9804_s23  ;;  %v3702_v27 = vcombine.low %v3693_v22, %v3700_v21 }
 0x16a   :  { %13871 = vst [vmem:[#allocation8_spill] sm:$0xff] %v11571_v61  ;;  %v13876_v4 = vrot.slane %v11435_v44, 4  ;;  %v13877_v61 = vrot.slane %v11341_v42, 4  ;;  %v13878_v49 = vrot.slane %v11435_v44, 7  ;;  %538 = vrot.lane.b32.xlu0 %v11361_v16, %s9798_s15  ;;  %v13856_v2 = vrot.slane %v11576_v48, 2 }
 0x16b   :  { %v11585_v52 = vsel %vm741_vm4, %v13874_v18, %v13873_v46  ;;  %v6537_v46 = vmax.f32 %v4836_v58, %v4850_v12  ;;  %v6538_v18 = vmax.f32 %v4843_v31, %v4857_v29  ;;  %v11610_v21 = vpop.permute.xlu1 %848  ;;  %v3716_v31 = vrot.slane %v3702_v27, %v10139_v62 }
 0x16c   :  { %13875 = vst [vmem:[#allocation10_spill] sm:$0xff] %v11585_v52  ;;  %v11594_v32 = vsel %vm582_vm2, %v13877_v61, %v13876_v4  ;;  %v11599_v3 = vsel %vm1059_vm6, %v1116_v37, %v13878_v49  ;;  %v6598_v52 = vmax.f32 %v4859_v41, %v4861_v43  ;;  %v9778_v61 = vld [vmem:[%s13841_s0 + $0xa8] sm:$0xff]  ;;  %v4602_v37 = vpop.f32.mrf.mxu0  ;;  %v3709_v4 = vrot.slane %v3701_v1, %v10139_v62 }
 0x16d   :  { %v1240_v22 = vsel %vm1218_vm8, %v9778_v61, %v11155_v39  ;;  %v13858_v58 = vrot.slane %v11576_v48, 1  ;;  %v11617_v12 = vmax.f32 %v6537_v46, %v6597_v38  ;;  %v4603_v41 = vadd.f32 %v11453_v30, %v4602_v37  ;;  %v11622_v43 = vpop.permute.xlu0 %836  ;;  %685 = vrot.lane.b32.xlu1 %v11366_v54, %s9800_s17 }
 0x16e   :  { %v1273_v16 = vsel %vm1251_vm9, %v1240_v22, %v11199_v6  ;;  %v11619_v29 = vmax.f32 %v6538_v18, %v6598_v52  ;;  %v9586_v1 = vpop.f32.mrf.mxu0  ;;  %v3717_v27 = vcombine.low %v3709_v4, %v3716_v31  ;;  %v13853_v49 = vrot.slane %v11576_v48, 4  ;;  %1172 = vrot.lane.b32.xlu0 %v11379_v20, %s9804_s23 }
 0x16f   :  { %v1306_v39 = vsel %vm1284_vm10, %v1273_v16, %v11254_v5  ;;  %v13857_v6 = vrot.slane %v11576_v48, 3  ;;  %v4752_v46 = vmax.f32 %v4603_v41, 0.0  ;;  %v13879_v5 = vrot.slane %v11341_v42, 6  ;;  %v11643_v61 = vpop.permute.xlu1 %357 }
 0x170   :  { %v1339_v38 = vsel %vm1317_vm11, %v1306_v39, %v11374_v33  ;;  %9624 = vmatmul.mubr.msk.f32.gmra.mxu0 %vm4468_vm15, %v3717_v27  ;;  %v13852_v33 = vrot.slane %v11576_v48, 6  ;;  %v13854_v22 = vrot.slane %v11576_v48, 5  ;;  %v13855_v37 = vrot.slane %v11576_v48, 7 }
 0x171   :  { %v11639_v54 = vsel %vm900_vm5, %v13879_v5, %v959_v9  ;;  %v1372_v18 = vsel %vm1350_vm12, %v1339_v38, %v11475_v17  ;;  %v4862_v42 = vcombine.high %v4752_v46, %v4752_v46  ;;  %v4869_v4 = vrot.slane %v4752_v46, %v10139_v62  ;;  %v1165_v31 = vpop.permute.xlu0 %1164  ;;  %222 = vrot.lane.b32.xlu1 %v11384_v8, %s9799_s16 }
 0x172   :  { %v1405_v20 = vsel %vm1383_vm13, %v1372_v18, %v11547_v40  ;;  %v13880_v17 = vrot.slane %v11435_v44, 2  ;;  %v13881_v41 = vmov 0.0   ;;  %v13882_v40 = vrot.slane %v11435_v44, 1  ;;  %697 = vrot.lane.b32.xlu0 %v11391_v60, %s9800_s17 }
 0x173   :  { %9626 = vmatprep.mubr.msk.f32.mxu0 %vm9806_vm7, %v13881_v41  ;;  %v1438_v39 = vsel %vm1416_vm14, %v1405_v20, %v1165_v31  ;;  %v13883_v27 = vrot.slane %v11435_v44, 4  ;;  %v13884_v46 = vrot.slane %v11435_v44, 3  ;;  %v4876_v5 = vrot.slane %v4862_v42, %v10139_v62 }
 0x174   :  { %v11657_v16 = vsel %vm264_vm3, %v13880_v17, %v13856_v2  ;;  %v11669_v1 = vsel %vm105_vm1, %v13882_v40, %v13858_v58  ;;  %v4877_v18 = vcombine.high %v4869_v4, %v4869_v4  ;;  %v4885_v20 = vrot.slane %v4869_v4, %v10139_v62  ;;  %v11690_v40 = vpop.permute.xlu1 %373 }
 0x175   :  { %v11676_v38 = vsel %vm582_vm2, %v13883_v27, %v13853_v49  ;;  %v11683_v8 = vsel %vm423_vm0, %v13884_v46, %v13857_v6  ;;  %v2475_v31 = vcombine.high %v1438_v39, %v1438_v39  ;;  %v2482_v17 = vrot.slane %v1438_v39, %v10139_v62  ;;  %v9779_v39 = vld [vmem:[%s13841_s0 + $0xb0] sm:$0xff]  ;;  %856 = vrot.lane.b32.xlu1 %v11394_v13, %s9802_s19 }
 0x176   :  { %v11695_v27 = vsel %vm900_vm5, %v959_v9, %v13852_v33  ;;  %v13885_v42 = vrot.slane %v11435_v44, 5  ;;  %v13887_v60 = vrot.slane %v11435_v44, 7  ;;  %v1241_v9 = vsel %vm1218_vm8, %v9779_v39, %v11221_v7  ;;  %v9780_v44 = vld [vmem:[%s13841_s0 + $0x80] sm:$0xff]  ;;  %844 = vrot.lane.b32.xlu0 %v11401_v50, %s9802_s19 }
 0x177   :  { %v4878_v33 = vcombine.high %v4876_v5, %v4876_v5  ;;  %v4892_v49 = vrot.slane %v4876_v5, %v10139_v62  ;;  %v2489_v2 = vrot.slane %v2475_v31, %v10139_v62  ;;  %v2490_v7 = vcombine.high %v2482_v17, %v2482_v17  ;;  %v4607_v13 = vpop.f32.mrf.mxu0 }
 0x178   :  { %v11702_v46 = vsel %vm741_vm4, %v13885_v42, %v13854_v22  ;;  %v11709_v4 = vsel %vm1059_vm6, %v13887_v60, %v13855_v37  ;;  %v4899_v42 = vrot.slane %v4877_v18, %v10139_v62  ;;  %v11718_v22 = vpop.permute.xlu0 %361  ;;  %v1235_v60 = vsel %vm1218_vm8, %v9780_v44, %v11228_v26  ;;  %v11739_v44 = vpop.permute.xlu1 %1007 }
 0x179   :  { %13886 = vst [vmem:[#allocation11_spill] sm:$0xff] %v11702_v46  ;;  %13888 = vst [vmem:[#allocation12_spill] sm:$0xff] %v11709_v4  ;;  %v1274_v37 = vsel %vm1251_vm9, %v1241_v9, %v11308_v24  ;;  %v1268_v5 = vsel %vm1251_vm9, %v1235_v60, %v11314_v63  ;;  %v4906_v18 = vrot.slane %v4878_v33, %v10139_v62  ;;  %1003 = vrot.lane.b32.xlu1 %v11408_v28, %s9803_s22  ;;  %vm7833_vm0 = vcmask 64512  }
 0x17a   :  { %v4907_v39 = vcombine.high %v4885_v20, %v4885_v20  ;;  %v4909_v6 = vcombine.high %v4899_v42, %v4899_v42  ;;  %v1307_v26 = vsel %vm1284_vm10, %v1274_v37, %v11421_v25  ;;  %v2491_v24 = vcombine.high %v2489_v2, %v2489_v2  ;;  %381 = vrot.lane.b32.xlu0 %v11411_v15, %s9801_s18 }
 0x17b   :  { %v2505_v31 = vrot.slane %v2489_v2, %v10139_v62  ;;  %v2512_v9 = vrot.slane %v2490_v7, %v10139_v62  ;;  %v4908_v58 = vcombine.high %v4892_v49, %v4892_v49  ;;  %v4910_v63 = vcombine.high %v4906_v18, %v4906_v18  ;;  %v9589_v2 = vpop.f32.mrf.mxu0 }
 0x17c   :  { %v6539_v60 = vmax.f32 %v4885_v20, %v4899_v42  ;;  %v6599_v33 = vmax.f32 %v4907_v39, %v4909_v6  ;;  %v996_v52 = vpop.permute.xlu0 %995  ;;  %v1301_v4 = vsel %vm1284_vm10, %v1268_v5, %v11439_v47  ;;  %v11744_v50 = vrot.slane %v2491_v24, %v10139_v62  ;;  %v11759_v28 = vpop.permute.xlu1 %520 }
 0x17d   :  { %v2521_v25 = vcombine.high %v2505_v31, %v2505_v31  ;;  %v2522_v37 = vcombine.high %v2512_v9, %v2512_v9  ;;  %v6540_v7 = vmax.f32 %v4892_v49, %v4906_v18  ;;  %v6600_v48 = vmax.f32 %v4908_v58, %v4910_v63  ;;  %540 = vrot.lane.b32.xlu1 %v11414_v45, %s9798_s15 }
 0x17e   :  { %v11748_v46 = vmax.f32 %v6539_v60, %v6599_v33  ;;  %v4608_v20 = vadd.f32 %v11453_v30, %v4607_v13  ;;  %v1340_v47 = vsel %vm1317_vm11, %v1307_v26, %v11514_v10  ;;  %v11756_v6 = vrot.slane %v2482_v17, %v10139_v62  ;;  %v9781_v10 = vld [vmem:[%s13841_s0 + $0x78] sm:$0xff]  ;;  %1015 = vrot.lane.b32.xlu0 %v11417_v34, %s9803_s22 }
 0x17f   :  { %v3965_v42 = vcombine.low %v2522_v37, %v2505_v31  ;;  %v3966_v5 = vcombine.low %v11744_v50, %v2521_v25  ;;  %v1334_v58 = vsel %vm1317_vm11, %v1301_v4, %v11527_v11  ;;  %v11763_v49 = vmax.f32 %v6540_v7, %v6600_v48  ;;  %v9782_v26 = vld [vmem:[%s13841_s0 + $0xb8] sm:$0xff] }
 0x180   :  { %v7121_v18 = vcombine.low %v11619_v29, %v11748_v46  ;;  %v4753_v15 = vmax.f32 %v4608_v20, 0.0  ;;  %v11767_v39 = vpop.permute.xlu0 %516  ;;  %v1234_v17 = vsel %vm1218_vm8, %v9781_v10, %v11543_v51  ;;  %v1242_v11 = vsel %vm1218_vm8, %v9782_v26, %v11564_v53  ;;  %v9783_v53 = vld [vmem:[%s13841_s0 + $0x88] sm:$0xff]  ;;  %v1155_v33 = vpop.permute.xlu1 %1154 }
 0x181   :  { %v3987_v48 = vrot.slane %v3965_v42, %v10139_v62  ;;  %v3994_v4 = vrot.slane %v3966_v5, %v10139_v62  ;;  %v6772_v24 = vcombine.low %v11748_v46, %v11763_v49  ;;  %v1367_v51 = vsel %vm1350_vm12, %v1334_v58, %v11622_v43  ;;  %1174 = vrot.lane.b32.xlu1 %v11424_v23, %s9804_s23 }
 0x182   :  { %v4911_v31 = vcombine.high %v4753_v15, %v4753_v15  ;;  %v4918_v13 = vrot.slane %v4753_v15, %v10139_v62  ;;  %v1236_v63 = vsel %vm1218_vm8, %v9783_v53, %v11578_v19  ;;  %v2520_v45 = vcombine.high %v11756_v6, %v11756_v6  ;;  %1162 = vrot.lane.b32.xlu0 %v11429_v0, %s9804_s23 }
 0x183   :  { %v1400_v60 = vsel %vm1383_vm13, %v1367_v51, %v996_v52  ;;  %v11798_v43 = vcombine.low %v3987_v48, %v3994_v4  ;;  %v11801_v25 = vrot.slane %v6772_v24, %v10139_v62  ;;  %v1373_v19 = vsel %vm1350_vm12, %v1340_v47, %v11610_v21 }
 0x184   :  { %v4925_v34 = vrot.slane %v4911_v31, %v10139_v62  ;;  %v4926_v37 = vcombine.high %v4918_v13, %v4918_v13  ;;  %v4934_v2 = vrot.slane %v4918_v13, %v10139_v62  ;;  %v11805_v7 = vpop.permute.xlu0 %532  ;;  %v1267_v20 = vsel %vm1251_vm9, %v1234_v17, %v11643_v61  ;;  %v11829_v17 = vpop.permute.xlu1 %675 }
 0x185   :  { %v1433_v52 = vsel %vm1416_vm14, %v1400_v60, %v1155_v33  ;;  %v13889_v42 = vcombine.low %v11617_v12, %v11619_v29  ;;  %v1275_v58 = vsel %vm1251_vm9, %v1242_v11, %v11690_v40  ;;  %v11826_v61 = vcombine.low %v2512_v9, %v2520_v45  ;;  %224 = vrot.lane.b32.xlu1 %v11442_v14, %s9799_s16 }
 0x186   :  { %v4927_v15 = vcombine.high %v4925_v34, %v4925_v34  ;;  %v4941_v21 = vrot.slane %v4925_v34, %v10139_v62  ;;  %v4948_v47 = vrot.slane %v4926_v37, %v10139_v62  ;;  %v2230_v23 = vcombine.high %v1433_v52, %v1433_v52  ;;  %699 = vrot.lane.b32.xlu0 %v11456_v55, %s9800_s17 }
 0x187   :  { %v11818_v5 = vrot.slane %v13889_v42, %v10139_v62  ;;  %v2237_v10 = vrot.slane %v1433_v52, %v10139_v62  ;;  %v1406_v40 = vsel %vm1383_vm13, %v1373_v19, %v11739_v44  ;;  %v4956_v11 = vcombine.high %v4934_v2, %v4934_v2  ;;  %v4612_v14 = vpop.f32.mrf.mxu0 }
 0x188   :  { %v4955_v26 = vrot.slane %v4927_v15, %v10139_v62  ;;  %v4958_v48 = vcombine.high %v4948_v47, %v4948_v47  ;;  %v1167_v4 = vpop.permute.xlu0 %1166  ;;  %v4957_v24 = vcombine.high %v4941_v21, %v4941_v21  ;;  %v6541_v0 = vmax.f32 %v4934_v2, %v4948_v47  ;;  %v11849_v37 = vpop.permute.xlu1 %691 }
 0x189   :  { %v2244_v9 = vrot.slane %v2230_v23, %v10139_v62  ;;  %v2245_v51 = vcombine.high %v2237_v10, %v2237_v10  ;;  %v11840_v53 = vrot.slane %v2237_v10, %v10139_v62  ;;  %v1439_v44 = vsel %vm1416_vm14, %v1406_v40, %v1167_v4  ;;  %383 = vrot.lane.b32.xlu1 %v11469_v36, %s9801_s18  ;;  %v9592_v23 = vpop.f32.mrf.mxu0 }
 0x18a   :  { %v4959_v31 = vcombine.high %v4955_v26, %v4955_v26  ;;  %v6601_v13 = vmax.f32 %v4956_v11, %v4958_v48  ;;  %v1269_v45 = vsel %vm1251_vm9, %v1236_v63, %v11718_v22  ;;  %v2524_v52 = vcombine.high %v1439_v44, %v1439_v44  ;;  %858 = vrot.lane.b32.xlu0 %v11478_v59, %s9802_s19 }
 0x18b   :  { %v2246_v60 = vcombine.high %v2244_v9, %v2244_v9  ;;  %v2260_v33 = vrot.slane %v2244_v9, %v10139_v62  ;;  %v2267_v34 = vrot.slane %v2245_v51, %v10139_v62  ;;  %v2531_v42 = vrot.slane %v1439_v44, %v10139_v62 }
 0x18c   :  { %v6602_v2 = vmax.f32 %v4957_v24, %v4959_v31  ;;  %v6661_v19 = vmax.f32 %v6541_v0, %v6601_v13  ;;  %v11852_v15 = vpop.permute.xlu0 %679  ;;  %v6542_v47 = vmax.f32 %v4941_v21, %v4955_v26  ;;  %v11858_v22 = vsel %vm1284_vm10, %v1269_v45, %v11759_v28 }
 0x18d   :  { %v1300_v63 = vsel %vm1284_vm10, %v1267_v20, %v11767_v39  ;;  %v2275_v40 = vcombine.high %v11840_v53, %v11840_v53  ;;  %v2538_v11 = vrot.slane %v2524_v52, %v10139_v62  ;;  %v2539_v48 = vcombine.high %v2531_v42, %v2531_v42  ;;  %v217_v20 = vpop.permute.xlu1 %216  ;;  %542 = vrot.lane.b32.xlu1 %v11483_v57, %s9798_s15 }
 0x18e   :  { %v7122_v10 = vcombine.low %v11763_v49, %v6661_v19  ;;  %v11871_v28 = vrot.slane %v2246_v60, %v10139_v62  ;;  %v2277_v21 = vcombine.high %v2267_v34, %v2267_v34  ;;  %v2523_v39 = vcombine.high %v11744_v50, %v11744_v50  ;;  %1017 = vrot.lane.b32.xlu0 %v11489_v56, %s9803_s22 }
 0x18f   :  { %v2547_v36 = vrot.slane %v2531_v42, %v10139_v62  ;;  %v11876_v49 = vmax.f32 %v6542_v47, %v6602_v2  ;;  %v2276_v26 = vcombine.high %v2260_v33, %v2260_v33  ;;  %v2540_v4 = vcombine.high %v2538_v11, %v2538_v11 }
 0x190   :  { %v2554_v24 = vrot.slane %v2538_v11, %v10139_v62  ;;  %v205_v0 = vpop.permute.xlu0 %204  ;;  %v11883_v59 = vrot.slane %v7121_v18, %v10139_v62  ;;  %v1308_v9 = vsel %vm1284_vm10, %v1275_v58, %v11805_v7  ;;  %v2561_v50 = vrot.slane %v2539_v48, %v10139_v62  ;;  %v13890_v11 = vld [vmem:[#allocation2_spill] sm:$0xff] }
 0x191   :  { %v2569_v51 = vcombine.high %v2547_v36, %v2547_v36  ;;  %v11890_v31 = vcombine.low %v2267_v34, %v2275_v40  ;;  %v11893_v13 = vrot.slane %v2540_v4, %v10139_v62  ;;  %v4012_v45 = vcombine.low %v2523_v39, %v2547_v36  ;;  %v839_v58 = vpop.permute.xlu1 %838  ;;  %701 = vrot.lane.b32.xlu1 %v11494_v35, %s9800_s17 }
 0x192   :  { %v2570_v44 = vcombine.high %v2554_v24, %v2554_v24  ;;  %v11897_v29 = vcombine.low %v2277_v21, %v2260_v33  ;;  %v2571_v46 = vcombine.high %v2561_v50, %v2561_v50  ;;  %v4613_v7 = vadd.f32 %v11453_v30, %v4612_v14  ;;  %1176 = vrot.lane.b32.xlu0 %v13890_v11, %s9804_s23 }
 0x193   :  { %v4013_v18 = vcombine.low %v2561_v50, %v2569_v51  ;;  %v6773_v60 = vcombine.low %v6661_v19, %v11876_v49  ;;  %v11902_v57 = vcombine.low %v11871_v28, %v2276_v26  ;;  %v1333_v56 = vsel %vm1317_vm11, %v1300_v63, %v11829_v17  ;;  %v4617_v21 = vpop.f32.mrf.mxu0 }
 0x194   :  { %v4015_v34 = vcombine.low %v11893_v13, %v2570_v44  ;;  %v835_v2 = vpop.permute.xlu0 %834  ;;  %v4014_v33 = vcombine.low %v2571_v46, %v2554_v24  ;;  %v4754_v47 = vmax.f32 %v4613_v7, 0.0  ;;  %v11913_v14 = vrot.slane %v7122_v10, %v10139_v62  ;;  %v13891_v46 = vld [vmem:[#allocation3_spill] sm:$0xff] }
 0x195   :  { %v4029_v42 = vrot.slane %v4013_v18, %v10139_v62  ;;  %v3735_v19 = vrot.slane %v11890_v31, %v10139_v62  ;;  %v4022_v23 = vrot.slane %v4012_v45, %v10139_v62  ;;  %v3742_v17 = vrot.slane %v11897_v29, %v10139_v62  ;;  %v11925_v10 = vpop.permute.xlu1 %363  ;;  %860 = vrot.lane.b32.xlu1 %v13891_v46, %s9802_s19  ;;  %v9595_v18 = vpop.f32.mrf.mxu0 }
 0x196   :  { %v4043_v40 = vrot.slane %v4015_v34, %v10139_v62  ;;  %v4036_v63 = vrot.slane %v4014_v33, %v10139_v62  ;;  %v4960_v48 = vcombine.high %v4754_v47, %v4754_v47  ;;  %v4967_v35 = vrot.slane %v4754_v47, %v10139_v62 }
 0x197   :  { %v11928_v39 = vrot.slane %v6773_v60, %v10139_v62  ;;  %v3749_v36 = vrot.slane %v11902_v57, %v10139_v62  ;;  %v4044_v26 = vcombine.low %v4022_v23, %v4029_v42  ;;  %v4618_v4 = vadd.f32 %v11453_v30, %v4617_v21  ;;  %v9784_v60 = vld [vmem:[%s13841_s0 + $0xc0] sm:$0xff]  ;;  %v13892_v57 = vld [vmem:[#allocation4_spill] sm:$0xff] }
 0x198   :  { %v11933_v24 = vpop.permute.xlu0 %850  ;;  %v11937_v50 = vsel %vm1317_vm11, %v1308_v9, %v11849_v37  ;;  %v4974_v51 = vrot.slane %v4960_v48, %v10139_v62  ;;  %v4975_v44 = vcombine.high %v4967_v35, %v4967_v35  ;;  %v4983_v45 = vrot.slane %v4967_v35, %v10139_v62  ;;  %226 = vrot.lane.b32.xlu0 %v13892_v57, %s9799_s16 }
 0x199   :  { %v1335_v7 = vsel %vm1317_vm11, %v11858_v22, %v11852_v15  ;;  %v11950_v37 = vsel %vm1218_vm8, %v9784_v60, %v217_v20  ;;  %v4755_v9 = vmax.f32 %v4618_v4, 0.0  ;;  %v4045_v34 = vcombine.low %v4036_v63, %v4043_v40  ;;  %v9785_v15 = vld [vmem:[%s13841_s0 + $0x90] sm:$0xff]  ;;  %v994_v23 = vpop.permute.xlu1 %993 }
 0x19a   :  { %v4976_v33 = vcombine.high %v4974_v51, %v4974_v51  ;;  %v4990_v42 = vrot.slane %v4974_v51, %v10139_v62  ;;  %v4997_v47 = vrot.slane %v4975_v44, %v10139_v62  ;;  %v1237_v22 = vsel %vm1218_vm8, %v9785_v15, %v205_v0  ;;  %v13893_v44 = vld [vmem:[#allocation5_spill] sm:$0xff] }
 0x19b   :  { %v5009_v11 = vcombine.high %v4755_v9, %v4755_v9  ;;  %v5016_v20 = vrot.slane %v4755_v9, %v10139_v62  ;;  %v4052_v48 = vrot.slane %v4044_v26, %v10139_v62  ;;  %v4059_v35 = vrot.slane %v4045_v34, %v10139_v62  ;;  %1019 = vrot.lane.b32.xlu1 %v13893_v44, %s9803_s22  ;;  %v13894_v26 = vld [vmem:[#allocation6_spill] sm:$0xff] }
 0x19c   :  { %v11963_v40 = vpop.permute.xlu0 %375  ;;  %v5004_v63 = vrot.slane %v4976_v33, %v10139_v62  ;;  %v5005_v21 = vcombine.high %v4983_v45, %v4983_v45  ;;  %v5007_v4 = vcombine.high %v4997_v47, %v4997_v47  ;;  %v1368_v51 = vsel %vm1350_vm12, %v1335_v7, %v839_v58  ;;  %385 = vrot.lane.b32.xlu0 %v13894_v26, %s9801_s18  ;;  %v13895_v26 = vld [vmem:[#allocation7_spill] sm:$0xff] }
 0x19d   :  { %v5023_v0 = vrot.slane %v5009_v11, %v10139_v62  ;;  %v5024_v46 = vcombine.high %v5016_v20, %v5016_v20  ;;  %v5032_v18 = vrot.slane %v5016_v20, %v10139_v62  ;;  %v4060_v60 = vcombine.low %v4052_v48, %v4059_v35  ;;  %v1010_v15 = vpop.permute.xlu1 %1009 }
 0x19e   :  { %v5006_v9 = vcombine.high %v4990_v42, %v4990_v42  ;;  %v5008_v57 = vcombine.high %v5004_v63, %v5004_v63  ;;  %v6543_v34 = vmax.f32 %v4983_v45, %v4997_v47  ;;  %v6603_v33 = vmax.f32 %v5005_v21, %v5007_v4  ;;  %v13896_v21 = vld [vmem:[#allocation8_spill] sm:$0xff] }
 0x19f   :  { %v1366_v12 = vsel %vm1350_vm12, %v1333_v56, %v835_v2  ;;  %v5025_v58 = vcombine.high %v5023_v0, %v5023_v0  ;;  %v5039_v7 = vrot.slane %v5023_v0, %v10139_v62  ;;  %v5046_v44 = vrot.slane %v5024_v46, %v10139_v62  ;;  %9645 = vmatmul.mubr.msk.f32.vlgmr.msra.gmra.mxu1 %vm4468_vm15, %v4060_v60 }
 0x1a0   :  { %v998_v11 = vpop.permute.xlu0 %997  ;;  %v6544_v20 = vmax.f32 %v4990_v42, %v5004_v63  ;;  %v6604_v48 = vmax.f32 %v5006_v9, %v5008_v57  ;;  %v6663_v35 = vmax.f32 %v6543_v34, %v6603_v33  ;;  %1178 = vrot.lane.b32.xlu1 %v13895_v26, %s9804_s23  ;;  %v2278_v45 = vcombine.high %v11871_v28, %v11871_v28 }
 0x1a1   :  { %v5053_v47 = vrot.slane %v5025_v58, %v10139_v62  ;;  %v5054_v2 = vcombine.high %v5032_v18, %v5032_v18  ;;  %v5056_v56 = vcombine.high %v5046_v44, %v5046_v44  ;;  %544 = vrot.lane.b32.xlu0 %v13896_v21, %s9798_s15  ;;  %v11987_v4 = vcombine.low %v3742_v17, %v3749_v36  ;;  %v535_v0 = vpop.permute.xlu1 %534  ;;  %v13897_v58 = vld [vmem:[#allocation10_spill] sm:$0xff] }
 0x1a2   :  { %v11989_v42 = vmax.f32 %v6544_v20, %v6604_v48  ;;  %v7123_v63 = vcombine.low %v11876_v49, %v6663_v35  ;;  %9647 = vmatprep.mubr.msk.f32.mxu1 %vm9806_vm7, %v13881_v41  ;;  %v7487_v46 = vcombine.low %v11801_v25, %v11928_v39  ;;  %v7153_v60 = vcombine.low %v11883_v59, %v11913_v14 }
 0x1a3   :  { %v12000_v9 = vsel %vm1251_vm9, %v1237_v22, %v11925_v10  ;;  %v5055_v29 = vcombine.high %v5039_v7, %v5039_v7  ;;  %v5057_v17 = vcombine.high %v5053_v47, %v5053_v47  ;;  %v6605_v36 = vmax.f32 %v5054_v2, %v5056_v56  ;;  %v4622_v56 = vpop.f32.mrf.mxu0 }
 0x1a4   :  { %v12002_v57 = vpop.permute.xlu0 %522  ;;  %v6774_v49 = vcombine.low %v6663_v35, %v11989_v42  ;;  %v12006_v34 = vrot.slane %v7123_v63, %v10139_v62  ;;  %v1374_v33 = vsel %vm1350_vm12, %v11937_v50, %v11933_v24  ;;  %862 = vrot.lane.b32.xlu1 %v13897_v58, %s9802_s19  ;;  %v2572_v10 = vcombine.high %v11893_v13, %v11893_v13 }
 0x1a5   :  { %v6545_v22 = vmax.f32 %v5032_v18, %v5046_v44  ;;  %v6546_v20 = vmax.f32 %v5039_v7, %v5053_v47  ;;  %v6606_v48 = vmax.f32 %v5055_v29, %v5057_v17  ;;  %703 = vrot.lane.b32.xlu0 %v11594_v32, %s9800_s17  ;;  %v3765_v35 = vrot.slane %v11987_v4, %v10139_v62  ;;  %v1157_v2 = vpop.permute.xlu1 %1156  ;;  %v9787_v4 = vld [vmem:[%s13841_s0 + $0xc8] sm:$0xff] }
 0x1a6   :  { %v12020_v26 = vrot.slane %v6774_v49, %v10139_v62  ;;  %v1399_v24 = vsel %vm1383_vm13, %v1366_v12, %v994_v23  ;;  %v1401_v50 = vsel %vm1383_vm13, %v1368_v51, %v998_v11  ;;  %v7661_v18 = vcombine.low %v11913_v14, %v12006_v34  ;;  %v9598_v11 = vpop.f32.mrf.mxu0 }
 0x1a7   :  { %v6665_v7 = vmax.f32 %v6545_v22, %v6605_v36  ;;  %v12026_v44 = vmax.f32 %v6546_v20, %v6606_v48  ;;  %v1434_v32 = vsel %vm1416_vm14, %v1401_v50, %v1157_v2  ;;  %v4623_v47 = vadd.f32 %v11453_v30, %v4622_v56 }
 0x1a8   :  { %v1153_v21 = vpop.permute.xlu0 %1152  ;;  %v1276_v63 = vsel %vm1251_vm9, %v11950_v37, %v11963_v40  ;;  %v2279_v12 = vcombine.high %v1434_v32, %v1434_v32  ;;  %v2286_v23 = vrot.slane %v1434_v32, %v10139_v62  ;;  %1180 = vrot.lane.b32.xlu1 %v11599_v3, %s9804_s23  ;;  %v1407_v29 = vsel %vm1383_vm13, %v1374_v33, %v1010_v15 }
 0x1a9   :  { %v1432_v51 = vsel %vm1416_vm14, %v1399_v24, %v1153_v21  ;;  %v12039_v17 = vsel %vm1284_vm10, %v1276_v63, %v535_v0  ;;  %v4756_v36 = vmax.f32 %v4623_v47, 0.0  ;;  %1021 = vrot.lane.b32.xlu0 %v11639_v54, %s9803_s22  ;;  %v12046_v22 = vpop.permute.xlu1 %681  ;;  %v6820_v15 = vcombine.low %v6665_v7, %v12026_v44 }
 0x1aa   :  { %v2222_v49 = vrot.slane %v1432_v51, %v10139_v62  ;;  %v2293_v37 = vrot.slane %v2279_v12, %v10139_v62  ;;  %v2294_v40 = vcombine.high %v2286_v23, %v2286_v23  ;;  %v2302_v58 = vrot.slane %v2286_v23, %v10139_v62 }
 0x1ab   :  { %v7124_v0 = vcombine.low %v11989_v42, %v6665_v7  ;;  %v5058_v33 = vcombine.high %v4756_v36, %v4756_v36  ;;  %v5065_v20 = vrot.slane %v4756_v36, %v10139_v62  ;;  %vm7842_vm1 = vcmask 130048  }
 0x1ac   :  { %v1169_v48 = vpop.permute.xlu0 %1168  ;;  %v2295_v24 = vcombine.high %v2293_v37, %v2293_v37  ;;  %v2309_v54 = vrot.slane %v2293_v37, %v10139_v62  ;;  %v2316_v50 = vrot.slane %v2294_v40, %v10139_v62  ;;  %v2324_v2 = vcombine.high %v2302_v58, %v2302_v58  ;;  %387 = vrot.lane.b32.xlu1 %v11657_v16, %s9801_s18 }
 0x1ad   :  { %v3767_v56 = vcombine.low %v2278_v45, %v2302_v58  ;;  %v5072_v32 = vrot.slane %v5058_v33, %v10139_v62  ;;  %v5073_v42 = vcombine.high %v5065_v20, %v5065_v20  ;;  %v2229_v7 = vrot.slane %v2222_v49, %v10139_v62  ;;  %228 = vrot.lane.b32.xlu0 %v11669_v1, %s9799_s16  ;;  %v207_v23 = vpop.permute.xlu1 %206 }
 0x1ae   :  { %v12065_v47 = vrot.slane %v2295_v24, %v10139_v62  ;;  %v2325_v21 = vcombine.high %v2309_v54, %v2309_v54  ;;  %v2326_v63 = vcombine.high %v2316_v50, %v2316_v50  ;;  %v3768_v12 = vcombine.low %v2316_v50, %v2324_v2 }
 0x1af   :  { %v5074_v16 = vcombine.high %v5072_v32, %v5072_v32  ;;  %v5081_v51 = vrot.slane %v5065_v20, %v10139_v62  ;;  %v12069_v28 = vrot.slane %v5072_v32, %v10139_v62  ;;  %v5095_v45 = vrot.slane %v5073_v42, %v10139_v62  ;;  %v4627_v33 = vpop.f32.mrf.mxu0 }
 0x1b0   :  { %v694_v11 = vpop.permute.xlu0 %693  ;;  %v1303_v1 = vsel %vm1284_vm10, %v12000_v9, %v12002_v57  ;;  %v12075_v36 = vcombine.low %v2326_v63, %v2309_v54  ;;  %705 = vrot.lane.b32.xlu1 %v11676_v38, %s9800_s17  ;;  %v12083_v49 = vrot.slane %v7487_v46, %v10139_v62  ;;  %v12089_v37 = vrot.slane %v7153_v60, %v10139_v62 }
 0x1b1   :  { %v12092_v40 = vcombine.low %v12065_v47, %v2325_v21  ;;  %v5102_v9 = vrot.slane %v5074_v16, %v10139_v62  ;;  %v5105_v57 = vcombine.high %v5095_v45, %v5095_v45  ;;  %546 = vrot.lane.b32.xlu0 %v11683_v8, %s9798_s15  ;;  %v12098_v38 = vrot.slane %v7661_v18, %v10139_v62  ;;  %v841_v60 = vpop.permute.xlu1 %840  ;;  %v13898_v21 = vld [vmem:[#allocation11_spill] sm:$0xff] }
 0x1b2   :  { %v12101_v46 = vrot.slane %v6820_v15, %v10139_v62  ;;  %v12104_v58 = vrot.slane %v7124_v0, %v10139_v62  ;;  %v3784_v59 = vrot.slane %v3768_v12, %v10139_v62  ;;  %v3718_v14 = vcombine.low %v2229_v7, %v11840_v53  ;;  %v9601_v53 = vpop.f32.mrf.mxu0 }
 0x1b3   :  { %v3777_v20 = vrot.slane %v3767_v56, %v10139_v62  ;;  %v5103_v24 = vcombine.high %v5081_v51, %v5081_v51  ;;  %v5104_v8 = vcombine.high %v12069_v28, %v12069_v28  ;;  %v6547_v18 = vmax.f32 %v5081_v51, %v5095_v45 }
 0x1b4   :  { %v12111_v54 = vpop.permute.xlu0 %218  ;;  %v3791_v15 = vrot.slane %v12075_v36, %v10139_v62  ;;  %v5106_v0 = vcombine.high %v5102_v9, %v5102_v9  ;;  %v3728_v50 = vrot.slane %v3718_v14, %v10139_v62  ;;  %v1440_v2 = vsel %vm1416_vm14, %v1407_v29, %v1169_v48  ;;  %1023 = vrot.lane.b32.xlu1 %v11695_v27, %s9803_s22 }
 0x1b5   :  { %v3798_v56 = vrot.slane %v12092_v40, %v10139_v62  ;;  %v6607_v32 = vmax.f32 %v5103_v24, %v5105_v57  ;;  %v2573_v42 = vcombine.high %v1440_v2, %v1440_v2  ;;  %v2580_v7 = vrot.slane %v1440_v2, %v10139_v62  ;;  %864 = vrot.lane.b32.xlu0 %v13898_v21, %s9802_s19  ;;  %v366_v48 = vpop.permute.xlu1 %365  ;;  %v9786_v57 = vld [vmem:[%s13841_s0 + $0x98] sm:$0xff]  ;;  %v13901_v24 = vld [vmem:[#allocation12_spill] sm:$0xff] }
 0x1b6   :  { %v12124_v63 = vcombine.low %v3777_v20, %v3784_v59  ;;  %v6548_v12 = vmax.f32 %v12069_v28, %v5102_v9  ;;  %v3750_v29 = vcombine.low %v3728_v50, %v3735_v19  ;;  %v4628_v27 = vadd.f32 %v11453_v30, %v4627_v33 }
 0x1b7   :  { %v1336_v16 = vsel %vm1317_vm11, %v1303_v1, %v12046_v22  ;;  %v2587_v51 = vrot.slane %v2573_v42, %v10139_v62  ;;  %v2588_v45 = vcombine.high %v2580_v7, %v2580_v7  ;;  %v1238_v59 = vsel %vm1218_vm8, %v9786_v57, %v207_v23  ;;  %v13899_v22 = vld [vmem:[#allocation9_spill] sm:$0xff] }
 0x1b8   :  { %v12138_v28 = vpop.permute.xlu0 %852  ;;  %v6608_v9 = vmax.f32 %v5104_v8, %v5106_v0  ;;  %v2596_v31 = vrot.slane %v2580_v7, %v10139_v62  ;;  %v12143_v30 = vsel %vm1317_vm11, %v12039_v17, %v694_v11  ;;  %v4757_v19 = vmax.f32 %v4628_v27, 0.0 }
 0x1b9   :  { %v13900_v1 = vrot.slane %v13899_v22, 1  ;;  %v6667_v14 = vmax.f32 %v6547_v18, %v6607_v32  ;;  %v2589_v33 = vcombine.high %v2587_v51, %v2587_v51  ;;  %v2603_v20 = vrot.slane %v2587_v51, %v10139_v62  ;;  %1182 = vrot.lane.b32.xlu0 %v13901_v24, %s9804_s23  ;;  %v1000_v50 = vpop.permute.xlu1 %999 }
 0x1ba   :  { %v3758_v23 = vrot.slane %v3750_v29, %v10139_v62  ;;  %v2610_v8 = vrot.slane %v2588_v45, %v10139_v62  ;;  %v2618_v0 = vcombine.high %v2596_v31, %v2596_v31  ;;  %v1369_v17 = vsel %vm1350_vm12, %v1336_v16, %v841_v60 }
 0x1bb   :  { %230 = vrot.lane.b32.xlu1 %v13900_v1, %s9799_s16  ;;  %v5107_v11 = vcombine.high %v4757_v19, %v4757_v19  ;;  %v12155_v2 = vrot.slane %v2589_v33, %v10139_v62  ;;  %v2619_v53 = vcombine.high %v2603_v20, %v2603_v20  ;;  %v4061_v18 = vcombine.low %v2572_v10, %v2596_v31 }
 0x1bc   :  { %v5114_v32 = vrot.slane %v4757_v19, %v10139_v62  ;;  %v12161_v42 = vpop.permute.xlu0 %377  ;;  %v12163_v7 = vmax.f32 %v6548_v12, %v6608_v9  ;;  %v2620_v21 = vcombine.high %v2610_v8, %v2610_v8  ;;  %v4062_v29 = vcombine.low %v2610_v8, %v2618_v0 }
 0x1bd   :  { %v5121_v60 = vrot.slane %v5107_v11, %v10139_v62  ;;  %v13902_v27 = vrot.slane %v13899_v22, 3  ;;  %v4064_v16 = vcombine.low %v12155_v2, %v2619_v53  ;;  %v3766_v10 = vcombine.low %v3758_v23, %v3765_v35  ;;  %v525_v19 = vpop.permute.xlu1 %524 }
 0x1be   :  { %v5122_v51 = vcombine.high %v5114_v32, %v5114_v32  ;;  %v5130_v13 = vrot.slane %v5114_v32, %v10139_v62  ;;  %v13903_v12 = vrot.slane %v13899_v22, 2  ;;  %v7170_v45 = vcombine.low %v12026_v44, %v6667_v14 }
 0x1bf   :  { %548 = vrot.lane.b32.xlu1 %v13902_v27, %s9798_s15  ;;  %v4063_v57 = vcombine.low %v2620_v21, %v2603_v20  ;;  %v4078_v9 = vrot.slane %v4062_v29, %v10139_v62  ;;  %v5123_v31 = vcombine.high %v5121_v60, %v5121_v60  ;;  %v4071_v1 = vrot.slane %v4061_v18, %v10139_v62  ;;  %s9813_s15 = smov 64  }
 0x1c0   :  { %389 = vrot.lane.b32.xlu0 %v13903_v12, %s9801_s18  ;;  %v4092_v33 = vrot.slane %v4064_v16, %v10139_v62  ;;  %v5144_v24 = vrot.slane %v5122_v51, %v10139_v62  ;;  %v1244_v35 = vsel %vm1218_vm8, %v9787_v4, %v12111_v54  ;;  %9627 = vmatmul.mubr.msk.f32.gmra.mxu0 %vm4468_vm15, %v3766_v10  ;;  %v1012_v44 = vpop.permute.xlu0 %1011  ;;  %v13905_v27 = vrot.slane %v13899_v22, 4  ;;  %v4632_v16 = vpop.f32.mrf.mxu0 }
 0x1c1   :  { %v6821_v20 = vcombine.low %v6667_v14, %v12163_v7  ;;  %v4085_v23 = vrot.slane %v4063_v57, %v10139_v62  ;;  %v5137_v8 = vrot.slane %v5121_v60, %v10139_v62  ;;  %v5151_v0 = vrot.slane %v5123_v31, %v10139_v62  ;;  %9629 = vmatprep.mubr.msk.f32.mxu0 %vm9806_vm7, %v13881_v41  ;;  %v1159_v40 = vpop.permute.xlu1 %1158 }
 0x1c2   :  { %v4093_v11 = vcombine.low %v4071_v1, %v4078_v9  ;;  %v5152_v53 = vcombine.high %v5130_v13, %v5130_v13  ;;  %v5154_v18 = vcombine.high %v5144_v24, %v5144_v24  ;;  %v3800_v54 = vcombine.low %v3791_v15, %v3798_v56 }
 0x1c3   :  { %v13904_v14 = vrot.slane %v13899_v22, 5  ;;  %v12204_v32 = vrot.slane %v7170_v45, %v10139_v62  ;;  %v5155_v21 = vcombine.high %v5151_v0, %v5151_v0  ;;  %v1271_v29 = vsel %vm1251_vm9, %v1238_v59, %v366_v48 }
 0x1c4   :  { %v1402_v60 = vsel %vm1383_vm13, %v1369_v17, %v1000_v50  ;;  %707 = vrot.lane.b32.xlu0 %v13905_v27, %s9800_s17  ;;  %v6609_v36 = vmax.f32 %v5152_v53, %v5154_v18  ;;  %v3807_v15 = vrot.slane %v12124_v63, %v10139_v62  ;;  %v3814_v56 = vrot.slane %v3800_v54, %v10139_v62  ;;  %v537_v10 = vpop.permute.xlu0 %536  ;;  %v9604_v50 = vpop.f32.mrf.mxu0 }
 0x1c5   :  { %866 = vrot.lane.b32.xlu1 %v13904_v14, %s9802_s19  ;;  %v4094_v51 = vcombine.low %v4085_v23, %v4092_v33  ;;  %v12215_v12 = vrot.slane %v6821_v20, %v10139_v62  ;;  %v5153_v48 = vcombine.high %v5137_v8, %v5137_v8  ;;  %v1375_v59 = vsel %vm1350_vm12, %v12143_v30, %v12138_v28  ;;  %v12230_v28 = vld [vmem:[%s13842_s1 + $0x28] ss:$0 sm:$0xff]  ;;  %s9808_s19 = smov 16  }
 0x1c6   :  { %v1435_v17 = vsel %vm1416_vm14, %v1402_v60, %v1159_v40  ;;  %v6549_v45 = vmax.f32 %v5130_v13, %v5144_v24  ;;  %v3815_v57 = vcombine.low %v3807_v15, %v3814_v56  ;;  %v4101_v9 = vrot.slane %v4093_v11, %v10139_v62  ;;  %v684_v24 = vpop.permute.xlu1 %683 }
 0x1c7   :  { %v4108_v63 = vrot.slane %v4094_v51, %v10139_v62  ;;  %v13906_v31 = vrot.slane %v13899_v22, 7  ;;  %v6610_v1 = vmax.f32 %v5153_v48, %v5155_v21  ;;  %v2328_v33 = vcombine.high %v1435_v17, %v1435_v17 }
 0x1c8   :  { %v2335_v4 = vrot.slane %v1435_v17, %v10139_v62  ;;  %v4633_v30 = vadd.f32 %v12230_v28, %v4632_v16  ;;  %v13907_v13 = vrot.slane %v13899_v22, 6  ;;  %v6550_v20 = vmax.f32 %v5137_v8, %v5151_v0  ;;  %9630 = vmatmul.mubr.msk.f32.gmra.mxu0 %vm4468_vm15, %v3815_v57  ;;  %v1171_v18 = vpop.permute.xlu0 %1170 }
 0x1c9   :  { %1184 = vrot.lane.b32.xlu1 %v13906_v31, %s9804_s23  ;;  %v12236_v23 = vmax.f32 %v6549_v45, %v6609_v36  ;;  %v1277_v11 = vsel %vm1251_vm9, %v1244_v35, %v12161_v42  ;;  %v4109_v53 = vcombine.low %v4101_v9, %v4108_v63  ;;  %v1408_v54 = vsel %vm1383_vm13, %v1375_v59, %v1012_v44 }
 0x1ca   :  { %1025 = vrot.lane.b32.xlu0 %v13907_v13, %s9803_s22  ;;  %v2342_v14 = vrot.slane %v2328_v33, %v10139_v62  ;;  %v2343_v21 = vcombine.high %v2335_v4, %v2335_v4  ;;  %v2351_v60 = vrot.slane %v2335_v4, %v10139_v62  ;;  %9632 = vmatprep.mubr.msk.f32.mxu0 %vm9806_vm7, %v13881_v41  ;;  %v4758_v42 = vmax.f32 %v4633_v30, 0.0  ;;  %v12255_v16 = vpop.permute.xlu1 %208  ;;  %s9809_s22 = smov 8  }
 0x1cb   :  { %v1304_v22 = vsel %vm1284_vm10, %v1271_v29, %v525_v19  ;;  %9648 = vmatmul.mubr.msk.f32.gmra.mxu1 %vm4468_vm15, %v4109_v53  ;;  %v2327_v8 = vcombine.high %v12065_v47, %v12065_v47  ;;  %v1441_v35 = vsel %vm1416_vm14, %v1408_v54, %v1171_v18  ;;  %v12251_v0 = vmax.f32 %v6550_v20, %v6610_v1  ;;  %v4637_v4 = vpop.f32.mrf.mxu0 }
 0x1cc   :  { %v2344_v44 = vcombine.high %v2342_v14, %v2342_v14  ;;  %v2358_v27 = vrot.slane %v2342_v14, %v10139_v62  ;;  %v2365_v40 = vrot.slane %v2343_v21, %v10139_v62  ;;  %9650 = vmatprep.mubr.msk.f32.mxu1 %vm9806_vm7, %v13881_v41  ;;  %v7171_v19 = vcombine.low %v12163_v7, %v12236_v23  ;;  %v12262_v15 = vpop.permute.xlu0 %695  ;;  %v9789_v7 = vld [vmem:[%s13841_s0 + $0xa0] sm:$0xff] }
 0x1cd   :  { %v2373_v29 = vcombine.high %v2351_v60, %v2351_v60  ;;  %v5156_v47 = vcombine.high %v4758_v42, %v4758_v42  ;;  %v5163_v36 = vrot.slane %v4758_v42, %v10139_v62  ;;  %v2622_v59 = vcombine.high %v1441_v35, %v1441_v35  ;;  %v9607_v14 = vpop.f32.mrf.mxu0 }
 0x1ce   :  { %v12265_v56 = vrot.slane %v2344_v44, %v10139_v62  ;;  %v2374_v51 = vcombine.high %v2358_v27, %v2358_v27  ;;  %v2375_v48 = vcombine.high %v2365_v40, %v2365_v40  ;;  %v12269_v57 = vsel %vm1284_vm10, %v1277_v11, %v537_v10  ;;  %v12278_v33 = vpop.permute.xlu1 %842 }
 0x1cf   :  { %v3817_v17 = vcombine.low %v2365_v40, %v2373_v29  ;;  %v5170_v50 = vrot.slane %v5156_v47, %v10139_v62  ;;  %v5171_v45 = vcombine.high %v5163_v36, %v5163_v36  ;;  %v6822_v9 = vcombine.low %v12236_v23, %v12251_v0 }
 0x1d0   :  { %v5179_v63 = vrot.slane %v5163_v36, %v10139_v62  ;;  %v12275_v31 = vsel %vm1317_vm11, %v1304_v22, %v684_v24  ;;  %v2629_v1 = vrot.slane %v1441_v35, %v10139_v62  ;;  %v2621_v10 = vcombine.high %v12155_v2, %v12155_v2  ;;  %v12284_v11 = vpop.permute.xlu0 %220 }
 0x1d1   :  { %v5172_v30 = vcombine.high %v5170_v50, %v5170_v50  ;;  %v5186_v13 = vrot.slane %v5170_v50, %v10139_v62  ;;  %v5193_v20 = vrot.slane %v5171_v45, %v10139_v62  ;;  %v3816_v53 = vcombine.low %v2327_v8, %v2351_v60 }
 0x1d2   :  { %v12286_v18 = vcombine.low %v2375_v48, %v2358_v27  ;;  %v12289_v24 = vcombine.low %v12265_v56, %v2374_v51  ;;  %v2636_v54 = vrot.slane %v2622_v59, %v10139_v62  ;;  %v3833_v21 = vrot.slane %v3817_v17, %v10139_v62  ;;  %v12295_v60 = vpop.permute.xlu1 %367 }
 0x1d3   :  { %v5200_v22 = vrot.slane %v5172_v30, %v10139_v62  ;;  %v5201_v42 = vcombine.high %v5179_v63, %v5179_v63  ;;  %v5203_v35 = vcombine.high %v5193_v20, %v5193_v20  ;;  %v5202_v44 = vcombine.high %v5186_v13, %v5186_v13 }
 0x1d4   :  { %v2637_v40 = vcombine.high %v2629_v1, %v2629_v1  ;;  %v2638_v2 = vcombine.high %v2636_v54, %v2636_v54  ;;  %v2645_v29 = vrot.slane %v2629_v1, %v10139_v62  ;;  %v6551_v27 = vmax.f32 %v5179_v63, %v5193_v20  ;;  %v12298_v51 = vpop.permute.xlu0 %854 }
 0x1d5   :  { %v5204_v8 = vcombine.high %v5200_v22, %v5200_v22  ;;  %v6611_v47 = vmax.f32 %v5201_v42, %v5203_v35  ;;  %v2652_v36 = vrot.slane %v2636_v54, %v10139_v62  ;;  %v6552_v48 = vmax.f32 %v5186_v13, %v5200_v22 }
 0x1d6   :  { %v2659_v59 = vrot.slane %v2637_v40, %v10139_v62  ;;  %v12302_v17 = vrot.slane %v2638_v2, %v10139_v62  ;;  %v2667_v50 = vcombine.high %v2645_v29, %v2645_v29  ;;  %v7488_v1 = vcombine.low %v12020_v26, %v12101_v46  ;;  %v1002_v42 = vpop.permute.xlu1 %1001 }
 0x1d7   :  { %v6612_v45 = vmax.f32 %v5202_v44, %v5204_v8  ;;  %v6671_v30 = vmax.f32 %v6551_v27, %v6611_v47  ;;  %v2668_v14 = vcombine.high %v2652_v36, %v2652_v36  ;;  %v4110_v63 = vcombine.low %v2621_v10, %v2645_v29 }
 0x1d8   :  { %v2669_v3 = vcombine.high %v2659_v59, %v2659_v59  ;;  %v4111_v20 = vcombine.low %v2659_v59, %v2667_v50  ;;  %v7154_v54 = vcombine.low %v12006_v34, %v12104_v58  ;;  %v3826_v13 = vrot.slane %v3816_v53, %v10139_v62  ;;  %v12313_v40 = vpop.permute.xlu0 %379 }
 0x1d9   :  { %v12309_v22 = vmax.f32 %v6552_v48, %v6612_v45  ;;  %v4113_v35 = vcombine.low %v12302_v17, %v2668_v14  ;;  %v7502_v44 = vrot.slane %v7488_v1, %v10139_v62  ;;  %v7172_v2 = vcombine.low %v12251_v0, %v6671_v30 }
 0x1da   :  { %v4112_v8 = vcombine.low %v2669_v3, %v2652_v36  ;;  %v4127_v10 = vrot.slane %v4111_v20, %v10139_v62  ;;  %v7168_v29 = vrot.slane %v7154_v54, %v10139_v62  ;;  %v3840_v34 = vrot.slane %v12286_v18, %v10139_v62  ;;  %v12327_v36 = vpop.permute.xlu1 %526 }
 0x1db   :  { %v3847_v53 = vrot.slane %v12289_v24, %v10139_v62  ;;  %v3848_v27 = vcombine.low %v3826_v13, %v3833_v21  ;;  %v7503_v47 = vcombine.low %v12083_v49, %v7502_v44  ;;  %v4120_v48 = vrot.slane %v4110_v63, %v10139_v62 }
 0x1dc   :  { %v4134_v59 = vrot.slane %v4112_v8, %v10139_v62  ;;  %v4141_v0 = vrot.slane %v4113_v35, %v10139_v62  ;;  %v7169_v3 = vcombine.low %v12089_v37, %v7168_v29  ;;  %v12330_v50 = vrot.slane %v6822_v9, %v10139_v62  ;;  %v12342_v37 = vpop.permute.xlu0 %1013 }
 0x1dd   :  { %v12336_v18 = vrot.slane %v7171_v19, %v10139_v62  ;;  %7635 = vrot.lane.b32.xlu1 %v7503_v47, %s9808_s19  ;;  %v7662_v49 = vcombine.low %v12104_v58, %v12204_v32  ;;  %v4638_v24 = vadd.f32 %v12230_v28, %v4637_v4  ;;  %v6823_v21 = vcombine.low %v6671_v30, %v12309_v22 }
 0x1de   :  { %v12346_v9 = vrot.slane %v7172_v2, %v10139_v62  ;;  %v4142_v45 = vcombine.low %v4120_v48, %v4127_v10  ;;  %7461 = vrot.lane.b32.xlu0 %v7169_v3, %s9809_s22  ;;  %v12354_v58 = vsel %vm1218_vm8, %v9789_v7, %v12255_v16  ;;  %v1370_v19 = vsel %vm1350_vm12, %v12275_v31, %v12278_v33  ;;  %v1161_v16 = vpop.permute.xlu1 %1160  ;;  %v4642_v33 = vpop.f32.mrf.mxu0 }
 0x1df   :  { %v7676_v23 = vrot.slane %v7662_v49, %v10139_v62  ;;  %v4759_v4 = vmax.f32 %v4638_v24, 0.0  ;;  %v3849_v30 = vcombine.low %v3840_v34, %v3847_v53  ;;  %v12363_v14 = vsel %vm1317_vm11, %v12269_v57, %v12262_v15 }
 0x1e0   :  { %v1403_v1 = vsel %vm1383_vm13, %v1370_v19, %v1002_v42  ;;  %v3856_v63 = vrot.slane %v3848_v27, %v10139_v62  ;;  %v4143_v20 = vcombine.low %v4134_v59, %v4141_v0  ;;  %v12370_v44 = vpop.permute.xlu0 %538  ;;  %v12373_v2 = vrot.slane %v6823_v21, %v10139_v62  ;;  %v9610_v34 = vpop.f32.mrf.mxu0 }
 0x1e1   :  { %v7677_v54 = vcombine.low %v12098_v38, %v7676_v23  ;;  %v5205_v13 = vcombine.high %v4759_v4, %v4759_v4  ;;  %v5212_v35 = vrot.slane %v4759_v4, %v10139_v62  ;;  %v3863_v31 = vrot.slane %v3849_v30, %v10139_v62 }
 0x1e2   :  { %v4150_v15 = vrot.slane %v4142_v45, %v10139_v62  ;;  %v4157_v57 = vrot.slane %v4143_v20, %v10139_v62  ;;  %v1436_v42 = vsel %vm1416_vm14, %v1403_v1, %v1161_v16  ;;  %v4643_v48 = vadd.f32 %v12230_v28, %v4642_v33  ;;  %v12383_v59 = vpop.permute.xlu1 %685 }
 0x1e3   :  { %7809 = vrot.lane.b32.xlu0 %v7677_v54, %s9810_s20  ;;  %v5219_v38 = vrot.slane %v5205_v13, %v10139_v62  ;;  %v5220_v8 = vcombine.high %v5212_v35, %v5212_v35  ;;  %v5228_v10 = vrot.slane %v5212_v35, %v10139_v62  ;;  %v3864_v29 = vcombine.low %v3856_v63, %v3863_v31  ;;  %v52_v13 = vld [vmem:[%s13842_s1 + $0x48] sm:$0xff]  ;;  %v51_v35 = vld [vmem:[%s13842_s1 + $0x40] sm:$0xff] }
 0x1e4   :  { %v4158_v53 = vcombine.low %v4150_v15, %v4157_v57  ;;  %v2377_v27 = vcombine.high %v1436_v42, %v1436_v42  ;;  %v2384_v47 = vrot.slane %v1436_v42, %v10139_v62  ;;  %v2376_v24 = vcombine.high %v12265_v56, %v12265_v56  ;;  %v12390_v21 = vpop.permute.xlu0 %1172  ;;  %9675 = vmatpush3.msra.mxu1 %v52_v13 }
 0x1e5   :  { %v5221_v0 = vcombine.high %v5219_v38, %v5219_v38  ;;  %v5235_v3 = vrot.slane %v5219_v38, %v10139_v62  ;;  %v5242_v49 = vrot.slane %v5220_v8, %v10139_v62  ;;  %9633 = vmatmul.mubr.msk.f32.gmra.mxu0 %vm4468_vm15, %v3864_v29  ;;  %v5250_v4 = vcombine.high %v5228_v10, %v5228_v10  ;;  %v9790_v8 = vld [vmem:[%s13841_s0 + $0xd0] sm:$0xff] }
 0x1e6   :  { %9651 = vmatmul.mubr.msk.f32.gmra.mxu1 %vm4468_vm15, %v4158_v53  ;;  %v2391_v45 = vrot.slane %v2377_v27, %v10139_v62  ;;  %v2392_v7 = vcombine.high %v2384_v47, %v2384_v47  ;;  %v2400_v23 = vrot.slane %v2384_v47, %v10139_v62  ;;  %9635 = vmatprep.mubr.msk.f32.mxu0 %vm9806_vm7, %v13881_v41  ;;  %v4760_v1 = vmax.f32 %v4643_v48, 0.0  ;;  %v12402_v54 = vpop.permute.xlu1 %222 }
 0x1e7   :  { %v5249_v19 = vrot.slane %v5221_v0, %v10139_v62  ;;  %v5252_v30 = vcombine.high %v5242_v49, %v5242_v49  ;;  %9653 = vmatprep.mubr.msk.f32.mxu1 %vm9806_vm7, %v13881_v41  ;;  %v5251_v31 = vcombine.high %v5235_v3, %v5235_v3  ;;  %v6553_v15 = vmax.f32 %v5228_v10, %v5242_v49  ;;  %v50_v10 = vld [vmem:[%s13842_s1 + $0x38] sm:$0xff] }
 0x1e8   :  { %v2393_v56 = vcombine.high %v2391_v45, %v2391_v45  ;;  %v2407_v63 = vrot.slane %v2391_v45, %v10139_v62  ;;  %v2414_v20 = vrot.slane %v2392_v7, %v10139_v62  ;;  %v2422_v16 = vcombine.high %v2400_v23, %v2400_v23  ;;  %v12410_v42 = vpop.permute.xlu0 %697  ;;  %9676 = vmatprep.subr.mxu1 %v13881_v41  ;;  %v49_v45 = vld [vmem:[%s13842_s1 + $0x30] sm:$0xff] }
 0x1e9   :  { %v5253_v33 = vcombine.high %v5249_v19, %v5249_v19  ;;  %v6613_v57 = vmax.f32 %v5250_v4, %v5252_v30  ;;  %v6554_v38 = vmax.f32 %v5235_v3, %v5249_v19  ;;  %v1245_v29 = vsel %vm1218_vm8, %v9790_v8, %v12284_v11  ;;  %9677 = vmatpush3.msra.mxu1 %v51_v35 }
 0x1ea   :  { %v1272_v34 = vsel %vm1251_vm9, %v12354_v58, %v12295_v60  ;;  %v12420_v53 = vcombine.low %v2376_v24, %v2400_v23  ;;  %v2424_v48 = vcombine.high %v2414_v20, %v2414_v20  ;;  %v5254_v0 = vcombine.high %v4760_v1, %v4760_v1  ;;  %v12432_v58 = vpop.permute.xlu1 %856  ;;  %v12434_v24 = vpop.f32.mrf.mxu0  ;;  %9678 = vmatprep.subr.mxu1 %v13881_v41 }
 0x1eb   :  { %v6614_v27 = vmax.f32 %v5251_v31, %v5253_v33  ;;  %v6673_v47 = vmax.f32 %v6553_v15, %v6613_v57  ;;  %v12427_v3 = vrot.slane %v2393_v56, %v10139_v62  ;;  %v2423_v11 = vcombine.high %v2407_v63, %v2407_v63  ;;  %9679 = vmatpush3.msra.mxu1 %v50_v10 }
 0x1ec   :  { %v12429_v49 = vcombine.low %v2414_v20, %v2422_v16  ;;  %v5261_v60 = vrot.slane %v4760_v1, %v10139_v62  ;;  %v1376_v23 = vsel %vm1350_vm12, %v12363_v14, %v12298_v51  ;;  %v1278_v19 = vsel %vm1251_vm9, %v1245_v29, %v12313_v40  ;;  %v12447_v30 = vpop.permute.xlu0 %844  ;;  %v9613_v16 = vpop.f32.mrf.mxu0  ;;  %9680 = vmatprep.subr.mxu1 %v13881_v41 }
 0x1ed   :  { %v7173_v7 = vcombine.low %v12309_v22, %v6673_v47  ;;  %v5268_v4 = vrot.slane %v5254_v0, %v10139_v62  ;;  %v12449_v1 = vmax.f32 %v6554_v38, %v6614_v27  ;;  %v1305_v56 = vsel %vm1284_vm10, %v1272_v34, %v12327_v36  ;;  %9681 = vmatpush3.msra.mxu1 %v49_v45 }
 0x1ee   :  { %v1409_v22 = vsel %vm1383_vm13, %v1376_v23, %v12342_v37  ;;  %v5269_v20 = vcombine.high %v5261_v60, %v5261_v60  ;;  %v12456_v51 = vcombine.low %v2424_v48, %v2407_v63  ;;  %v3875_v40 = vrot.slane %v12420_v53, %v10139_v62  ;;  %v12468_v33 = vpop.permute.xlu1 %1003  ;;  %9703 = vmatprep.subr.mxu1 %v13881_v41 }
 0x1ef   :  { %v5270_v14 = vcombine.high %v5268_v4, %v5268_v4  ;;  %v5277_v13 = vrot.slane %v5261_v60, %v10139_v62  ;;  %v12462_v35 = vcombine.low %v12427_v3, %v2423_v11  ;;  %v3882_v36 = vrot.slane %v12429_v49, %v10139_v62 }
 0x1f0   :  { %v5284_v37 = vrot.slane %v5268_v4, %v10139_v62  ;;  %v5291_v31 = vrot.slane %v5269_v20, %v10139_v62  ;;  %v12472_v63 = vrot.slane %v7173_v7, %v10139_v62  ;;  %v1311_v57 = vsel %vm1284_vm10, %v1278_v19, %v12370_v44  ;;  %v12479_v8 = vpop.permute.xlu0 %381 }
 0x1f1   :  { %v5298_v15 = vrot.slane %v5270_v14, %v10139_v62  ;;  %v1442_v38 = vsel %vm1416_vm14, %v1409_v22, %v12390_v21  ;;  %v6869_v29 = vcombine.low %v6673_v47, %v12449_v1  ;;  %v5299_v34 = vcombine.high %v5277_v13, %v5277_v13 }
 0x1f2   :  { %v5301_v53 = vcombine.high %v5291_v31, %v5291_v31  ;;  %v2671_v10 = vcombine.high %v1442_v38, %v1442_v38  ;;  %v3889_v27 = vrot.slane %v12456_v51, %v10139_v62  ;;  %v5300_v48 = vcombine.high %v5284_v37, %v5284_v37  ;;  %v12488_v45 = vpop.permute.xlu1 %540 }
 0x1f3   :  { %v5302_v0 = vcombine.high %v5298_v15, %v5298_v15  ;;  %v2678_v11 = vrot.slane %v1442_v38, %v10139_v62  ;;  %v6555_v49 = vmax.f32 %v5277_v13, %v5291_v31  ;;  %v7202_v21 = vcombine.low %v12204_v32, %v12336_v18 }
 0x1f4   :  { %v6615_v60 = vmax.f32 %v5299_v34, %v5301_v53  ;;  %v2685_v44 = vrot.slane %v2671_v10, %v10139_v62  ;;  %v7203_v19 = vcombine.low %v12346_v9, %v12472_v63  ;;  %v1016_v4 = vpop.permute.xlu0 %1015  ;;  %v12494_v22 = vrot.slane %v6869_v29, %v10139_v62 }
 0x1f5   :  { %v6616_v47 = vmax.f32 %v5300_v48, %v5302_v0  ;;  %v2686_v7 = vcombine.high %v2678_v11, %v2678_v11  ;;  %v2694_v23 = vrot.slane %v2678_v11, %v10139_v62  ;;  %v2670_v20 = vcombine.high %v12302_v17, %v12302_v17 }
 0x1f6   :  { %v2687_v16 = vcombine.high %v2685_v44, %v2685_v44  ;;  %v2701_v51 = vrot.slane %v2685_v44, %v10139_v62  ;;  %v6556_v32 = vmax.f32 %v5284_v37, %v5298_v15  ;;  %v12499_v14 = vmax.f32 %v6555_v49, %v6615_v60  ;;  %v1175_v10 = vpop.permute.xlu1 %1174 }
 0x1f7   :  { %v2708_v13 = vrot.slane %v2686_v7, %v10139_v62  ;;  %v2716_v31 = vcombine.high %v2694_v23, %v2694_v23  ;;  %v7210_v53 = vrot.slane %v7202_v21, %v10139_v62  ;;  %v7217_v29 = vrot.slane %v7203_v19, %v10139_v62 }
 0x1f8   :  { %v12503_v38 = vrot.slane %v2687_v16, %v10139_v62  ;;  %v2717_v34 = vcombine.high %v2701_v51, %v2701_v51  ;;  %v3896_v17 = vrot.slane %v12462_v35, %v10139_v62  ;;  %v12509_v48 = vmax.f32 %v6556_v32, %v6616_v47  ;;  %v12511_v0 = vpop.permute.xlu0 %1162  ;;  %v9791_v35 = vld [vmem:[%s13841_s0 + $0xd8] sm:$0xff] }
 0x1f9   :  { %v2718_v37 = vcombine.high %v2708_v13, %v2708_v13  ;;  %v4159_v15 = vcombine.low %v2670_v20, %v2694_v23  ;;  %v3897_v11 = vcombine.low %v3875_v40, %v3882_v36  ;;  %v12515_v49 = vsel %vm1317_vm11, %v1305_v56, %v12383_v59 }
 0x1fa   :  { %v4160_v60 = vcombine.low %v2708_v13, %v2716_v31  ;;  %v7218_v44 = vcombine.low %v7210_v53, %v7217_v29  ;;  %v4162_v7 = vcombine.low %v12503_v38, %v2717_v34  ;;  %v1246_v47 = vsel %vm1218_vm8, %v9791_v35, %v12402_v54  ;;  %v12534_v19 = vpop.permute.xlu1 %224 }
 0x1fb   :  { %v4161_v21 = vcombine.low %v2718_v37, %v2701_v51  ;;  %v4648_v23 = vadd.f32 %v12230_v28, %v12434_v24  ;;  %v7219_v40 = vcombine.low %v12449_v1, %v12499_v14  ;;  %v1344_v59 = vsel %vm1317_vm11, %v1311_v57, %v12410_v42  ;;  %v12541_v42 = vpop.f32.mrf.mxu0 }
 0x1fc   :  { %7463 = vrot.lane.b32.xlu1 %v7218_v44, %s9809_s22  ;;  %v7504_v56 = vcombine.low %v12215_v12, %v12330_v50  ;;  %v7505_v36 = vcombine.low %v12373_v2, %v12494_v22  ;;  %v6870_v54 = vcombine.low %v12499_v14, %v12509_v48  ;;  %v4169_v24 = vrot.slane %v4159_v15, %v10139_v62  ;;  %v12543_v57 = vpop.permute.xlu0 %699 }
 0x1fd   :  { %v1377_v1 = vsel %vm1350_vm12, %v1344_v59, %v12432_v58  ;;  %v4761_v20 = vmax.f32 %v4648_v23, 0.0  ;;  %v4176_v16 = vrot.slane %v4160_v60, %v10139_v62  ;;  %v3898_v13 = vcombine.low %v3889_v27, %v3896_v17  ;;  %v9616_v58 = vpop.f32.mrf.mxu0 }
 0x1fe   :  { %v7512_v51 = vrot.slane %v7504_v56, %v10139_v62  ;;  %v7519_v32 = vrot.slane %v7505_v36, %v10139_v62  ;;  %v4183_v31 = vrot.slane %v4161_v21, %v10139_v62  ;;  %v4190_v34 = vrot.slane %v4162_v7, %v10139_v62  ;;  %v12554_v35 = vpop.permute.xlu1 %383 }
 0x1ff   :  { %v5303_v53 = vcombine.high %v4761_v20, %v4761_v20  ;;  %v5310_v29 = vrot.slane %v4761_v20, %v10139_v62  ;;  %v3905_v15 = vrot.slane %v3897_v11, %v10139_v62  ;;  %v3912_v44 = vrot.slane %v3898_v13, %v10139_v62 }
 0x200   :  { %v7520_v37 = vcombine.low %v7512_v51, %v7519_v32  ;;  %v1410_v60 = vsel %vm1383_vm13, %v1377_v1, %v1016_v4  ;;  %v12559_v7 = vpop.permute.xlu0 %858  ;;  %v12562_v59 = vrot.slane %v7219_v40, %v10139_v62  ;;  %v4191_v36 = vcombine.low %v4169_v24, %v4176_v16 }
 0x201   :  { %v5317_v23 = vrot.slane %v5303_v53, %v10139_v62  ;;  %v5318_v27 = vcombine.high %v5310_v29, %v5310_v29  ;;  %v5326_v17 = vrot.slane %v5310_v29, %v10139_v62  ;;  %v1443_v21 = vsel %vm1416_vm14, %v1410_v60, %v1175_v10 }
 0x202   :  { %7637 = vrot.lane.b32.xlu0 %v7520_v37, %s9808_s19  ;;  %v3913_v11 = vcombine.low %v3905_v15, %v3912_v44  ;;  %v2720_v56 = vcombine.high %v1443_v21, %v1443_v21  ;;  %v2727_v4 = vrot.slane %v1443_v21, %v10139_v62  ;;  %v2719_v51 = vcombine.high %v12503_v38, %v12503_v38  ;;  %v12573_v53 = vpop.permute.xlu1 %542 }
 0x203   :  { %v5319_v1 = vcombine.high %v5317_v23, %v5317_v23  ;;  %v5340_v20 = vrot.slane %v5318_v27, %v10139_v62  ;;  %v5333_v10 = vrot.slane %v5317_v23, %v10139_v62  ;;  %v5348_v24 = vcombine.high %v5326_v17, %v5326_v17 }
 0x204   :  { %9636 = vmatmul.mubr.msk.f32.gmra.mxu0 %vm4468_vm15, %v3913_v11  ;;  %v2734_v40 = vrot.slane %v2720_v56, %v10139_v62  ;;  %v2735_v32 = vcombine.high %v2727_v4, %v2727_v4  ;;  %v2743_v13 = vrot.slane %v2727_v4, %v10139_v62  ;;  %v4192_v58 = vcombine.low %v4183_v31, %v4190_v34  ;;  %v12576_v37 = vpop.permute.xlu0 %1017 }
 0x205   :  { %v5347_v29 = vrot.slane %v5319_v1, %v10139_v62  ;;  %v5350_v16 = vcombine.high %v5340_v20, %v5340_v20  ;;  %9638 = vmatprep.mubr.msk.f32.mxu0 %vm9806_vm7, %v13881_v41  ;;  %v1371_v27 = vsel %vm1350_vm12, %v12515_v49, %v12447_v30  ;;  %v1279_v21 = vsel %vm1251_vm9, %v1246_v47, %v12479_v8 }
 0x206   :  { %v2736_v38 = vcombine.high %v2734_v40, %v2734_v40  ;;  %v2750_v15 = vrot.slane %v2734_v40, %v10139_v62  ;;  %v2757_v44 = vrot.slane %v2735_v32, %v10139_v62  ;;  %v2765_v60 = vcombine.high %v2743_v13, %v2743_v13  ;;  %v12588_v1 = vpop.permute.xlu1 %701  ;;  %v12590_v40 = vpop.f32.mrf.mxu0 }
 0x207   :  { %v5351_v23 = vcombine.high %v5347_v29, %v5347_v29  ;;  %v4199_v31 = vrot.slane %v4191_v36, %v10139_v62  ;;  %v5349_v34 = vcombine.high %v5333_v10, %v5333_v10  ;;  %v6617_v11 = vmax.f32 %v5348_v24, %v5350_v16 }
 0x208   :  { %v2767_v56 = vcombine.high %v2757_v44, %v2757_v44  ;;  %v4208_v4 = vcombine.low %v2719_v51, %v2743_v13  ;;  %v12593_v32 = vrot.slane %v2736_v38, %v10139_v62  ;;  %v2766_v52 = vcombine.high %v2750_v15, %v2750_v15  ;;  %v12596_v49 = vpop.permute.xlu0 %1176  ;;  %v9619_v13 = vpop.f32.mrf.mxu0 }
 0x209   :  { %v4209_v55 = vcombine.low %v2757_v44, %v2765_v60  ;;  %v4206_v30 = vrot.slane %v4192_v58, %v10139_v62  ;;  %v12602_v8 = vrot.slane %v6870_v54, %v10139_v62  ;;  %v6557_v47 = vmax.f32 %v5326_v17, %v5340_v20 }
 0x20a   :  { %v1404_v36 = vsel %vm1383_vm13, %v1371_v27, %v12468_v33  ;;  %v12608_v51 = vsel %vm1284_vm10, %v1279_v21, %v12488_v45  ;;  %v6558_v24 = vmax.f32 %v5333_v10, %v5347_v29  ;;  %v6618_v16 = vmax.f32 %v5349_v34, %v5351_v23  ;;  %v12617_v20 = vpop.permute.xlu1 %860 }
 0x20b   :  { %v4207_v58 = vcombine.low %v4199_v31, %v4206_v30  ;;  %v1437_v38 = vsel %vm1416_vm14, %v1404_v36, %v12511_v0  ;;  %v12612_v44 = vmax.f32 %v6557_v47, %v6617_v11  ;;  %v12614_v14 = vcombine.low %v2767_v56, %v2750_v15 }
 0x20c   :  { %v4218_v54 = vrot.slane %v4208_v4, %v10139_v62  ;;  %v2426_v17 = vcombine.high %v1437_v38, %v1437_v38  ;;  %v12620_v33 = vcombine.low %v12593_v32, %v2766_v52  ;;  %v4225_v45 = vrot.slane %v4209_v55, %v10139_v62  ;;  %v12627_v29 = vpop.permute.xlu0 %226 }
 0x20d   :  { %9654 = vmatmul.mubr.msk.f32.gmra.mxu1 %vm4468_vm15, %v4207_v58  ;;  %v2433_v10 = vrot.slane %v1437_v38, %v10139_v62  ;;  %v7678_v0 = vcombine.low %v12336_v18, %v12346_v9  ;;  %v2425_v15 = vcombine.high %v12427_v3, %v12427_v3  ;;  %v7679_v52 = vcombine.low %v12472_v63, %v12562_v59 }
 0x20e   :  { %v2440_v60 = vrot.slane %v2426_v17, %v10139_v62  ;;  %v4653_v55 = vadd.f32 %v12230_v28, %v12541_v42  ;;  %9656 = vmatprep.mubr.msk.f32.mxu1 %vm9806_vm7, %v13881_v41  ;;  %v12638_v23 = vmax.f32 %v6558_v24, %v6618_v16  ;;  %v7220_v63 = vcombine.low %v12509_v48, %v12612_v44  ;;  %v12647_v4 = vpop.permute.xlu1 %1019 }
 0x20f   :  { %v2441_v27 = vcombine.high %v2433_v10, %v2433_v10  ;;  %v2449_v18 = vrot.slane %v2433_v10, %v10139_v62  ;;  %v7686_v9 = vrot.slane %v7678_v0, %v10139_v62  ;;  %v7693_v31 = vrot.slane %v7679_v52, %v10139_v62 }
 0x210   :  { %v2442_v21 = vcombine.high %v2440_v60, %v2440_v60  ;;  %v2456_v3 = vrot.slane %v2440_v60, %v10139_v62  ;;  %v4762_v34 = vmax.f32 %v4653_v55, 0.0  ;;  %v12649_v30 = vpop.permute.xlu0 %385  ;;  %v4232_v16 = vrot.slane %v12614_v14, %v10139_v62 }
 0x211   :  { %v2463_v42 = vrot.slane %v2441_v27, %v10139_v62  ;;  %v2471_v11 = vcombine.high %v2449_v18, %v2449_v18  ;;  %v3914_v56 = vcombine.low %v2425_v15, %v2449_v18  ;;  %v7694_v13 = vcombine.low %v7686_v9, %v7693_v31 }
 0x212   :  { %v2470_v47 = vrot.slane %v2442_v21, %v10139_v62  ;;  %v2472_v36 = vcombine.high %v2456_v3, %v2456_v3  ;;  %v5352_v24 = vcombine.high %v4762_v34, %v4762_v34  ;;  %v5359_v48 = vrot.slane %v4762_v34, %v10139_v62  ;;  %v9792_v21 = vld [vmem:[%s13841_s0 + $0xe0] sm:$0xff] }
 0x213   :  { %v2473_v58 = vcombine.high %v2463_v42, %v2463_v42  ;;  %v3915_v38 = vcombine.low %v2463_v42, %v2471_v11  ;;  %v4239_v17 = vrot.slane %v12620_v33, %v10139_v62  ;;  %v12657_v10 = vcombine.low %v4218_v54, %v4225_v45  ;;  %7811 = vrot.lane.b32.xlu1 %v7694_v13, %s9810_s20 }
 0x214   :  { %v3917_v0 = vcombine.low %v2470_v47, %v2472_v36  ;;  %v5366_v15 = vrot.slane %v5352_v24, %v10139_v62  ;;  %v2474_v60 = vcombine.high %v2470_v47, %v2470_v47  ;;  %v5367_v27 = vcombine.high %v5359_v48, %v5359_v48  ;;  %v12662_v18 = vpop.permute.xlu0 %544  ;;  %v12675_v47 = vpop.permute.xlu1 %1178 }
 0x215   :  { %v3916_v52 = vcombine.low %v2473_v58, %v2456_v3  ;;  %v3931_v55 = vrot.slane %v3915_v38, %v10139_v62  ;;  %v3924_v9 = vrot.slane %v3914_v56, %v10139_v62  ;;  %v1247_v54 = vsel %vm1218_vm8, %v9792_v21, %v12534_v19  ;;  %v12686_v24 = vpop.f32.mrf.mxu0 }
 0x216   :  { %v5368_v45 = vcombine.high %v5366_v15, %v5366_v15  ;;  %v5375_v31 = vrot.slane %v5359_v48, %v10139_v62  ;;  %v3945_v3 = vrot.slane %v3917_v0, %v10139_v62  ;;  %v5382_v42 = vrot.slane %v5366_v15, %v10139_v62 }
 0x217   :  { %v3938_v34 = vrot.slane %v3916_v52, %v10139_v62  ;;  %v5389_v11 = vrot.slane %v5367_v27, %v10139_v62  ;;  %v12680_v36 = vrot.slane %v7220_v63, %v10139_v62  ;;  %v1345_v13 = vsel %vm1317_vm11, %v12608_v51, %v12543_v57 }
 0x218   :  { %v5396_v19 = vrot.slane %v5368_v45, %v10139_v62  ;;  %v3946_v58 = vcombine.low %v3924_v9, %v3931_v55  ;;  %v12689_v38 = vcombine.low %v2474_v60, %v11756_v6  ;;  %v1280_v48 = vsel %vm1251_vm9, %v1247_v54, %v12554_v35  ;;  %v12699_v51 = vpop.permute.xlu0 %703  ;;  %v9622_v55 = vpop.f32.mrf.mxu0 }
 0x219   :  { %v1378_v0 = vsel %vm1350_vm12, %v1345_v13, %v12559_v7  ;;  %v5397_v63 = vcombine.high %v5375_v31, %v5375_v31  ;;  %v5399_v15 = vcombine.high %v5389_v11, %v5389_v11  ;;  %v4658_v57 = vadd.f32 %v12230_v28, %v12590_v40 }
 0x21a   :  { %v1411_v52 = vsel %vm1383_vm13, %v1378_v0, %v12576_v37  ;;  %v5398_v27 = vcombine.high %v5382_v42, %v5382_v42  ;;  %v1313_v6 = vsel %vm1284_vm10, %v1280_v48, %v12573_v53  ;;  %v3947_v60 = vcombine.low %v3938_v34, %v3945_v3  ;;  %v12710_v0 = vpop.permute.xlu1 %862 }
 0x21b   :  { %v1444_v35 = vsel %vm1416_vm14, %v1411_v52, %v12596_v49  ;;  %v5400_v7 = vcombine.high %v5396_v19, %v5396_v19  ;;  %v4763_v9 = vmax.f32 %v4658_v57, 0.0  ;;  %v6559_v37 = vmax.f32 %v5375_v31, %v5389_v11 }
 0x21c   :  { %v2769_v21 = vcombine.high %v1444_v35, %v1444_v35  ;;  %v2776_v54 = vrot.slane %v1444_v35, %v10139_v62  ;;  %v1346_v40 = vsel %vm1317_vm11, %v1313_v6, %v12588_v1  ;;  %v3954_v45 = vrot.slane %v3946_v58, %v10139_v62  ;;  %v12717_v6 = vpop.permute.xlu0 %1021 }
 0x21d   :  { %v3961_v13 = vrot.slane %v3947_v60, %v10139_v62  ;;  %v6619_v53 = vmax.f32 %v5397_v63, %v5399_v15  ;;  %v5401_v48 = vcombine.high %v4763_v9, %v4763_v9  ;;  %v5408_v49 = vrot.slane %v4763_v9, %v10139_v62 }
 0x21e   :  { %v2783_v34 = vrot.slane %v2769_v21, %v10139_v62  ;;  %v6560_v3 = vmax.f32 %v5382_v42, %v5396_v19  ;;  %v2784_v52 = vcombine.high %v2776_v54, %v2776_v54  ;;  %v2792_v57 = vrot.slane %v2776_v54, %v10139_v62 }
 0x21f   :  { %v3962_v31 = vcombine.low %v3954_v45, %v3961_v13  ;;  %v6620_v11 = vmax.f32 %v5398_v27, %v5400_v7  ;;  %v5415_v1 = vrot.slane %v5401_v48, %v10139_v62  ;;  %v5416_v55 = vcombine.high %v5408_v49, %v5408_v49 }
 0x220   :  { %v5424_v58 = vrot.slane %v5408_v49, %v10139_v62  ;;  %v2768_v63 = vcombine.high %v12593_v32, %v12593_v32  ;;  %v2785_v15 = vcombine.high %v2783_v34, %v2783_v34  ;;  %v2799_v35 = vrot.slane %v2783_v34, %v10139_v62  ;;  %v12745_v56 = vpop.permute.xlu0 %228 }
 0x221   :  { %v2806_v42 = vrot.slane %v2784_v52, %v10139_v62  ;;  %9639 = vmatmul.mubr.msk.f32.gmra.mxu0 %vm4468_vm15, %v3962_v31  ;;  %v12724_v19 = vmax.f32 %v6559_v37, %v6619_v53  ;;  %v5417_v27 = vcombine.high %v5415_v1, %v5415_v1  ;;  %v5431_v60 = vrot.slane %v5415_v1, %v10139_v62  ;;  %v12739_v37 = vpop.permute.xlu1 %1180 }
 0x222   :  { %v5438_v7 = vrot.slane %v5416_v55, %v10139_v62  ;;  %9641 = vmatprep.mubr.msk.f32.mxu0 %vm9806_vm7, %v13881_v41  ;;  %v12731_v9 = vrot.slane %v2785_v15, %v10139_v62  ;;  %v2814_v32 = vcombine.high %v2792_v57, %v2792_v57  ;;  %v2815_v21 = vcombine.high %v2799_v35, %v2799_v35 }
 0x223   :  { %v4241_v54 = vcombine.low %v4232_v16, %v4239_v17  ;;  %v12741_v45 = vmax.f32 %v6560_v3, %v6620_v11  ;;  %v5445_v13 = vrot.slane %v5417_v27, %v10139_v62  ;;  %v5446_v53 = vcombine.high %v5424_v58, %v5424_v58 }
 0x224   :  { %v5448_v48 = vcombine.high %v5438_v7, %v5438_v7  ;;  %v2816_v49 = vcombine.high %v2806_v42, %v2806_v42  ;;  %v4257_v34 = vcombine.low %v2768_v63, %v2792_v57  ;;  %v4258_v52 = vcombine.low %v2806_v42, %v2814_v32 }
 0x225   :  { %v4260_v31 = vcombine.low %v12731_v9, %v2815_v21  ;;  %v5447_v1 = vcombine.high %v5431_v60, %v5431_v60  ;;  %v5449_v55 = vcombine.high %v5445_v13, %v5445_v13  ;;  %v6561_v33 = vmax.f32 %v5424_v58, %v5438_v7  ;;  %v12762_v32 = vpop.permute.xlu1 %387 }
 0x226   :  { %v6621_v15 = vmax.f32 %v5446_v53, %v5448_v48  ;;  %v7221_v14 = vcombine.low %v12638_v23, %v12724_v19  ;;  %v4259_v16 = vcombine.low %v2816_v49, %v2799_v35  ;;  %v4274_v17 = vrot.slane %v4258_v52, %v10139_v62  ;;  %v9793_v53 = vld [vmem:[%s13841_s0 + $0xe8] sm:$0xff] }
 0x227   :  { %v1379_v3 = vsel %vm1350_vm12, %v1346_v40, %v12617_v20  ;;  %v6622_v11 = vmax.f32 %v5447_v1, %v5449_v55  ;;  %v4248_v63 = vrot.slane %v12657_v10, %v10139_v62  ;;  %v4255_v58 = vrot.slane %v4241_v54, %v10139_v62 }
 0x228   :  { %v12752_v57 = vmax.f32 %v6561_v33, %v6621_v15  ;;  %v4267_v42 = vrot.slane %v4257_v34, %v10139_v62  ;;  %v4281_v27 = vrot.slane %v4259_v16, %v10139_v62  ;;  %v4288_v7 = vrot.slane %v4260_v31, %v10139_v62  ;;  %v12784_v31 = vpop.permute.xlu0 %546 }
 0x229   :  { %v3973_v35 = vrot.slane %v12689_v38, %v10139_v62  ;;  %v6872_v20 = vcombine.low %v12724_v19, %v12741_v45  ;;  %v6562_v40 = vmax.f32 %v5431_v60, %v5445_v13  ;;  %v4256_v21 = vcombine.low %v4248_v63, %v4255_v58 }
 0x22a   :  { %v1412_v10 = vsel %vm1383_vm13, %v1379_v3, %v12647_v4  ;;  %v4289_v54 = vcombine.low %v4267_v42, %v4274_v17  ;;  %v1248_v48 = vsel %vm1218_vm8, %v9793_v53, %v12627_v29  ;;  %v13908_v38 = vrot.slane %v11826_v61, %v10139_v62 }
 0x22b   :  { %v1445_v34 = vsel %vm1416_vm14, %v1412_v10, %v12675_v47  ;;  %v12778_v60 = vmax.f32 %v6562_v40, %v6622_v11  ;;  %v7222_v4 = vcombine.low %v12741_v45, %v12752_v57  ;;  %9657 = vmatmul.mubr.msk.f32.gmra.mxu1 %vm4468_vm15, %v4256_v21  ;;  %v1281_v61 = vsel %vm1251_vm9, %v1248_v48, %v12649_v30 }
 0x22c   :  { %v3995_v49 = vcombine.low %v3973_v35, %v13908_v38  ;;  %v2818_v13 = vcombine.high %v1445_v34, %v1445_v34  ;;  %v2825_v52 = vrot.slane %v1445_v34, %v10139_v62  ;;  %v4663_v47 = vadd.f32 %v12230_v28, %v12686_v24  ;;  %9659 = vmatprep.mubr.msk.f32.mxu1 %vm9806_vm7, %v13881_v41  ;;  %v12802_v24 = vpop.permute.xlu1 %705 }
 0x22d   :  { %v4290_v1 = vcombine.low %v4281_v27, %v4288_v7  ;;  %v2817_v45 = vcombine.high %v12731_v9, %v12731_v9  ;;  %v13909_v16 = vrot.slane %v11798_v43, %v10139_v62  ;;  %v4297_v3 = vrot.slane %v4289_v54, %v10139_v62  ;;  %v12813_v54 = vpop.permute.xlu0 %864 }
 0x22e   :  { %v4003_v29 = vrot.slane %v3995_v49, %v10139_v62  ;;  %v2832_v55 = vrot.slane %v2818_v13, %v10139_v62  ;;  %v2833_v33 = vcombine.high %v2825_v52, %v2825_v52  ;;  %v2841_v15 = vrot.slane %v2825_v52, %v10139_v62 }
 0x22f   :  { %v4764_v30 = vmax.f32 %v4663_v47, 0.0  ;;  %v4304_v28 = vrot.slane %v4290_v1, %v10139_v62  ;;  %v6918_v42 = vcombine.low %v12752_v57, %v12778_v60  ;;  %v1314_v48 = vsel %vm1284_vm10, %v1281_v61, %v12662_v18 }
 0x230   :  { %v4011_v17 = vcombine.low %v4003_v29, %v13909_v16  ;;  %v2834_v11 = vcombine.high %v2832_v55, %v2832_v55  ;;  %v2848_v63 = vrot.slane %v2832_v55, %v10139_v62  ;;  %v2855_v9 = vrot.slane %v2833_v33, %v10139_v62  ;;  %v12835_v29 = vpop.f32.mrf.mxu0 }
 0x231   :  { %v2863_v58 = vcombine.high %v2841_v15, %v2841_v15  ;;  %v5450_v43 = vcombine.high %v4764_v30, %v4764_v30  ;;  %v5457_v27 = vrot.slane %v4764_v30, %v10139_v62  ;;  %v4305_v7 = vcombine.low %v4297_v3, %v4304_v28  ;;  %v1183_v28 = vpop.permute.xlu0 %1182 }
 0x232   :  { %9642 = vmatmul.mubr.msk.f32.gmra.mxu0 %vm4468_vm15, %v4011_v17  ;;  %v12811_v35 = vrot.slane %v2834_v11, %v10139_v62  ;;  %v2864_v40 = vcombine.high %v2848_v63, %v2848_v63  ;;  %v2865_v21 = vcombine.high %v2855_v9, %v2855_v9  ;;  %v4306_v10 = vcombine.low %v2817_v45, %v2841_v15  ;;  %v9625_v33 = vpop.f32.mrf.mxu0 }
 0x233   :  { %v4307_v53 = vcombine.low %v2855_v9, %v2863_v58  ;;  %v5465_v38 = vcombine.high %v5457_v27, %v5457_v27  ;;  %v5473_v57 = vrot.slane %v5457_v27, %v10139_v62  ;;  %9660 = vmatmul.mubr.msk.f32.gmra.mxu1 %vm4468_vm15, %v4305_v7  ;;  %v13910_v49 = vcombine.low %v12612_v44, %v12638_v23 }
 0x234   :  { %v12826_v13 = vrot.slane %v7222_v4, %v10139_v62  ;;  %v12829_v52 = vrot.slane %v5450_v43, %v10139_v62  ;;  %v1347_v18 = vsel %vm1317_vm11, %v1314_v48, %v12699_v51  ;;  %9662 = vmatprep.mubr.msk.f32.mxu1 %vm9806_vm7, %v13881_v41  ;;  %v12838_v61 = vrot.slane %v6872_v20, %v10139_v62  ;;  %v12850_v51 = vpop.permute.xlu1 %1023 }
 0x235   :  { %v12823_v34 = vrot.slane %v13910_v49, %v10139_v62  ;;  %v12844_v44 = vrot.slane %v7221_v14, %v10139_v62  ;;  %v12847_v4 = vrot.slane %v6918_v42, %v10139_v62  ;;  %v5487_v47 = vrot.slane %v5465_v38, %v10139_v62 }
 0x236   :  { %v2866_v1 = vcombine.high %v12811_v35, %v12811_v35  ;;  %v4308_v45 = vcombine.low %v2865_v21, %v2848_v63  ;;  %v4309_v20 = vcombine.low %v12811_v35, %v2864_v40  ;;  %v4316_v55 = vrot.slane %v4306_v10, %v10139_v62 }
 0x237   :  { %v4323_v23 = vrot.slane %v4307_v53, %v10139_v62  ;;  %v5495_v19 = vcombine.high %v5473_v57, %v5473_v57  ;;  %v5497_v14 = vcombine.high %v5487_v47, %v5487_v47  ;;  %v1380_v15 = vsel %vm1350_vm12, %v1347_v18, %v12710_v0  ;;  %v9794_v0 = vld [vmem:[%s13841_s0 + $0xf0] sm:$0xff] }
 0x238   :  { %v5466_v16 = vcombine.high %v12829_v52, %v12829_v52  ;;  %v1413_v17 = vsel %vm1383_vm13, %v1380_v15, %v12717_v6  ;;  %v7251_v30 = vcombine.low %v12562_v59, %v12680_v36  ;;  %v7252_v3 = vcombine.low %v12844_v44, %v12826_v13  ;;  %v231_v40 = vpop.permute.xlu1 %230 }
 0x239   :  { %v6563_v11 = vmax.f32 %v5473_v57, %v5487_v47  ;;  %v6623_v63 = vmax.f32 %v5495_v19, %v5497_v14  ;;  %v1446_v9 = vsel %vm1416_vm14, %v1413_v17, %v12739_v37  ;;  %v1249_v58 = vsel %vm1218_vm8, %v9794_v0, %v12745_v56 }
 0x23a   :  { %v2867_v6 = vcombine.high %v1446_v9, %v1446_v9  ;;  %v2874_v42 = vrot.slane %v1446_v9, %v10139_v62  ;;  %v7259_v59 = vrot.slane %v7251_v30, %v10139_v62  ;;  %v7266_v43 = vrot.slane %v7252_v3, %v10139_v62 }
 0x23b   :  { %v4330_v27 = vrot.slane %v4308_v45, %v10139_v62  ;;  %v4337_v7 = vrot.slane %v4309_v20, %v10139_v62  ;;  %v12879_v35 = vmax.f32 %v6563_v11, %v6623_v63  ;;  %v7521_v37 = vcombine.low %v12602_v8, %v12823_v34 }
 0x23c   :  { %v2881_v21 = vrot.slane %v2867_v6, %v10139_v62  ;;  %v2882_v56 = vcombine.high %v2874_v42, %v2874_v42  ;;  %v2890_v10 = vrot.slane %v2874_v42, %v10139_v62  ;;  %v7267_v53 = vcombine.low %v7259_v59, %v7266_v43  ;;  %v9795_v43 = vld [vmem:[%s13841_s0 + $0xf8] sm:$0xff] }
 0x23d   :  { %v4338_v48 = vcombine.low %v4316_v55, %v4323_v23  ;;  %v7268_v38 = vcombine.low %v12778_v60, %v12879_v35  ;;  %v1282_v57 = vsel %vm1251_vm9, %v1249_v58, %v12762_v32  ;;  %v7522_v49 = vcombine.low %v12838_v61, %v12847_v4  ;;  %v390_v55 = vpop.permute.xlu0 %389 }
 0x23e   :  { %v2897_v18 = vrot.slane %v2881_v21, %v10139_v62  ;;  %v2904_v47 = vrot.slane %v2882_v56, %v10139_v62  ;;  %v2912_v45 = vcombine.high %v2890_v10, %v2890_v10  ;;  %7465 = vrot.lane.b32.xlu0 %v7267_v53, %s9809_s22  ;;  %v1315_v20 = vsel %vm1284_vm10, %v1282_v57, %v12784_v31  ;;  %v12902_v31 = vpop.permute.xlu1 %548  ;;  %v12935_v53 = vld [vmem:[%s13842_s1 + $0x28] ss:$0 sm:$0xff] }
 0x23f   :  { %v2883_v33 = vcombine.high %v2881_v21, %v2881_v21  ;;  %v7529_v60 = vrot.slane %v7521_v37, %v10139_v62  ;;  %v7536_v23 = vrot.slane %v7522_v49, %v10139_v62  ;;  %v4339_v32 = vcombine.low %v4330_v27, %v4337_v7 }
 0x240   :  { %v2913_v19 = vcombine.high %v2897_v18, %v2897_v18  ;;  %v2914_v14 = vcombine.high %v2904_v47, %v2904_v47  ;;  %v4355_v15 = vcombine.low %v2866_v1, %v2890_v10  ;;  %v4356_v17 = vcombine.low %v2904_v47, %v2912_v45 }
 0x241   :  { %v7537_v30 = vcombine.low %v7529_v60, %v7536_v23  ;;  %v4346_v3 = vrot.slane %v4338_v48, %v10139_v62  ;;  %v4353_v11 = vrot.slane %v4339_v32, %v10139_v62  ;;  %v1348_v63 = vsel %vm1317_vm11, %v1315_v20, %v12802_v24  ;;  %v708_v7 = vpop.permute.xlu0 %707 }
 0x242   :  { %v4357_v9 = vcombine.low %v2914_v14, %v2897_v18  ;;  %v4372_v0 = vrot.slane %v4356_v17, %v10139_v62  ;;  %v1381_v58 = vsel %vm1350_vm12, %v1348_v63, %v12813_v54  ;;  %v12908_v6 = vrot.slane %v5466_v16, %v10139_v62  ;;  %v867_v47 = vpop.permute.xlu1 %866 }
 0x243   :  { %7639 = vrot.lane.b32.xlu1 %v7537_v30, %s9808_s19  ;;  %v4354_v1 = vcombine.low %v4346_v3, %v4353_v11  ;;  %v1414_v42 = vsel %vm1383_vm13, %v1381_v58, %v12850_v51  ;;  %v2911_v59 = vrot.slane %v2883_v33, %v10139_v62  ;;  %v4365_v24 = vrot.slane %v4355_v15, %v10139_v62 }
 0x244   :  { %v1250_v27 = vsel %vm1218_vm8, %v9795_v43, %v231_v40  ;;  %v1447_v54 = vsel %vm1416_vm14, %v1414_v42, %v1183_v28  ;;  %v12921_v16 = vrot.slane %v7268_v38, %v10139_v62  ;;  %v4379_v37 = vrot.slane %v4357_v9, %v10139_v62 }
 0x245   :  { %9663 = vmatmul.mubr.msk.f32.gmra.mxu1 %vm4468_vm15, %v4354_v1  ;;  %v4358_v51 = vcombine.low %v2911_v59, %v2913_v19  ;;  %v2916_v21 = vcombine.high %v1447_v54, %v1447_v54  ;;  %v2923_v56 = vrot.slane %v1447_v54, %v10139_v62  ;;  %v4387_v10 = vcombine.low %v4365_v24, %v4372_v0  ;;  %v1026_v15 = vpop.permute.xlu0 %1025 }
 0x246   :  { %9665 = vmatprep.mubr.msk.f32.mxu1 %vm9806_vm7, %v13881_v41  ;;  %v7695_v40 = vcombine.low %v12680_v36, %v12844_v44  ;;  %v7696_v28 = vcombine.low %v12826_v13, %v12921_v16  ;;  %v4668_v48 = vadd.f32 %v12935_v53, %v12835_v29  ;;  %v2915_v36 = vcombine.high %v2911_v59, %v2911_v59  ;;  %v1185_v24 = vpop.permute.xlu1 %1184 }
 0x247   :  { %v2930_v38 = vrot.slane %v2916_v21, %v10139_v62  ;;  %v2931_v57 = vcombine.high %v2923_v56, %v2923_v56  ;;  %v2939_v49 = vrot.slane %v2923_v56, %v10139_v62  ;;  %v4386_v18 = vrot.slane %v4358_v51, %v10139_v62 }
 0x248   :  { %v7703_v44 = vrot.slane %v7695_v40, %v10139_v62  ;;  %v7710_v13 = vrot.slane %v7696_v28, %v10139_v62  ;;  %v12944_v45 = vmax.f32 %v4668_v48, 0.0  ;;  %v5480_v23 = vrot.slane %v12829_v52, %v10139_v62 }
 0x249   :  { %v2932_v20 = vcombine.high %v2930_v38, %v2930_v38  ;;  %v2946_v33 = vrot.slane %v2930_v38, %v10139_v62  ;;  %v2953_v29 = vrot.slane %v2931_v57, %v10139_v62  ;;  %v2961_v60 = vcombine.high %v2939_v49, %v2939_v49 }
 0x24a   :  { %v4404_v32 = vcombine.low %v2915_v36, %v2939_v49  ;;  %v4388_v19 = vcombine.low %v4379_v37, %v4386_v18  ;;  %v7711_v14 = vcombine.low %v7703_v44, %v7710_v13  ;;  %v1283_v63 = vsel %vm1251_vm9, %v1250_v27, %v390_v55 }
 0x24b   :  { %v2960_v17 = vrot.slane %v2932_v20, %v10139_v62  ;;  %v2962_v30 = vcombine.high %v2946_v33, %v2946_v33  ;;  %v2963_v3 = vcombine.high %v2953_v29, %v2953_v29  ;;  %v4405_v11 = vcombine.low %v2953_v29, %v2961_v60 }
 0x24c   :  { %v4395_v9 = vrot.slane %v4387_v10, %v10139_v62  ;;  %v4402_v0 = vrot.slane %v4388_v19, %v10139_v62  ;;  %7813 = vrot.lane.b32.xlu0 %v7711_v14, %s9810_s20  ;;  %v5506_v52 = vrot.slane %v12944_v45, %v10139_v62  ;;  %v5498_v58 = vcombine.high %v12908_v6, %v12908_v6 }
 0x24d   :  { %v4406_v1 = vcombine.low %v2963_v3, %v2946_v33  ;;  %v4407_v42 = vcombine.low %v2960_v17, %v2962_v30  ;;  %v4421_v59 = vrot.slane %v4405_v11, %v10139_v62  ;;  %v4414_v43 = vrot.slane %v4404_v32, %v10139_v62 }
 0x24e   :  { %v4403_v55 = vcombine.low %v4395_v9, %v4402_v0  ;;  %v5514_v27 = vcombine.high %v5506_v52, %v5506_v52  ;;  %v5522_v54 = vrot.slane %v5506_v52, %v10139_v62  ;;  %v5496_v37 = vcombine.high %v5480_v23, %v5480_v23 }
 0x24f   :  { %v4428_v51 = vrot.slane %v4406_v1, %v10139_v62  ;;  %v4435_v21 = vrot.slane %v4407_v42, %v10139_v62  ;;  %v1316_v56 = vsel %vm1284_vm10, %v1283_v63, %v12902_v31  ;;  %v4436_v10 = vcombine.low %v4414_v43, %v4421_v59  ;;  %v7636_v33 = vpop.permute.xlu1 %7635 }
 0x250   :  { %9666 = vmatmul.mubr.msk.f32.gmra.mxu1 %vm4468_vm15, %v4403_v55  ;;  %v5536_v40 = vrot.slane %v5514_v27, %v10139_v62  ;;  %v1349_v28 = vsel %vm1317_vm11, %v1316_v56, %v708_v7  ;;  %v7462_v48 = vpop.permute.xlu0 %7461  ;;  %v6564_v38 = vmax.f32 %v5480_v23, %v12908_v6  ;;  %v6624_v57 = vmax.f32 %v5496_v37, %v5498_v58 }
 0x251   :  { %v13911_v49 = vcombine.low %v11818_v5, %v11801_v25  ;;  %v13912_v31 = vcombine.low %v11928_v39, %v12020_v26  ;;  %9668 = vmatprep.mubr.msk.f32.mxu1 %vm9806_vm7, %v13881_v41  ;;  %v5544_v44 = vcombine.high %v5522_v54, %v5522_v54  ;;  %v1382_v7 = vsel %vm1350_vm12, %v1349_v28, %v867_v47 }
 0x252   :  { %v5546_v13 = vcombine.high %v5536_v40, %v5536_v40  ;;  %v6565_v6 = vmax.f32 %v5522_v54, %v5536_v40  ;;  %v1415_v20 = vsel %vm1383_vm13, %v1382_v7, %v1026_v15  ;;  %v4437_v25 = vcombine.low %v4428_v51, %v4435_v21 }
 0x253   :  { %v6811_v18 = vrot.slane %v13911_v49, %v10139_v62  ;;  %v6818_v36 = vrot.slane %v13912_v31, %v10139_v62  ;;  %v1448_v60 = vsel %vm1416_vm14, %v1415_v20, %v1185_v24  ;;  %v4444_v39 = vrot.slane %v4436_v10, %v10139_v62 }
 0x254   :  { %v6625_v5 = vmax.f32 %v5544_v44, %v5546_v13  ;;  %v2971_v26 = vrot.slane %v1448_v60, %v10139_v62  ;;  %v4451_v32 = vrot.slane %v4437_v25, %v10139_v62  ;;  %vm7851_vm2 = vcmask 195584  }
 0x255   :  { %v6819_v29 = vcombine.low %v6811_v18, %v6818_v36  ;;  %v7810_v47 = vpop.permute.xlu0 %7809  ;;  %v12987_v19 = vmax.f32 %v6564_v38, %v6624_v57  ;;  %v5499_v14 = vcombine.high %v12944_v45, %v12944_v45  ;;  %v2964_v3 = vcombine.high %v2960_v17, %v2960_v17 }
 0x256   :  { %v12991_v15 = vmax.f32 %v6565_v6, %v6625_v5  ;;  %v2978_v11 = vrot.slane %v2971_v26, %v10139_v62  ;;  %v4452_v63 = vcombine.low %v4444_v39, %v4451_v32  ;;  %v6901_v45 = vcombine.low %v12494_v22, %v12602_v8 }
 0x257   :  { %v7834_v23 = vsel %vm7833_vm0, %v6819_v29, %v7462_v48  ;;  %v6902_v59 = vcombine.low %v12823_v34, %v12838_v61  ;;  %v5513_v24 = vrot.slane %v5499_v14, %v10139_v62  ;;  %v7282_v27 = vrot.slane %v12987_v19, %v10139_v62 }
 0x258   :  { %v7843_v30 = vsel %vm7842_vm1, %v7834_v23, %v7636_v33  ;;  %v7712_v0 = vcombine.low %v12987_v19, %v12991_v15  ;;  %v4453_v1 = vcombine.low %v2964_v3, %v2978_v11  ;;  %9669 = vmatmul.mubr.msk.f32.gmra.mxu1 %vm4468_vm15, %v4452_v63  ;;  %v13014_v8 = vrot.slane %v6901_v45, %v10139_v62 }
 0x259   :  { %v7852_v9 = vsel %vm7851_vm2, %v7843_v30, %v7810_v47  ;;  %9671 = vmatprep.mubr.msk.f32.mxu1 %vm9806_vm7, %v13881_v41  ;;  %v13017_v37 = vrot.slane %v6902_v59, %v10139_v62  ;;  %v13022_v51 = vcombine.low %v12921_v16, %v7282_v27  ;;  %v7538_v21 = vcombine.low %v12879_v35, %v12987_v19 }
 0x25a   :  { %v7868_v52 = vcombine.high %v7852_v9, %v7852_v9  ;;  %v7875_v58 = vrot.slane %v7852_v9, %v10139_v62  ;;  %v4460_v55 = vrot.slane %v4453_v1, %v10139_v62  ;;  %v5515_v48 = vcombine.high %v5513_v24, %v5513_v24 }
 0x25b   :  { %v6917_v28 = vcombine.low %v13014_v8, %v13017_v37  ;;  %v6932_v38 = vrot.slane %v12879_v35, %v10139_v62  ;;  %v5529_v33 = vrot.slane %v5513_v24, %v10139_v62  ;;  %vm8546_vm3 = vcmask 261120  }
 0x25c   :  { %v7882_v42 = vrot.slane %v7868_v52, %v10139_v62  ;;  %v7883_v17 = vcombine.high %v7875_v58, %v7875_v58  ;;  %v7891_v43 = vrot.slane %v7875_v58, %v10139_v62  ;;  %v4467_v61 = vrot.slane %v4460_v55, %v10139_v62 }
 0x25d   :  { %v13037_v36 = vcombine.low %v12847_v4, %v6932_v38  ;;  %v5543_v35 = vrot.slane %v5515_v48, %v10139_v62  ;;  %v5545_v4 = vcombine.high %v5529_v33, %v5529_v33  ;;  %v7552_v32 = vrot.slane %v12991_v15, %v10139_v62 }
 0x25e   :  { %v7884_v54 = vcombine.high %v7882_v42, %v7882_v42  ;;  %v7905_v22 = vrot.slane %v7883_v17, %v10139_v62  ;;  %v7898_v34 = vrot.slane %v7882_v42, %v10139_v62  ;;  %9672 = vmatmul.mubr.msk.f32.gmra.mxu1 %vm4468_vm15, %v4467_v61  ;;  %v7545_v47 = vrot.slane %v7538_v21, %v10139_v62 }
 0x25f   :  { %9682 = vmatprep.mubr.msk.f32.mxu1 %vm9806_vm7, %v13881_v41  ;;  %v4702_v31 = vpop.f32.mrf.mxu1  ;;  %v5547_v5 = vcombine.high %v5543_v35, %v5543_v35  ;;  %v6566_v26 = vmax.f32 %v5529_v33, %v5543_v35  ;;  %v7719_v14 = vrot.slane %v7712_v0, %v10139_v62  ;;  %v6853_v63 = vcombine.low %v12330_v50, %v12373_v2 }
 0x260   :  { %v7912_v56 = vrot.slane %v7884_v54, %v10139_v62  ;;  %v8212_v10 = vcombine.low %v7891_v43, %v7905_v22  ;;  %v9486_v40 = vcombine.high %v7891_v43, %v7905_v22  ;;  %v13051_v19 = vcombine.low %v7545_v47, %v7552_v32 }
 0x261   :  { %v9646_v6 = vpop.f32.mrf.mxu1  ;;  %v6626_v39 = vmax.f32 %v5545_v4, %v5547_v5  ;;  %v4703_v11 = vadd.f32 %v12935_v53, %v4702_v31  ;;  %v6852_v9 = vcombine.low %v12101_v46, %v12215_v12  ;;  %v6867_v15 = vrot.slane %v6853_v63, %v10139_v62 }
 0x262   :  { %v8214_v57 = vcombine.low %v7898_v34, %v7912_v56  ;;  %v9487_v49 = vcombine.high %v7898_v34, %v7912_v56  ;;  %v8222_v16 = vrot.slane %v8212_v10, %v10139_v62  ;;  %v8229_v18 = vrot.slane %v9486_v40, %v10139_v62 }
 0x263   :  { %v6686_v23 = vmax.f32 %v6566_v26, %v6626_v39  ;;  %v4772_v52 = vmax.f32 %v4703_v11, 0.0  ;;  %v6860_v58 = vrot.slane %v6852_v9, %v10139_v62  ;;  %vm9178_vm4 = vcmask 392192  }
 0x264   :  { %v8236_v44 = vrot.slane %v8214_v57, %v10139_v62  ;;  %v8243_v13 = vrot.slane %v9487_v49, %v10139_v62  ;;  %v8244_v7 = vcombine.low %v8222_v16, %v8229_v18  ;;  %vm9180_vm5 = vcmask 523264  }
 0x265   :  { %v7726_v30 = vrot.slane %v6686_v23, %v10139_v62  ;;  %v5842_v45 = vcombine.high %v4772_v52, %v4772_v52  ;;  %v6868_v0 = vcombine.low %v6860_v58, %v6867_v15  ;;  %v5849_v17 = vrot.slane %v4772_v52, %v10139_v62 }
 0x266   :  { %v8245_v20 = vcombine.low %v8236_v44, %v8243_v13  ;;  %v8252_v29 = vrot.slane %v8244_v7, %v10139_v62  ;;  %vm9186_vm6 = vcmask 654336  }
 0x267   :  { %v13055_v3 = vcombine.low %v7719_v14, %v7726_v30  ;;  %v13068_v46 = vrot.slane %v5842_v45, %v10139_v62  ;;  %v5857_v12 = vcombine.high %v5849_v17, %v5849_v17  ;;  %v13078_v48 = vrot.slane %v5849_v17, %v10139_v62 }
 0x268   :  { %v8259_v25 = vrot.slane %v8245_v20, %v10139_v62 }
 0x269   :  { %v5858_v40 = vcombine.high %v13068_v46, %v13068_v46  ;;  %v13082_v49 = vrot.slane %v5857_v12, %v10139_v62  ;;  %v5887_v12 = vcombine.high %v13078_v48, %v13078_v48 }
 0x26a   :  { %v8260_v60 = vcombine.low %v8252_v29, %v8259_v25 }
 0x26c   :  { %9683 = vmatmul.mubr.msk.f32.vlgmr.msra.gmra.mxu1 %vm8546_vm3, %v8260_v60 }
 0x26d   :  { %9685 = vmatprep.mubr.msk.f32.mxu1 %vm9806_vm7, %v13881_v41 }
 0x26e   :  { %v7464_v1 = vpop.permute.xlu1 %7463 }
 0x26f   :  { %v7835_v24 = vsel %vm7833_vm0, %v6868_v0, %v7464_v1 }
 0x274   :  { %v7638_v43 = vpop.permute.xlu0 %7637 }
 0x275   :  { %v7844_v55 = vsel %vm7842_vm1, %v7835_v24, %v7638_v43  ;;  %v5872_v24 = vrot.slane %v13068_v46, %v10139_v62  ;;  %v5889_v46 = vcombine.high %v13082_v49, %v13082_v49 }
 0x280   :  { %v4672_v42 = vpop.f32.mrf.mxu0 }
 0x281   :  { %v4673_v59 = vadd.f32 %v12935_v53, %v4672_v42 }
 0x282   :  { %v9628_v50 = vpop.f32.mrf.mxu0 }
 0x283   :  { %v4766_v2 = vmax.f32 %v4673_v59, 0.0 }
 0x285   :  { %v7812_v27 = vpop.permute.xlu1 %7811  ;;  %v5548_v54 = vcombine.high %v4766_v2, %v4766_v2  ;;  %v5555_v22 = vrot.slane %v4766_v2, %v10139_v62 }
 0x286   :  { %v7853_v34 = vsel %vm7851_vm2, %v7844_v55, %v7812_v27 }
 0x287   :  { %v7917_v61 = vcombine.high %v7853_v34, %v7853_v34  ;;  %v7924_v21 = vrot.slane %v7853_v34, %v10139_v62  ;;  %v5562_v56 = vrot.slane %v5548_v54, %v10139_v62  ;;  %v5563_v10 = vcombine.high %v5555_v22, %v5555_v22 }
 0x288   :  { %v5571_v38 = vrot.slane %v5555_v22, %v10139_v62  ;;  %v4677_v57 = vpop.f32.mrf.mxu0 }
 0x289   :  { %v7931_v16 = vrot.slane %v7917_v61, %v10139_v62  ;;  %v7932_v18 = vcombine.high %v7924_v21, %v7924_v21  ;;  %v5564_v31 = vcombine.high %v5562_v56, %v5562_v56  ;;  %v5578_v44 = vrot.slane %v5562_v56, %v10139_v62 }
 0x28a   :  { %v5585_v13 = vrot.slane %v5563_v10, %v10139_v62  ;;  %v5593_v7 = vcombine.high %v5571_v38, %v5571_v38  ;;  %v4678_v35 = vadd.f32 %v12935_v53, %v4677_v57  ;;  %v9631_v6 = vpop.f32.mrf.mxu0  ;;  %v7940_v29 = vrot.slane %v7924_v21, %v10139_v62 }
 0x28b   :  { %v4707_v20 = vpop.f32.mrf.mxu1  ;;  %v7933_v33 = vcombine.high %v7931_v16, %v7931_v16  ;;  %v7954_v25 = vrot.slane %v7932_v18, %v10139_v62  ;;  %v5592_v5 = vrot.slane %v5564_v31, %v10139_v62  ;;  %v7947_v60 = vrot.slane %v7931_v16, %v10139_v62 }
 0x28c   :  { %v5594_v4 = vcombine.high %v5578_v44, %v5578_v44  ;;  %v5595_v39 = vcombine.high %v5585_v13, %v5585_v13  ;;  %v4767_v26 = vmax.f32 %v4678_v35, 0.0  ;;  %v6567_v30 = vmax.f32 %v5585_v13, %v5593_v7 }
 0x28d   :  { %v9649_v23 = vpop.f32.mrf.mxu1  ;;  %v7961_v32 = vrot.slane %v7933_v33, %v10139_v62  ;;  %v8261_v47 = vcombine.low %v7940_v29, %v7954_v25  ;;  %v9488_v14 = vcombine.high %v7940_v29, %v7954_v25  ;;  %v5596_v63 = vcombine.high %v5592_v5, %v5592_v5 }
 0x28e   :  { %v6627_v11 = vmax.f32 %v5595_v39, %v5578_v44  ;;  %v5597_v9 = vcombine.high %v4767_v26, %v4767_v26  ;;  %v5604_v52 = vrot.slane %v4767_v26, %v10139_v62  ;;  %v4708_v2 = vadd.f32 %v12935_v53, %v4707_v20 }
 0x28f   :  { %v8263_v15 = vcombine.low %v7947_v60, %v7961_v32  ;;  %v9489_v58 = vcombine.high %v7947_v60, %v7961_v32  ;;  %v8271_v1 = vrot.slane %v8261_v47, %v10139_v62  ;;  %v8278_v45 = vrot.slane %v9488_v14, %v10139_v62 }
 0x290   :  { %v6687_v0 = vmax.f32 %v6567_v30, %v6627_v11  ;;  %v5611_v42 = vrot.slane %v5597_v9, %v10139_v62  ;;  %v5612_v17 = vcombine.high %v5604_v52, %v5604_v52  ;;  %v5620_v59 = vrot.slane %v5604_v52, %v10139_v62 }
 0x291   :  { %v8285_v43 = vrot.slane %v8263_v15, %v10139_v62  ;;  %v8292_v50 = vrot.slane %v9489_v58, %v10139_v62  ;;  %v8293_v55 = vcombine.low %v8271_v1, %v8278_v45  ;;  %v6568_v22 = vmax.f32 %v5592_v5, %v5594_v4 }
 0x292   :  { %v5634_v27 = vrot.slane %v5612_v17, %v10139_v62  ;;  %v5642_v54 = vcombine.high %v5620_v59, %v5620_v59  ;;  %v6628_v34 = vmax.f32 %v5596_v63, %v5620_v59  ;;  %v4773_v61 = vmax.f32 %v4708_v2, 0.0 }
 0x293   :  { %v8294_v21 = vcombine.low %v8285_v43, %v8292_v50  ;;  %v5886_v56 = vrot.slane %v5858_v40, %v10139_v62  ;;  %v13110_v10 = vrot.slane %v5611_v42, %v10139_v62  ;;  %v5888_v44 = vcombine.high %v5872_v24, %v5872_v24 }
 0x294   :  { %v5644_v38 = vcombine.high %v5634_v27, %v5634_v27  ;;  %v13112_v57 = vmax.f32 %v6568_v22, %v6628_v34  ;;  %v5891_v16 = vcombine.high %v4773_v61, %v4773_v61  ;;  %v5898_v18 = vrot.slane %v4773_v61, %v10139_v62 }
 0x295   :  { %v8308_v31 = vrot.slane %v8294_v21, %v10139_v62  ;;  %v6569_v13 = vmax.f32 %v5634_v27, %v5642_v54  ;;  %v8301_v40 = vrot.slane %v8293_v55, %v10139_v62  ;;  %v6639_v29 = vmax.f32 %v5889_v46, %v5872_v24 }
 0x296   :  { %v6629_v7 = vmax.f32 %v5644_v38, %v13110_v10  ;;  %v13119_v35 = vcombine.low %v6687_v0, %v13112_v57  ;;  %v5905_v6 = vrot.slane %v5891_v16, %v10139_v62  ;;  %v5906_v20 = vcombine.high %v5898_v18, %v5898_v18 }
 0x297   :  { %v5914_v33 = vrot.slane %v5898_v18, %v10139_v62  ;;  %v5890_v5 = vcombine.high %v5886_v56, %v5886_v56  ;;  %v8309_v60 = vcombine.low %v8301_v40, %v8308_v31  ;;  %v6579_v26 = vmax.f32 %v13082_v49, %v5887_v12 }
 0x298   :  { %v13123_v25 = vmax.f32 %v6569_v13, %v6629_v7  ;;  %v5928_v4 = vrot.slane %v5906_v20, %v10139_v62  ;;  %v6580_v32 = vmax.f32 %v5886_v56, %v5888_v44  ;;  %v5921_v14 = vrot.slane %v5905_v6, %v10139_v62 }
 0x299   :  { %v5936_v39 = vcombine.high %v5914_v33, %v5914_v33  ;;  %v6640_v47 = vmax.f32 %v5890_v5, %v5914_v33  ;;  %9686 = vmatmul.mubr.msk.f32.gmra.mxu1 %vm8546_vm3, %v8309_v60  ;;  %v13133_v11 = vmax.f32 %v6579_v26, %v6639_v29  ;;  %v5613_v1 = vcombine.high %v5611_v42, %v5611_v42 }
 0x29a   :  { %v7291_v23 = vcombine.low %v13112_v57, %v13123_v25  ;;  %v5938_v30 = vcombine.high %v5928_v4, %v5928_v4  ;;  %9688 = vmatprep.mubr.msk.f32.mxu1 %vm9806_vm7, %v13881_v41  ;;  %v5907_v50 = vcombine.high %v5905_v6, %v5905_v6  ;;  %v5643_v22 = vcombine.high %v13110_v10, %v13110_v10 }
 0x29b   :  { %v13135_v63 = vmax.f32 %v6580_v32, %v6640_v47  ;;  %v6581_v9 = vmax.f32 %v5928_v4, %v5936_v39  ;;  %v5641_v59 = vrot.slane %v5613_v1, %v10139_v62  ;;  %v5937_v16 = vcombine.high %v5921_v14, %v5921_v14 }
 0x29c   :  { %v6641_v52 = vmax.f32 %v5938_v30, %v5921_v14  ;;  %v5935_v21 = vrot.slane %v5907_v50, %v10139_v62 }
 0x29d   :  { %v6992_v49 = vcombine.low %v13133_v11, %v13135_v63  ;;  %v5645_v42 = vcombine.high %v5641_v59, %v5641_v59  ;;  %v6570_v7 = vmax.f32 %v5641_v59, %v5643_v22 }
 0x29e   :  { %v13139_v15 = vmax.f32 %v6581_v9, %v6641_v52  ;;  %v5939_v29 = vcombine.high %v5935_v21, %v5935_v21  ;;  %v6582_v39 = vmax.f32 %v5935_v21, %v5937_v16 }
 0x2a0   :  { %v7342_v58 = vcombine.low %v13135_v63, %v13139_v15 }
 0x2a5   :  { %v4682_v45 = vpop.f32.mrf.mxu0 }
 0x2a6   :  { %v4683_v0 = vadd.f32 %v12935_v53, %v4682_v45  ;;  %v4712_v17 = vpop.f32.mrf.mxu1 }
 0x2a7   :  { %v9634_v24 = vpop.f32.mrf.mxu0  ;;  %v4713_v43 = vadd.f32 %v12935_v53, %v4712_v17 }
 0x2a8   :  { %v4768_v2 = vmax.f32 %v4683_v0, 0.0  ;;  %v9652_v12 = vpop.f32.mrf.mxu1  ;;  %v13186_v24 = vrot.slane %v7291_v23, %v10139_v62 }
 0x2a9   :  { %v4774_v55 = vmax.f32 %v4713_v43, 0.0  ;;  %v13194_v12 = vrot.slane %v7342_v58, %v10139_v62 }
 0x2aa   :  { %v5646_v27 = vcombine.high %v4768_v2, %v4768_v2  ;;  %v5653_v54 = vrot.slane %v4768_v2, %v10139_v62 }
 0x2ab   :  { %v5940_v34 = vcombine.high %v4774_v55, %v4774_v55  ;;  %v5947_v61 = vrot.slane %v4774_v55, %v10139_v62 }
 0x2ac   :  { %v5660_v56 = vrot.slane %v5646_v27, %v10139_v62  ;;  %v5661_v46 = vcombine.high %v5653_v54, %v5653_v54  ;;  %v5669_v38 = vrot.slane %v5653_v54, %v10139_v62 }
 0x2ad   :  { %v13154_v18 = vrot.slane %v5940_v34, %v10139_v62  ;;  %v5955_v31 = vcombine.high %v5947_v61, %v5947_v61  ;;  %v5963_v44 = vrot.slane %v5947_v61, %v10139_v62 }
 0x2ae   :  { %v5683_v10 = vrot.slane %v5661_v46, %v10139_v62  ;;  %v5691_v13 = vcombine.high %v5669_v38, %v5669_v38  ;;  %v6630_v40 = vmax.f32 %v5645_v42, %v5669_v38  ;;  %v13160_v20 = vrot.slane %v5660_v56, %v10139_v62 }
 0x2af   :  { %v5977_v6 = vrot.slane %v5955_v31, %v10139_v62  ;;  %v13166_v60 = vrot.slane %v13154_v18, %v10139_v62  ;;  %v5985_v4 = vcombine.high %v5963_v44, %v5963_v44  ;;  %v6642_v14 = vmax.f32 %v5939_v29, %v5963_v44 }
 0x2b0   :  { %v5693_v33 = vcombine.high %v5683_v10, %v5683_v10  ;;  %v13162_v5 = vmax.f32 %v6570_v7, %v6630_v40  ;;  %v6571_v26 = vmax.f32 %v5683_v10, %v5691_v13  ;;  %v7466_v43 = vpop.permute.xlu0 %7465  ;;  %v5662_v38 = vcombine.high %v5660_v56, %v5660_v56 }
 0x2b1   :  { %v5987_v47 = vcombine.high %v5977_v6, %v5977_v6  ;;  %v6583_v52 = vmax.f32 %v5977_v6, %v5985_v4  ;;  %v13174_v45 = vmax.f32 %v6582_v39, %v6642_v14  ;;  %v7836_v57 = vsel %vm7833_vm0, %v6917_v28, %v7466_v43 }
 0x2b2   :  { %v6631_v32 = vmax.f32 %v5693_v33, %v13160_v20  ;;  %v6942_v30 = vcombine.low %v13123_v25, %v13162_v5  ;;  %v5690_v6 = vrot.slane %v5662_v38, %v10139_v62  ;;  %v6951_v25 = vrot.slane %v13119_v35, %v10139_v62 }
 0x2b3   :  { %v6643_v1 = vmax.f32 %v5987_v47, %v13166_v60  ;;  %v6993_v59 = vcombine.low %v13139_v15, %v13174_v45 }
 0x2b4   :  { %v13171_v9 = vmax.f32 %v6571_v26, %v6631_v32  ;;  %v5692_v26 = vcombine.high %v13160_v20, %v13160_v20 }
 0x2b5   :  { %v13178_v17 = vmax.f32 %v6583_v52, %v6643_v1  ;;  %v7640_v23 = vpop.permute.xlu1 %7639 }
 0x2b6   :  { %v7292_v0 = vcombine.low %v13162_v5, %v13171_v9  ;;  %v7845_v22 = vsel %vm7842_vm1, %v7836_v57, %v7640_v23  ;;  %v5694_v57 = vcombine.high %v5690_v6, %v5690_v6 }
 0x2b7   :  { %v7343_v2 = vcombine.low %v13174_v45, %v13178_v17 }
 0x2b8   :  { %v13189_v50 = vrot.slane %v7292_v0, %v10139_v62 }
 0x2b9   :  { %v13197_v55 = vrot.slane %v7343_v2, %v10139_v62 }
 0x2ba   :  { %v7323_v27 = vcombine.low %v13186_v24, %v13189_v50 }
 0x2bb   :  { %v7373_v54 = vcombine.low %v13194_v12, %v13197_v55 }
 0x2be   :  { %v7814_v42 = vpop.permute.xlu0 %7813 }
 0x2bf   :  { %v7854_v58 = vsel %vm7851_vm2, %v7845_v22, %v7814_v42  ;;  %v5956_v22 = vcombine.high %v13154_v18, %v13154_v18 }
 0x2c0   :  { %v7966_v34 = vcombine.high %v7854_v58, %v7854_v58  ;;  %v7973_v61 = vrot.slane %v7854_v58, %v10139_v62  ;;  %v6572_v58 = vmax.f32 %v5690_v6, %v5692_v26 }
 0x2c2   :  { %v7980_v21 = vrot.slane %v7966_v34, %v10139_v62  ;;  %v7981_v46 = vcombine.high %v7973_v61, %v7973_v61  ;;  %v7989_v8 = vrot.slane %v7973_v61, %v10139_v62 }
 0x2c4   :  { %v7982_v16 = vcombine.high %v7980_v21, %v7980_v21  ;;  %v8003_v37 = vrot.slane %v7981_v46, %v10139_v62  ;;  %v4687_v28 = vpop.f32.mrf.mxu0  ;;  %v7996_v44 = vrot.slane %v7980_v21, %v10139_v62 }
 0x2c5   :  { %v4688_v31 = vadd.f32 %v12935_v53, %v4687_v28 }
 0x2c6   :  { %v8010_v10 = vrot.slane %v7982_v16, %v10139_v62  ;;  %v8310_v13 = vcombine.low %v7989_v8, %v8003_v37  ;;  %v9490_v7 = vcombine.high %v7989_v8, %v8003_v37  ;;  %v9637_v40 = vpop.f32.mrf.mxu0 }
 0x2c7   :  { %v4769_v33 = vmax.f32 %v4688_v31, 0.0 }
 0x2c8   :  { %v8312_v29 = vcombine.low %v7996_v44, %v8010_v10  ;;  %v9491_v56 = vcombine.high %v7996_v44, %v8010_v10  ;;  %v8320_v4 = vrot.slane %v8310_v13, %v10139_v62  ;;  %v8327_v39 = vrot.slane %v9490_v7, %v10139_v62 }
 0x2c9   :  { %v5695_v32 = vcombine.high %v4769_v33, %v4769_v33  ;;  %v5702_v47 = vrot.slane %v4769_v33, %v10139_v62  ;;  %v13240_v44 = vrot.slane %v6942_v30, %v10139_v62  ;;  %v5984_v10 = vrot.slane %v5956_v22, %v10139_v62 }
 0x2ca   :  { %v8334_v14 = vrot.slane %v8312_v29, %v10139_v62  ;;  %v8341_v52 = vrot.slane %v9491_v56, %v10139_v62  ;;  %v8342_v1 = vcombine.low %v8320_v4, %v8327_v39  ;;  %v5986_v29 = vcombine.high %v13166_v60, %v13166_v60 }
 0x2cb   :  { %v13225_v0 = vrot.slane %v5695_v32, %v10139_v62  ;;  %v5710_v43 = vcombine.high %v5702_v47, %v5702_v47  ;;  %v5718_v2 = vrot.slane %v5702_v47, %v10139_v62  ;;  %v13265_v60 = vrot.slane %v6993_v59, %v10139_v62 }
 0x2cc   :  { %v8343_v23 = vcombine.low %v8334_v14, %v8341_v52  ;;  %v8350_v46 = vrot.slane %v8342_v1, %v10139_v62  ;;  %v5988_v39 = vcombine.high %v5984_v10, %v5984_v10  ;;  %v13269_v26 = vcombine.low %v6951_v25, %v13240_v44 }
 0x2cd   :  { %v5732_v20 = vrot.slane %v5710_v43, %v10139_v62  ;;  %v5740_v42 = vcombine.high %v5718_v2, %v5718_v2  ;;  %v4717_v34 = vpop.f32.mrf.mxu1  ;;  %v6632_v61 = vmax.f32 %v5694_v57, %v5718_v2  ;;  %v5725_v16 = vrot.slane %v13225_v0, %v10139_v62 }
 0x2ce   :  { %v4718_v21 = vadd.f32 %v12935_v53, %v4717_v34  ;;  %v8357_v38 = vrot.slane %v8343_v23, %v10139_v62  ;;  %v13275_v32 = vrot.slane %v6992_v49, %v10139_v62  ;;  %v6584_v15 = vmax.f32 %v5984_v10, %v5986_v29 }
 0x2cf   :  { %v5742_v8 = vcombine.high %v5732_v20, %v5732_v20  ;;  %v9655_v37 = vpop.f32.mrf.mxu1  ;;  %v6692_v28 = vmax.f32 %v6572_v58, %v6632_v61  ;;  %v6573_v13 = vmax.f32 %v5732_v20, %v5740_v42  ;;  %v5741_v10 = vcombine.high %v5725_v16, %v5725_v16 }
 0x2d0   :  { %v4775_v31 = vmax.f32 %v4718_v21, 0.0  ;;  %v8358_v18 = vcombine.low %v8350_v46, %v8357_v38  ;;  %v7023_v49 = vcombine.low %v13275_v32, %v13265_v60  ;;  %v5711_v21 = vcombine.high %v13225_v0, %v13225_v0 }
 0x2d1   :  { %v6633_v7 = vmax.f32 %v5742_v8, %v5725_v16  ;;  %v6943_v40 = vcombine.low %v13171_v9, %v6692_v28 }
 0x2d2   :  { %v5989_v6 = vcombine.high %v4775_v31, %v4775_v31  ;;  %v5996_v33 = vrot.slane %v4775_v31, %v10139_v62  ;;  %9689 = vmatmul.mubr.msk.f32.gmra.mxu1 %vm8546_vm3, %v8358_v18 }
 0x2d3   :  { %v13248_v56 = vmax.f32 %v6573_v13, %v6633_v7  ;;  %9691 = vmatprep.mubr.msk.f32.mxu1 %vm9806_vm7, %v13881_v41  ;;  %v13255_v5 = vrot.slane %v6943_v40, %v10139_v62 }
 0x2d4   :  { %v13258_v30 = vrot.slane %v5989_v6, %v10139_v62  ;;  %v6004_v9 = vcombine.high %v5996_v33, %v5996_v33  ;;  %v6012_v4 = vrot.slane %v5996_v33, %v10139_v62 }
 0x2d5   :  { %v7293_v35 = vcombine.low %v6692_v28, %v13248_v56  ;;  %v7561_v59 = vcombine.low %v13240_v44, %v13255_v5  ;;  %v5739_v28 = vrot.slane %v5711_v21, %v10139_v62 }
 0x2d6   :  { %v6026_v47 = vrot.slane %v6004_v9, %v10139_v62  ;;  %v6034_v14 = vcombine.high %v6012_v4, %v6012_v4  ;;  %v6644_v45 = vmax.f32 %v5988_v39, %v6012_v4  ;;  %v13285_v1 = vrot.slane %v13258_v30, %v10139_v62 }
 0x2d7   :  { %v13279_v52 = vrot.slane %v7293_v35, %v10139_v62  ;;  %v5743_v40 = vcombine.high %v5739_v28, %v5739_v28  ;;  %v6574_v33 = vmax.f32 %v5739_v28, %v5741_v10  ;;  %v6005_v39 = vcombine.high %v13258_v30, %v13258_v30 }
 0x2d8   :  { %v6036_v43 = vcombine.high %v6026_v47, %v6026_v47  ;;  %v6704_v2 = vmax.f32 %v6584_v15, %v6644_v45  ;;  %v6585_v57 = vmax.f32 %v6026_v47, %v6034_v14  ;;  %v7290_v14 = vrot.slane %v13022_v51, %v10139_v62 }
 0x2d9   :  { %v7735_v63 = vcombine.low %v13189_v50, %v13279_v52  ;;  %v7560_v30 = vrot.slane %v13051_v19, %v10139_v62 }
 0x2da   :  { %v6645_v23 = vmax.f32 %v6036_v43, %v13285_v1  ;;  %v7039_v22 = vcombine.low %v13178_v17, %v6704_v2 }
 0x2dc   :  { %v13293_v20 = vmax.f32 %v6585_v57, %v6645_v23  ;;  %v13296_v42 = vrot.slane %v7039_v22, %v10139_v62  ;;  %v13328_v57 = vrot.slane %v7323_v27, %v10139_v62  ;;  %v13336_v23 = vrot.slane %v7373_v54, %v10139_v62 }
 0x2dd   :  { %v7734_v22 = vrot.slane %v13055_v3, %v10139_v62 }
 0x2de   :  { %v7389_v58 = vcombine.low %v6704_v2, %v13293_v20  ;;  %v7579_v34 = vcombine.low %v13265_v60, %v13296_v42 }
 0x2e0   :  { %v13302_v61 = vrot.slane %v7389_v58, %v10139_v62 }
 0x2e1   :  { %v4692_v46 = vpop.f32.mrf.mxu0 }
 0x2e2   :  { %v4693_v38 = vadd.f32 %v12935_v53, %v4692_v46  ;;  %v7753_v17 = vcombine.low %v13197_v55, %v13302_v61  ;;  %v6033_v46 = vrot.slane %v6005_v39, %v10139_v62 }
 0x2e3   :  { %v9640_v8 = vpop.f32.mrf.mxu0 }
 0x2e4   :  { %v4770_v37 = vmax.f32 %v4693_v38, 0.0  ;;  %v6035_v38 = vcombine.high %v13285_v1, %v13285_v1  ;;  %v13356_v1 = vrot.slane %v7561_v59, %v10139_v62 }
 0x2e6   :  { %v5744_v31 = vcombine.high %v4770_v37, %v4770_v37  ;;  %v5751_v18 = vrot.slane %v4770_v37, %v10139_v62 }
 0x2e8   :  { %v5759_v13 = vcombine.high %v5751_v18, %v5751_v18  ;;  %v5767_v7 = vrot.slane %v5751_v18, %v10139_v62  ;;  %v5758_v0 = vrot.slane %v5744_v31, %v10139_v62 }
 0x2ea   :  { %v5781_v6 = vrot.slane %v5759_v13, %v10139_v62  ;;  %v6634_v29 = vmax.f32 %v5743_v40, %v5767_v7  ;;  %v5760_v16 = vcombine.high %v5758_v0, %v5758_v0  ;;  %v5774_v15 = vrot.slane %v5758_v0, %v10139_v62 }
 0x2eb   :  { %v4722_v25 = vpop.f32.mrf.mxu1  ;;  %v5789_v45 = vcombine.high %v5767_v7, %v5767_v7  ;;  %v6981_v0 = vrot.slane %v13269_v26, %v10139_v62  ;;  %v13488_v26 = vrot.slane %v7023_v49, %v10139_v62 }
 0x2ec   :  { %v5791_v9 = vcombine.high %v5781_v6, %v5781_v6  ;;  %v13314_v4 = vmax.f32 %v6574_v33, %v6634_v29  ;;  %v4723_v35 = vadd.f32 %v12935_v53, %v4722_v25  ;;  %v5788_v8 = vrot.slane %v5760_v16, %v10139_v62 }
 0x2ed   :  { %v9658_v47 = vpop.f32.mrf.mxu1  ;;  %v5790_v37 = vcombine.high %v5774_v15, %v5774_v15  ;;  %v6575_v28 = vmax.f32 %v5781_v6, %v5789_v45 }
 0x2ee   :  { %v6944_v43 = vcombine.low %v13248_v56, %v13314_v4  ;;  %v4776_v2 = vmax.f32 %v4723_v35, 0.0  ;;  %v6635_v56 = vmax.f32 %v5791_v9, %v5774_v15  ;;  %v6037_v35 = vcombine.high %v6033_v46, %v6033_v46 }
 0x2ef   :  { %v6586_v47 = vmax.f32 %v6033_v46, %v6035_v38  ;;  %v5792_v44 = vcombine.high %v5788_v8, %v5788_v8  ;;  %v6576_v59 = vmax.f32 %v5788_v8, %v5790_v37  ;;  %v13368_v15 = vrot.slane %v7735_v63, %v10139_v62 }
 0x2f0   :  { %v13341_v58 = vrot.slane %v6944_v43, %v10139_v62  ;;  %v6038_v21 = vcombine.high %v4776_v2, %v4776_v2  ;;  %v6045_v24 = vrot.slane %v4776_v2, %v10139_v62  ;;  %v6695_v33 = vmax.f32 %v6575_v28, %v6635_v56 }
 0x2f2   :  { %v4697_v27 = vpop.f32.mrf.mxu0  ;;  %v6053_v31 = vcombine.high %v6045_v24, %v6045_v24  ;;  %v6974_v13 = vcombine.low %v13255_v5, %v13341_v58  ;;  %v6052_v6 = vrot.slane %v6038_v21, %v10139_v62  ;;  %v6061_v29 = vrot.slane %v6045_v24, %v10139_v62 }
 0x2f3   :  { %v4698_v54 = vadd.f32 %v12935_v53, %v4697_v27  ;;  %v4727_v10 = vpop.f32.mrf.mxu1  ;;  %v7294_v21 = vcombine.low %v13314_v4, %v6695_v33 }
 0x2f4   :  { %v9643_v18 = vpop.f32.mrf.mxu0  ;;  %v4728_v40 = vadd.f32 %v12935_v53, %v4727_v10  ;;  %v6075_v25 = vrot.slane %v6053_v31, %v10139_v62  ;;  %v13374_v24 = vrot.slane %v6052_v6, %v10139_v62  ;;  %v6083_v27 = vcombine.high %v6061_v29, %v6061_v29 }
 0x2f5   :  { %v4771_v7 = vmax.f32 %v4698_v54, 0.0  ;;  %v9661_v9 = vpop.f32.mrf.mxu1  ;;  %v6054_v54 = vcombine.high %v6052_v6, %v6052_v6  ;;  %v6646_v37 = vmax.f32 %v6037_v35, %v6061_v29 }
 0x2f6   :  { %v4777_v16 = vmax.f32 %v4728_v40, 0.0  ;;  %v6085_v45 = vcombine.high %v6075_v25, %v6075_v25  ;;  %v6587_v40 = vmax.f32 %v6075_v25, %v6083_v27 }
 0x2f7   :  { %v5793_v39 = vcombine.high %v4771_v7, %v4771_v7  ;;  %v5800_v53 = vrot.slane %v4771_v7, %v10139_v62 }
 0x2f8   :  { %v6087_v46 = vcombine.high %v4777_v16, %v4777_v16  ;;  %v6094_v63 = vrot.slane %v4777_v16, %v10139_v62  ;;  %v6647_v18 = vmax.f32 %v6085_v45, %v13374_v24  ;;  %v6082_v45 = vrot.slane %v6054_v54, %v10139_v62 }
 0x2f9   :  { %v5807_v43 = vrot.slane %v5793_v39, %v10139_v62  ;;  %v5808_v2 = vcombine.high %v5800_v53, %v5800_v53  ;;  %v5816_v56 = vrot.slane %v5800_v53, %v10139_v62  ;;  %v13386_v53 = vrot.slane %v7579_v34, %v10139_v62 }
 0x2fa   :  { %v6101_v39 = vrot.slane %v6087_v46, %v10139_v62  ;;  %v6102_v16 = vcombine.high %v6094_v63, %v6094_v63  ;;  %v6086_v54 = vcombine.high %v6082_v45, %v6082_v45 }
 0x2fb   :  { %v5809_v38 = vcombine.high %v5807_v43, %v5807_v43  ;;  %v5823_v8 = vrot.slane %v5807_v43, %v10139_v62  ;;  %v5830_v50 = vrot.slane %v5808_v2, %v10139_v62  ;;  %v5838_v28 = vcombine.high %v5816_v56, %v5816_v56 }
 0x2fc   :  { %v6636_v31 = vmax.f32 %v5792_v44, %v5816_v56  ;;  %v7322_v44 = vrot.slane %v7294_v21, %v10139_v62  ;;  %v13390_v43 = vmax.f32 %v6586_v47, %v6646_v37  ;;  %v6103_v46 = vcombine.high %v6101_v39, %v6101_v39 }
 0x2fd   :  { %v5837_v4 = vrot.slane %v5809_v38, %v10139_v62  ;;  %v5839_v10 = vcombine.high %v5823_v8, %v5823_v8  ;;  %v5840_v7 = vcombine.high %v5830_v50, %v5830_v50  ;;  %v6577_v29 = vmax.f32 %v5830_v50, %v5838_v28 }
 0x2fe   :  { %v6696_v9 = vmax.f32 %v6576_v59, %v6636_v31  ;;  %v13392_v59 = vmax.f32 %v6587_v40, %v6647_v18  ;;  %v6110_v38 = vrot.slane %v6094_v63, %v10139_v62  ;;  %v13403_v21 = vrot.slane %v7753_v17, %v10139_v62 }
 0x2ff   :  { %v5841_v6 = vcombine.high %v5837_v4, %v5837_v4  ;;  %v6637_v35 = vmax.f32 %v5840_v7, %v5823_v8  ;;  %v6578_v2 = vmax.f32 %v5837_v4, %v5839_v10  ;;  %v7040_v50 = vcombine.low %v13293_v20, %v13390_v43 }
 0x300   :  { %v6990_v25 = vcombine.low %v6695_v33, %v6696_v9  ;;  %v6084_v33 = vcombine.high %v13374_v24, %v13374_v24  ;;  %v6117_v37 = vrot.slane %v6101_v39, %v10139_v62  ;;  %v7324_v63 = vcombine.low %v13279_v52, %v7322_v44  ;;  %v13423_v52 = vld [vmem:[%s13842_s1 + $0x28] ss:$0 sm:$0xff] }
 0x301   :  { %v6638_v56 = vmax.f32 %v5841_v6, %v13078_v48  ;;  %v6697_v27 = vmax.f32 %v6577_v29, %v6637_v35  ;;  %v6124_v48 = vrot.slane %v6102_v16, %v10139_v62  ;;  %v7390_v55 = vcombine.low %v13390_v43, %v13392_v59 }
 0x302   :  { %v13396_v34 = vrot.slane %v6990_v25, %v10139_v62  ;;  %v6131_v31 = vrot.slane %v6103_v46, %v10139_v62  ;;  %v6132_v18 = vcombine.high %v6110_v38, %v6110_v38  ;;  %v7338_v4 = vrot.slane %v7324_v63, %v10139_v62 }
 0x303   :  { %v6698_v47 = vmax.f32 %v6578_v2, %v6638_v56  ;;  %v7340_v8 = vcombine.low %v6696_v9, %v6697_v27  ;;  %v6134_v7 = vcombine.high %v6124_v48, %v6124_v48  ;;  %v6133_v39 = vcombine.high %v6117_v37, %v6117_v37 }
 0x304   :  { %v7562_v20 = vcombine.low %v13341_v58, %v13396_v34  ;;  %v7339_v6 = vcombine.low %v13328_v57, %v7338_v4  ;;  %v6588_v43 = vmax.f32 %v6082_v45, %v6084_v33  ;;  %v6648_v25 = vmax.f32 %v6086_v54, %v6110_v38 }
 0x305   :  { %v6991_v17 = vcombine.low %v6697_v27, %v6698_v47  ;;  %v7341_v28 = vcombine.low %v6698_v47, %v13133_v11  ;;  %v7350_v24 = vrot.slane %v7340_v8, %v10139_v62  ;;  %v4732_v10 = vpop.f32.mrf.mxu1  ;;  %v6589_v57 = vmax.f32 %v6124_v48, %v6132_v18 }
 0x306   :  { %v4733_v40 = vadd.f32 %v13423_v52, %v4732_v10  ;;  %v7576_v29 = vrot.slane %v7562_v20, %v10139_v62  ;;  %7469 = vrot.lane.b32.xlu1 %v7339_v6, %s9809_s22  ;;  %v6649_v8 = vmax.f32 %v6134_v7, %v6117_v37  ;;  %v6708_v33 = vmax.f32 %v6588_v43, %v6648_v25 }
 0x307   :  { %v7736_v11 = vcombine.low %v7322_v44, %v7350_v24  ;;  %v7357_v9 = vrot.slane %v7341_v28, %v10139_v62  ;;  %v9664_v35 = vpop.f32.mrf.mxu1  ;;  %v7007_v16 = vrot.slane %v6991_v17, %v10139_v62  ;;  %v6135_v17 = vcombine.high %v6131_v31, %v6131_v31 }
 0x308   :  { %v4778_v2 = vmax.f32 %v4733_v40, 0.0  ;;  %v7577_v27 = vcombine.low %v13356_v1, %v7576_v29  ;;  %v13454_v10 = vrot.slane %v7040_v50, %v10139_v62  ;;  %v6709_v20 = vmax.f32 %v6589_v57, %v6649_v8 }
 0x309   :  { %v7372_v56 = vcombine.low %v7350_v24, %v7357_v9  ;;  %v7750_v44 = vrot.slane %v7736_v11, %v10139_v62  ;;  %v7578_v46 = vcombine.low %v7007_v16, %v13275_v32  ;;  %v7752_v47 = vcombine.low %v7357_v9, %v13194_v12 }
 0x30a   :  { %v6136_v63 = vcombine.high %v4778_v2, %v4778_v2  ;;  %v6143_v28 = vrot.slane %v4778_v2, %v10139_v62  ;;  %7643 = vrot.lane.b32.xlu0 %v7577_v27, %s9808_s19  ;;  %7467 = vrot.lane.b32.xlu1 %v7290_v14, %s9809_s22  ;;  %v13458_v11 = vrot.slane %v7390_v55, %v10139_v62 }
 0x30b   :  { %v7380_v45 = vrot.slane %v7372_v56, %v10139_v62  ;;  %v7586_v38 = vrot.slane %v7578_v46, %v10139_v62  ;;  %v13440_v1 = vrot.slane %v7752_v47, %v10139_v62  ;;  %v7751_v48 = vcombine.low %v13368_v15, %v7750_v44 }
 0x30c   :  { %v6150_v54 = vrot.slane %v6136_v63, %v10139_v62  ;;  %v6151_v24 = vcombine.high %v6143_v28, %v6143_v28  ;;  %v6159_v12 = vrot.slane %v6143_v28, %v10139_v62  ;;  %v6590_v51 = vmax.f32 %v6131_v31, %v6133_v39 }
 0x30d   :  { %v7388_v37 = vcombine.low %v7380_v45, %v13336_v23  ;;  %v7594_v18 = vcombine.low %v7586_v38, %v13386_v53  ;;  %v7768_v4 = vcombine.low %v13440_v1, %v13403_v21  ;;  %v6988_v23 = vrot.slane %v6974_v13, %v10139_v62 }
 0x30e   :  { %v6173_v7 = vrot.slane %v6151_v24, %v10139_v62  ;;  %v6181_v40 = vcombine.high %v6159_v12, %v6159_v12  ;;  %v6650_v14 = vmax.f32 %v6135_v17, %v6159_v12  ;;  %7817 = vrot.lane.b32.xlu0 %v7751_v48, %s9810_s20  ;;  %v7041_v15 = vcombine.low %v13392_v59, %v6708_v33 }
 0x30f   :  { %v6152_v53 = vcombine.high %v6150_v54, %v6150_v54  ;;  %v6166_v21 = vrot.slane %v6150_v54, %v10139_v62  ;;  %7641 = vrot.lane.b32.xlu1 %v7560_v30, %s9808_s19  ;;  %v13475_v5 = vcombine.low %v6981_v0, %v6988_v23  ;;  %v7022_v58 = vcombine.low %v13396_v34, %v7007_v16 }
 0x310   :  { %v6183_v50 = vcombine.high %v6173_v7, %v6173_v7  ;;  %v4737_v9 = vpop.f32.mrf.mxu1  ;;  %v6710_v6 = vmax.f32 %v6590_v51, %v6650_v14  ;;  %v7391_v13 = vcombine.low %v6708_v33, %v6709_v20  ;;  %v6591_v59 = vmax.f32 %v6173_v7, %v6181_v40 }
 0x311   :  { %v4738_v55 = vadd.f32 %v13423_v52, %v4737_v9  ;;  %v7071_v29 = vcombine.low %v13296_v42, %v13454_v10  ;;  %v13482_v30 = vrot.slane %v7022_v58, %v10139_v62  ;;  %v13491_v0 = vrot.slane %v7041_v15, %v10139_v62 }
 0x312   :  { %v6651_v31 = vmax.f32 %v6183_v50, %v6166_v21  ;;  %v9667_v39 = vpop.f32.mrf.mxu1  ;;  %v7042_v35 = vcombine.low %v6709_v20, %v6710_v6  ;;  %7471 = vrot.lane.b32.xlu0 %v7388_v37, %s9809_s22  ;;  %v6180_v34 = vrot.slane %v6152_v53, %v10139_v62  ;;  %v6182_v16 = vcombine.high %v6166_v21, %v6166_v21 }
 0x313   :  { %v4779_v19 = vmax.f32 %v4738_v55, 0.0  ;;  %7815 = vrot.lane.b32.xlu1 %v7734_v22, %s9810_s20  ;;  %v7038_v60 = vcombine.low %v13482_v30, %v13488_v26  ;;  %v13505_v32 = vrot.slane %v7391_v13, %v10139_v62  ;;  %v7421_v56 = vcombine.low %v13302_v61, %v13458_v11 }
 0x314   :  { %v6711_v42 = vmax.f32 %v6591_v59, %v6651_v31  ;;  %v13495_v43 = vrot.slane %v7042_v35, %v10139_v62  ;;  %v6184_v47 = vcombine.high %v6180_v34, %v6180_v34  ;;  %v6592_v57 = vmax.f32 %v6180_v34, %v6182_v16 }
 0x315   :  { %v6185_v25 = vcombine.high %v4779_v19, %v4779_v19  ;;  %v6192_v2 = vrot.slane %v4779_v19, %v10139_v62  ;;  %v13518_v8 = vrot.slane %v7071_v29, %v10139_v62  ;;  %v7429_v48 = vrot.slane %v7421_v56, %v10139_v62 }
 0x316   :  { %v7392_v49 = vcombine.low %v6710_v6, %v6711_v42  ;;  %7645 = vrot.lane.b32.xlu0 %v7594_v18, %s9808_s19  ;;  %v7072_v3 = vcombine.low %v13491_v0, %v13495_v43  ;;  %v7595_v6 = vcombine.low %v13454_v10, %v13491_v0  ;;  %v7769_v55 = vcombine.low %v13458_v11, %v13505_v32 }
 0x317   :  { %v6199_v27 = vrot.slane %v6185_v25, %v10139_v62  ;;  %v6200_v44 = vcombine.high %v6192_v2, %v6192_v2  ;;  %v6208_v46 = vrot.slane %v6192_v2, %v10139_v62  ;;  %7819 = vrot.lane.b32.xlu1 %v7768_v4, %s9810_s20 }
 0x318   :  { %v13515_v22 = vrot.slane %v7392_v49, %v10139_v62  ;;  %v4742_v45 = vpop.f32.mrf.mxu1  ;;  %v13527_v54 = vrot.slane %v7072_v3, %v10139_v62 }
 0x319   :  { %v6201_v63 = vcombine.high %v6199_v27, %v6199_v27  ;;  %v6215_v61 = vrot.slane %v6199_v27, %v10139_v62  ;;  %v6222_v28 = vrot.slane %v6200_v44, %v10139_v62  ;;  %v6230_v17 = vcombine.high %v6208_v46, %v6208_v46 }
 0x31a   :  { %v6652_v38 = vmax.f32 %v6184_v47, %v6208_v46  ;;  %v4743_v1 = vadd.f32 %v13423_v52, %v4742_v45  ;;  %v7422_v33 = vcombine.low %v13505_v32, %v13515_v22  ;;  %v9670_v12 = vpop.f32.mrf.mxu1  ;;  %v7087_v4 = vcombine.low %v13518_v8, %v13527_v54 }
 0x31b   :  { %v6232_v24 = vcombine.high %v6222_v28, %v6222_v28  ;;  %v6229_v7 = vrot.slane %v6201_v63, %v10139_v62  ;;  %v6231_v40 = vcombine.high %v6215_v61, %v6215_v61  ;;  %v6593_v51 = vmax.f32 %v6222_v28, %v6230_v17 }
 0x31c   :  { %v6712_v37 = vmax.f32 %v6592_v57, %v6652_v38  ;;  %v4780_v18 = vmax.f32 %v4743_v1, 0.0  ;;  %v7436_v20 = vrot.slane %v7422_v33, %v10139_v62  ;;  %v7603_v44 = vrot.slane %v7595_v6, %v10139_v62  ;;  %v13560_v33 = vld [vmem:[%s13842_s1 + $0x50] ss:$0 sm:$0xff] }
 0x31d   :  { %v6653_v14 = vmax.f32 %v6232_v24, %v6215_v61  ;;  %v6233_v29 = vcombine.high %v6229_v7, %v6229_v7  ;;  %v6594_v35 = vmax.f32 %v6229_v7, %v6231_v40  ;;  %v7777_v28 = vrot.slane %v7769_v55, %v10139_v62 }
 0x31e   :  { %v7088_v23 = vcombine.low %v6711_v42, %v6712_v37  ;;  %v6234_v15 = vcombine.high %v4780_v18, %v4780_v18  ;;  %v6241_v53 = vrot.slane %v4780_v18, %v10139_v62  ;;  %v7437_v21 = vcombine.low %v7429_v48, %v7436_v20  ;;  %v4747_v9 = vpop.f32.mrf.mxu1 }
 0x31f   :  { %v6713_v50 = vmax.f32 %v6593_v51, %v6653_v14  ;;  %v4748_v19 = vadd.f32 %v13423_v52, %v4747_v9 }
 0x320   :  { %v7095_v58 = vrot.slane %v7088_v23, %v10139_v62  ;;  %v6248_v13 = vrot.slane %v6234_v15, %v10139_v62  ;;  %v6249_v59 = vcombine.high %v6241_v53, %v6241_v53  ;;  %v6257_v31 = vrot.slane %v6241_v53, %v10139_v62  ;;  %7473 = vrot.lane.b32.xlu0 %v7437_v21, %s9809_s22  ;;  %v9673_v34 = vpop.f32.mrf.mxu1 }
 0x321   :  { %v7438_v39 = vcombine.low %v6712_v37, %v6713_v50  ;;  %v4781_v2 = vmax.f32 %v4748_v19, 0.0  ;;  %v7102_v15 = vrot.slane %v6713_v50, %v10139_v62 }
 0x322   :  { %v6250_v16 = vcombine.high %v6248_v13, %v6248_v13  ;;  %v6264_v10 = vrot.slane %v6248_v13, %v10139_v62  ;;  %v6271_v11 = vrot.slane %v6249_v59, %v10139_v62  ;;  %v6279_v0 = vcombine.high %v6257_v31, %v6257_v31 }
 0x323   :  { %v7445_v42 = vrot.slane %v7438_v39, %v10139_v62  ;;  %v6654_v25 = vmax.f32 %v6233_v29, %v6257_v31  ;;  %v7596_v32 = vcombine.low %v13495_v43, %v7095_v58  ;;  %v6289_v46 = vrot.slane %v4781_v2, %v10139_v62 }
 0x324   :  { %v6278_v49 = vrot.slane %v6250_v16, %v10139_v62  ;;  %v6280_v56 = vcombine.high %v6264_v10, %v6264_v10  ;;  %v6281_v27 = vcombine.high %v6271_v11, %v6271_v11  ;;  %v6595_v57 = vmax.f32 %v6271_v11, %v6279_v0 }
 0x325   :  { %v6714_v52 = vmax.f32 %v6594_v35, %v6654_v25  ;;  %v7610_v3 = vrot.slane %v7596_v32, %v10139_v62  ;;  %v7770_v47 = vcombine.low %v13515_v22, %v7445_v42  ;;  %v6296_v43 = vrot.slane %v6289_v46, %v10139_v62 }
 0x326   :  { %v6655_v63 = vmax.f32 %v6281_v27, %v6264_v10  ;;  %v6282_v61 = vcombine.high %v6278_v49, %v6278_v49  ;;  %v6596_v22 = vmax.f32 %v6278_v49, %v6280_v56  ;;  %v13572_v13 = vcombine.low %v7095_v58, %v7102_v15 }
 0x327   :  { %v7611_v17 = vcombine.low %v7603_v44, %v7610_v3  ;;  %v7784_v45 = vrot.slane %v7770_v47, %v10139_v62  ;;  %v7452_v38 = vrot.slane %v6714_v52, %v10139_v62  ;;  %v7612_v24 = vcombine.low %v6713_v50, %v6714_v52 }
 0x328   :  { %v6715_v1 = vmax.f32 %v6595_v57, %v6655_v63  ;;  %v6656_v12 = vmax.f32 %v6282_v61, %v6296_v43  ;;  %v7110_v8 = vrot.slane %v13572_v13, %v10139_v62 }
 0x329   :  { %7647 = vrot.lane.b32.xlu1 %v7611_v17, %s9808_s19  ;;  %v7785_v48 = vcombine.low %v7777_v28, %v7784_v45  ;;  %v7453_v37 = vcombine.low %v7445_v42, %v7452_v38  ;;  %v7619_v7 = vrot.slane %v7612_v24, %v10139_v62 }
 0x32a   :  { %v7786_v18 = vcombine.low %v6714_v52, %v6715_v1  ;;  %v7626_v40 = vrot.slane %v6715_v1, %v10139_v62  ;;  %v6716_v51 = vmax.f32 %v6596_v22, %v6656_v12 }
 0x32b   :  { %7821 = vrot.lane.b32.xlu0 %v7785_v48, %s9810_s20  ;;  %v7460_v14 = vrot.slane %v7453_v37, %v10139_v62 }
 0x32c   :  { %v8627_v20 = vpop.f32.mrf.mxu1  ;;  %v7627_v21 = vcombine.low %v7619_v7, %v7626_v40  ;;  %v7793_v9 = vrot.slane %v7786_v18, %v10139_v62  ;;  %v7800_v6 = vrot.slane %v6716_v51, %v10139_v62 }
 0x32d   :  { %v8628_v23 = vadd.f32 %v13560_v33, %v8627_v20  ;;  %7475 = vrot.lane.b32.xlu1 %v7460_v14, %s9809_s22 }
 0x32e   :  { %v9684_v53 = vpop.f32.mrf.mxu1  ;;  %v7634_v59 = vrot.slane %v7627_v21, %v10139_v62  ;;  %v7801_v29 = vcombine.low %v7793_v9, %v7800_v6 }
 0x32f   :  { %v8661_v55 = vmax.f32 %v8628_v23, 0.0  ;;  %v6940_v53 = vrot.slane %v13037_v36, %v10139_v62 }
 0x330   :  { %7649 = vrot.lane.b32.xlu0 %v7634_v59, %s9808_s19  ;;  %v7808_v34 = vrot.slane %v7801_v29, %v10139_v62 }
 0x331   :  { %v8675_v31 = vcombine.high %v8661_v55, %v8661_v55  ;;  %v8682_v39 = vrot.slane %v8661_v55, %v10139_v62 }
 0x332   :  { %7823 = vrot.lane.b32.xlu1 %v7808_v34, %s9810_s20 }
 0x333   :  { %v8689_v50 = vrot.slane %v8675_v31, %v10139_v62  ;;  %v8690_v35 = vcombine.high %v8682_v39, %v8682_v39  ;;  %v8698_v19 = vrot.slane %v8682_v39, %v10139_v62 }
 0x335   :  { %v8691_v16 = vcombine.high %v8689_v50, %v8689_v50  ;;  %v8705_v10 = vrot.slane %v8689_v50, %v10139_v62  ;;  %v8712_v58 = vrot.slane %v8690_v35, %v10139_v62  ;;  %v8720_v0 = vcombine.high %v8698_v19, %v8698_v19 }
 0x337   :  { %v8719_v11 = vrot.slane %v8691_v16, %v10139_v62  ;;  %v8722_v42 = vcombine.high %v8712_v58, %v8712_v58  ;;  %v8721_v25 = vcombine.high %v8705_v10, %v8705_v10  ;;  %v9032_v49 = vmax.f32 %v8698_v19, %v8712_v58 }
 0x339   :  { %v8723_v2 = vcombine.high %v8719_v11, %v8719_v11  ;;  %v9044_v32 = vmax.f32 %v8720_v0, %v8722_v42  ;;  %v9033_v56 = vmax.f32 %v8705_v10, %v8719_v11 }
 0x33b   :  { %v9045_v27 = vmax.f32 %v8721_v25, %v8723_v2  ;;  %v13584_v44 = vmax.f32 %v9032_v49, %v9044_v32 }
 0x33d   :  { %v13586_v52 = vmax.f32 %v9033_v56, %v9045_v27 }
 0x33f   :  { %v9068_v46 = vmax.f32 %v13584_v44, %v13586_v52  ;;  %v58_v44 = vld [vmem:[%s13842_s1 + $0x78] sm:$0xff] }
 0x359   :  { %v8632_v3 = vpop.f32.mrf.mxu1 }
 0x35a   :  { %v8633_v47 = vadd.f32 %v13560_v33, %v8632_v3 }
 0x35b   :  { %v9687_v57 = vpop.f32.mrf.mxu1 }
 0x35c   :  { %v8662_v63 = vmax.f32 %v8633_v47, 0.0 }
 0x35e   :  { %v8731_v61 = vrot.slane %v8662_v63, %v10139_v62  ;;  %v8724_v36 = vcombine.high %v8662_v63, %v8662_v63 }
 0x360   :  { %v8739_v28 = vcombine.high %v8731_v61, %v8731_v61  ;;  %v8747_v43 = vrot.slane %v8731_v61, %v10139_v62  ;;  %v8738_v30 = vrot.slane %v8724_v36, %v10139_v62 }
 0x362   :  { %v8761_v17 = vrot.slane %v8739_v28, %v10139_v62  ;;  %v8769_v45 = vcombine.high %v8747_v43, %v8747_v43 }
 0x364   :  { %v8771_v38 = vcombine.high %v8761_v17, %v8761_v17  ;;  %v9034_v1 = vmax.f32 %v8747_v43, %v8761_v17 }
 0x366   :  { %v9046_v24 = vmax.f32 %v8769_v45, %v8771_v38 }
 0x368   :  { %v13594_v22 = vmax.f32 %v9034_v1, %v9046_v24  ;;  %v8740_v24 = vcombine.high %v8738_v30, %v8738_v30 }
 0x36a   :  { %v9069_v12 = vmax.f32 %v13586_v52, %v13594_v22  ;;  %v57_v52 = vld [vmem:[%s13842_s1 + $0x70] sm:$0xff] }
 0x378   :  { %v7470_v48 = vpop.permute.xlu1 %7469 }
 0x379   :  { %v7838_v18 = vsel %vm7833_vm0, %v13475_v5, %v7470_v48 }
 0x37c   :  { %v7644_v37 = vpop.permute.xlu0 %7643  ;;  %v7468_v20 = vpop.permute.xlu1 %7467 }
 0x37d   :  { %v7847_v7 = vsel %vm7842_vm1, %v7838_v18, %v7644_v37  ;;  %v7837_v5 = vsel %vm7833_vm0, %v6940_v53, %v7468_v20 }
 0x380   :  { %v7818_v40 = vpop.permute.xlu0 %7817 }
 0x381   :  { %v7856_v51 = vsel %vm7851_vm2, %v7847_v7, %v7818_v40  ;;  %v7642_v15 = vpop.permute.xlu1 %7641 }
 0x382   :  { %v8038_v14 = vcombine.high %v7856_v51, %v7856_v51  ;;  %v8045_v23 = vrot.slane %v7856_v51, %v10139_v62  ;;  %v7846_v29 = vsel %vm7842_vm1, %v7837_v5, %v7642_v15  ;;  %v8768_v5 = vrot.slane %v8740_v24, %v10139_v62 }
 0x384   :  { %v8052_v21 = vrot.slane %v8038_v14, %v10139_v62  ;;  %v8053_v9 = vcombine.high %v8045_v23, %v8045_v23  ;;  %v8061_v6 = vrot.slane %v8045_v23, %v10139_v62  ;;  %v7472_v55 = vpop.permute.xlu0 %7471 }
 0x385   :  { %v7816_v50 = vpop.permute.xlu1 %7815  ;;  %v7839_v16 = vsel %vm7833_vm0, %v7038_v60, %v7472_v55 }
 0x386   :  { %v8054_v59 = vcombine.high %v8052_v21, %v8052_v21  ;;  %v8075_v31 = vrot.slane %v8053_v9, %v10139_v62  ;;  %v8083_v39 = vcombine.high %v8061_v6, %v8061_v6  ;;  %v8068_v35 = vrot.slane %v8052_v21, %v10139_v62 }
 0x387   :  { %v7855_v19 = vsel %vm7851_vm2, %v7846_v29, %v7816_v50 }
 0x388   :  { %v8085_v34 = vcombine.high %v8075_v31, %v8075_v31  ;;  %v7646_v10 = vpop.permute.xlu0 %7645  ;;  %v8021_v58 = vrot.slane %v7855_v19, %v10139_v62  ;;  %v8082_v0 = vrot.slane %v8054_v59, %v10139_v62  ;;  %v8361_v42 = vcombine.low %v8075_v31, %v8083_v39 }
 0x389   :  { %v7848_v11 = vsel %vm7842_vm1, %v7839_v16, %v7646_v10  ;;  %v7820_v2 = vpop.permute.xlu1 %7819  ;;  %v8084_v32 = vcombine.high %v8068_v35, %v8068_v35  ;;  %v8772_v10 = vcombine.high %v8768_v5, %v8768_v5 }
 0x38a   :  { %v8362_v25 = vcombine.low %v8085_v34, %v8068_v35  ;;  %v8022_v49 = vcombine.high %v8021_v58, %v8021_v58  ;;  %v8029_v56 = vrot.slane %v8021_v58, %v10139_v62  ;;  %v7857_v27 = vsel %vm7851_vm2, %v7848_v11, %v7820_v2 }
 0x38b   :  { %v8087_v26 = vcombine.high %v7857_v27, %v7857_v27  ;;  %v8094_v60 = vrot.slane %v7857_v27, %v10139_v62  ;;  %v8383_v63 = vrot.slane %v8361_v42, %v10139_v62  ;;  %v8408_v17 = vcombine.low %v8082_v0, %v8084_v32 }
 0x38c   :  { %v8390_v3 = vrot.slane %v8362_v25, %v10139_v62  ;;  %v8036_v47 = vrot.slane %v8022_v49, %v10139_v62  ;;  %v8037_v57 = vcombine.high %v8029_v56, %v8029_v56  ;;  %v8086_v1 = vcombine.high %v8082_v0, %v8082_v0 }
 0x38d   :  { %v8101_v61 = vrot.slane %v8087_v26, %v10139_v62  ;;  %v8102_v28 = vcombine.high %v8094_v60, %v8094_v60  ;;  %v8110_v43 = vrot.slane %v8094_v60, %v10139_v62  ;;  %v8418_v21 = vrot.slane %v8408_v17, %v10139_v62 }
 0x38e   :  { %v8359_v45 = vcombine.low %v8029_v56, %v8036_v47  ;;  %v8360_v38 = vcombine.low %v8037_v57, %v8061_v6  ;;  %v8392_v40 = vcombine.low %v8383_v63, %v8390_v3  ;;  %v8754_v35 = vrot.slane %v8738_v30, %v10139_v62 }
 0x38f   :  { %v8124_v48 = vrot.slane %v8102_v28, %v10139_v62  ;;  %v8132_v37 = vcombine.high %v8110_v43, %v8110_v43  ;;  %v8409_v7 = vcombine.low %v8086_v1, %v8110_v43  ;;  %v8117_v14 = vrot.slane %v8101_v61, %v10139_v62 }
 0x390   :  { %v8369_v18 = vrot.slane %v8359_v45, %v10139_v62  ;;  %v8376_v20 = vrot.slane %v8360_v38, %v10139_v62  ;;  %v8406_v29 = vrot.slane %v8392_v40, %v10139_v62  ;;  %v8103_v58 = vcombine.high %v8101_v61, %v8101_v61 }
 0x391   :  { %v8134_v23 = vcombine.high %v8124_v48, %v8124_v48  ;;  %v8410_v15 = vcombine.low %v8124_v48, %v8132_v37  ;;  %v8425_v9 = vrot.slane %v8409_v7, %v10139_v62  ;;  %v8770_v2 = vcombine.high %v8754_v35, %v8754_v35 }
 0x392   :  { %v8637_v51 = vpop.f32.mrf.mxu1  ;;  %v8391_v53 = vcombine.low %v8369_v18, %v8376_v20  ;;  %v7474_v11 = vpop.permute.xlu0 %7473  ;;  %v8131_v26 = vrot.slane %v8103_v58, %v10139_v62  ;;  %v8133_v57 = vcombine.high %v8117_v14, %v8117_v14  ;;  %v9035_v43 = vmax.f32 %v8754_v35, %v8768_v5 }
 0x393   :  { %v8638_v6 = vadd.f32 %v13560_v33, %v8637_v51  ;;  %v8411_v59 = vcombine.low %v8134_v23, %v8117_v14  ;;  %v8440_v31 = vcombine.low %v8418_v21, %v8425_v9  ;;  %v8432_v19 = vrot.slane %v8410_v15, %v10139_v62 }
 0x394   :  { %v9690_v55 = vpop.f32.mrf.mxu1  ;;  %v8399_v39 = vrot.slane %v8391_v53, %v10139_v62  ;;  %v9047_v30 = vmax.f32 %v8770_v2, %v8772_v10  ;;  %v7840_v60 = vsel %vm7833_vm0, %v7087_v4, %v7474_v11  ;;  %v8457_v48 = vcombine.low %v8131_v26, %v8133_v57 }
 0x395   :  { %v13638_v50 = vmax.f32 %v8638_v6, 0.0  ;;  %v8439_v36 = vrot.slane %v8411_v59, %v10139_v62  ;;  %v8448_v49 = vrot.slane %v8440_v31, %v10139_v62  ;;  %v8135_v40 = vcombine.high %v8131_v26, %v8131_v26 }
 0x396   :  { %v8407_v34 = vcombine.low %v8399_v39, %v8406_v29  ;;  %v13664_v54 = vmax.f32 %v9035_v43, %v9047_v30  ;;  %v8467_v5 = vrot.slane %v8457_v48, %v10139_v62 }
 0x397   :  { %v8780_v16 = vrot.slane %v13638_v50, %v10139_v62  ;;  %v8441_v0 = vcombine.low %v8432_v19, %v8439_v36 }
 0x398   :  { %9692 = vmatmul.mubr.msk.f32.gmra.mxu1 %vm8546_vm3, %v8407_v34 }
 0x399   :  { %v8788_v42 = vcombine.high %v8780_v16, %v8780_v16  ;;  %v8796_v25 = vrot.slane %v8780_v16, %v10139_v62  ;;  %9694 = vmatprep.mubr.msk.f32.mxu1 %vm9806_vm7, %v13881_v41  ;;  %v8455_v56 = vrot.slane %v8441_v0, %v10139_v62 }
 0x39b   :  { %v7648_v32 = vpop.permute.xlu1 %7647  ;;  %v8810_v27 = vrot.slane %v8788_v42, %v10139_v62  ;;  %v8456_v3 = vcombine.low %v8448_v49, %v8455_v56  ;;  %v8818_v63 = vcombine.high %v8796_v25, %v8796_v25 }
 0x39c   :  { %v7849_v28 = vsel %vm7842_vm1, %v7840_v60, %v7648_v32 }
 0x39d   :  { %v7822_v47 = vpop.permute.xlu0 %7821  ;;  %v8820_v61 = vcombine.high %v8810_v27, %v8810_v27  ;;  %9695 = vmatmul.mubr.msk.f32.gmra.mxu1 %vm8546_vm3, %v8456_v3  ;;  %v9036_v38 = vmax.f32 %v8796_v25, %v8810_v27 }
 0x39e   :  { %v7858_v17 = vsel %vm7851_vm2, %v7849_v28, %v7822_v47  ;;  %9697 = vmatprep.mubr.msk.f32.mxu1 %vm9806_vm7, %v13881_v41 }
 0x39f   :  { %v7476_v45 = vpop.permute.xlu1 %7475  ;;  %v9048_v1 = vmax.f32 %v8818_v63, %v8820_v61  ;;  %v8136_v24 = vcombine.high %v7858_v17, %v7858_v17  ;;  %v8143_v4 = vrot.slane %v7858_v17, %v10139_v62 }
 0x3a0   :  { %v7841_v20 = vsel %vm7833_vm0, %v7110_v8, %v7476_v45 }
 0x3a1   :  { %v13667_v37 = vmax.f32 %v9036_v38, %v9048_v1  ;;  %v8150_v18 = vrot.slane %v8136_v24, %v10139_v62  ;;  %v8151_v51 = vcombine.high %v8143_v4, %v8143_v4  ;;  %v8159_v14 = vrot.slane %v8143_v4, %v10139_v62 }
 0x3a2   :  { %v7650_v7 = vpop.permute.xlu0 %7649 }
 0x3a3   :  { %v7850_v13 = vsel %vm7842_vm1, %v7841_v20, %v7650_v7  ;;  %v9071_v23 = vmax.f32 %v13664_v54, %v13667_v37  ;;  %v8152_v15 = vcombine.high %v8150_v18, %v8150_v18  ;;  %v8166_v53 = vrot.slane %v8150_v18, %v10139_v62 }
 0x3a4   :  { %v8173_v21 = vrot.slane %v8151_v51, %v10139_v62  ;;  %v8181_v9 = vcombine.high %v8159_v14, %v8159_v14  ;;  %v8458_v6 = vcombine.low %v8135_v40, %v8159_v14  ;;  %v7824_v55 = vpop.permute.xlu1 %7823 }
 0x3a5   :  { %v8180_v59 = vrot.slane %v8152_v15, %v10139_v62  ;;  %v8182_v31 = vcombine.high %v8166_v53, %v8166_v53  ;;  %v7859_v39 = vsel %vm7851_vm2, %v7850_v13, %v7824_v55 }
 0x3a6   :  { %v8183_v29 = vcombine.high %v8173_v21, %v8173_v21  ;;  %v8459_v35 = vcombine.low %v8173_v21, %v8181_v9  ;;  %v8474_v19 = vrot.slane %v8458_v6, %v10139_v62  ;;  %v8191_v36 = vrot.slane %v7859_v39, %v10139_v62 }
 0x3a7   :  { %v8506_v58 = vcombine.low %v8180_v59, %v8182_v31  ;;  %v8184_v11 = vcombine.high %v8180_v59, %v8180_v59 }
 0x3a8   :  { %v8460_v34 = vcombine.low %v8183_v29, %v8166_v53  ;;  %v8489_v16 = vcombine.low %v8467_v5, %v8474_v19  ;;  %v8192_v10 = vcombine.high %v8191_v36, %v8191_v36  ;;  %v8199_v0 = vrot.slane %v8191_v36, %v10139_v62 }
 0x3a9   :  { %v8481_v42 = vrot.slane %v8459_v35, %v10139_v62  ;;  %v8515_v30 = vrot.slane %v8506_v58, %v10139_v62 }
 0x3aa   :  { %v8488_v25 = vrot.slane %v8460_v34, %v10139_v62  ;;  %v8206_v2 = vrot.slane %v8192_v10, %v10139_v62  ;;  %v8207_v32 = vcombine.high %v8199_v0, %v8199_v0  ;;  %v8507_v49 = vcombine.low %v8184_v11, %v8199_v0 }
 0x3ab   :  { %v8497_v60 = vrot.slane %v8489_v16, %v10139_v62 }
 0x3ac   :  { %v8490_v56 = vcombine.low %v8481_v42, %v8488_v25  ;;  %v8508_v27 = vcombine.low %v8206_v2, %v8207_v32  ;;  %v8522_v26 = vrot.slane %v8507_v49, %v10139_v62  ;;  %v8773_v25 = vcombine.high %v13638_v50, %v13638_v50  ;;  %v63_v2 = vld [vmem:[%s13842_s1 + $0xa0] sm:$0xff]  ;;  %v62_v32 = vld [vmem:[%s13842_s1 + $0x98] sm:$0xff] }
 0x3ad   :  { %9704 = vmatpush3.msra.mxu1 %v63_v2 }
 0x3ae   :  { %v8504_v3 = vrot.slane %v8490_v56, %v10139_v62  ;;  %v8529_v47 = vrot.slane %v8508_v27, %v10139_v62  ;;  %v8530_v57 = vcombine.low %v8515_v30, %v8522_v26  ;;  %9705 = vmatprep.subr.mxu1 %v13881_v41  ;;  %v61_v30 = vld [vmem:[%s13842_s1 + $0x90] sm:$0xff] }
 0x3af   :  { %9706 = vmatpush3.msra.mxu1 %v62_v32  ;;  %v54_v32 = vld [vmem:[%s13842_s1 + $0x58] sm:$0xff] }
 0x3b0   :  { %v8505_v63 = vcombine.low %v8497_v60, %v8504_v3  ;;  %v8537_v61 = vrot.slane %v8530_v57, %v10139_v62  ;;  %v8544_v28 = vrot.slane %v8529_v47, %v10139_v62  ;;  %v8787_v60 = vrot.slane %v8773_v25, %v10139_v62  ;;  %9707 = vmatprep.subr.mxu1 %v13881_v41  ;;  %v60_v3 = vld [vmem:[%s13842_s1 + $0x88] sm:$0xff] }
 0x3b1   :  { %9708 = vmatpush3.msra.mxu1 %v61_v30 }
 0x3b2   :  { %9698 = vmatmul.mubr.msk.f32.gmra.mxu1 %vm8546_vm3, %v8505_v63  ;;  %v8545_v43 = vcombine.low %v8537_v61, %v8544_v28  ;;  %9709 = vmatprep.subr.mxu1 %v13881_v41  ;;  %v59_v63 = vld [vmem:[%s13842_s1 + $0x80] sm:$0xff]  ;;  %v8789_v28 = vcombine.high %v8787_v60, %v8787_v60 }
 0x3b3   :  { %9700 = vmatprep.mubr.msk.f32.mxu1 %vm9806_vm7, %v13881_v41  ;;  %9710 = vmatpush3.msra.mxu1 %v60_v3 }
 0x3b4   :  { %9711 = vmatprep.subr.mxu1 %v13881_v41 }
 0x3b5   :  { %9712 = vmatpush3.msra.mxu1 %v59_v63 }
 0x3b6   :  { %9701 = vmatmul.mubr.msk.f32.gmra.mxu1 %vm8546_vm3, %v8545_v43  ;;  %9713 = vmatprep.subr.mxu1 %v13881_v41 }
 0x3b7   :  { %9723 = vmatprep.mubr.msk.f32.mxu1 %vm9806_vm7, %v13881_v41  ;;  %9714 = vmatpush3.msra.mxu1 %v58_v44 }
 0x3b8   :  { %9715 = vmatprep.subr.mxu1 %v13881_v41 }
 0x3b9   :  { %9716 = vmatpush3.msra.mxu1 %v57_v52 }
 0x3ba   :  { %9717 = vmatprep.subr.mxu1 %v13881_v41 }
 0x458   :  { %v8642_v17 = vpop.f32.mrf.mxu1 }
 0x459   :  { %v8643_v45 = vadd.f32 %v13560_v33, %v8642_v17 }
 0x45a   :  { %v9693_v38 = vpop.f32.mrf.mxu1 }
 0x45b   :  { %v8664_v1 = vmax.f32 %v8643_v45, 0.0 }
 0x45d   :  { %v8822_v24 = vcombine.high %v8664_v1, %v8664_v1  ;;  %v8829_v8 = vrot.slane %v8664_v1, %v10139_v62  ;;  %v8647_v4 = vpop.f32.mrf.mxu1  ;;  %v8817_v1 = vrot.slane %v8789_v28, %v10139_v62 }
 0x45e   :  { %v8648_v48 = vadd.f32 %v13560_v33, %v8647_v4 }
 0x45f   :  { %v8836_v18 = vrot.slane %v8822_v24, %v10139_v62  ;;  %v8837_v20 = vcombine.high %v8829_v8, %v8829_v8  ;;  %v9696_v7 = vpop.f32.mrf.mxu1 }
 0x460   :  { %v8665_v40 = vmax.f32 %v8648_v48, 0.0 }
 0x461   :  { %v8838_v51 = vcombine.high %v8836_v18, %v8836_v18  ;;  %v8845_v14 = vrot.slane %v8836_v18, %v10139_v62  ;;  %v8852_v13 = vrot.slane %v8837_v20, %v10139_v62  ;;  %v8803_v18 = vrot.slane %v8787_v60, %v10139_v62 }
 0x462   :  { %v8863_v15 = vcombine.high %v8665_v40, %v8665_v40  ;;  %v8870_v53 = vrot.slane %v8665_v40, %v10139_v62 }
 0x463   :  { %v8859_v21 = vrot.slane %v8838_v51, %v10139_v62  ;;  %v8860_v9 = vcombine.high %v8845_v14, %v8845_v14  ;;  %v8861_v6 = vcombine.high %v8852_v13, %v8852_v13  ;;  %v8821_v13 = vcombine.high %v8817_v1, %v8817_v1 }
 0x464   :  { %v8877_v55 = vrot.slane %v8863_v15, %v10139_v62  ;;  %v8878_v5 = vcombine.high %v8870_v53, %v8870_v53  ;;  %v8886_v59 = vrot.slane %v8870_v53, %v10139_v62 }
 0x465   :  { %v9038_v31 = vmax.f32 %v8861_v6, %v8845_v14  ;;  %v9050_v39 = vmax.f32 %v8859_v21, %v8860_v9  ;;  %v8862_v29 = vcombine.high %v8859_v21, %v8859_v21  ;;  %v8819_v6 = vcombine.high %v8803_v18, %v8803_v18 }
 0x466   :  { %v8879_v35 = vcombine.high %v8877_v55, %v8877_v55  ;;  %v8893_v19 = vrot.slane %v8877_v55, %v10139_v62  ;;  %v8900_v36 = vrot.slane %v8878_v5, %v10139_v62  ;;  %v8908_v34 = vcombine.high %v8886_v59, %v8886_v59 }
 0x467   :  { %v9062_v16 = vmax.f32 %v9038_v31, %v9050_v39  ;;  %v9039_v10 = vmax.f32 %v8862_v29, %v8886_v59 }
 0x468   :  { %v8907_v58 = vrot.slane %v8879_v35, %v10139_v62  ;;  %v8909_v11 = vcombine.high %v8893_v19, %v8893_v19  ;;  %v8910_v0 = vcombine.high %v8900_v36, %v8900_v36  ;;  %v9051_v42 = vmax.f32 %v8900_v36, %v8908_v34  ;;  %v56_v34 = vld [vmem:[%s13842_s1 + $0x68] sm:$0xff] }
 0x469   :  { %v9049_v35 = vmax.f32 %v8819_v6, %v8821_v13  ;;  %9718 = vmatpush3.msra.mxu1 %v56_v34 }
 0x46a   :  { %v9040_v49 = vmax.f32 %v8910_v0, %v8893_v19  ;;  %v9052_v56 = vmax.f32 %v8907_v58, %v8909_v11  ;;  %v9063_v27 = vmax.f32 %v9039_v10, %v9051_v42  ;;  %v8911_v15 = vcombine.high %v8907_v58, %v8907_v58  ;;  %9719 = vmatprep.subr.mxu1 %v13881_v41 }
 0x46b   :  { %v9037_v0 = vmax.f32 %v8803_v18, %v8817_v1 }
 0x46c   :  { %v13724_v26 = vmax.f32 %v9040_v49, %v9052_v56  ;;  %v9073_v50 = vmax.f32 %v9062_v16, %v9063_v27  ;;  %v55_v16 = vld [vmem:[%s13842_s1 + $0x60] sm:$0xff]  ;;  %v9070_v49 = vmax.f32 %v13594_v22, %v13664_v54 }
 0x46d   :  { %9720 = vmatpush3.msra.mxu1 %v55_v16  ;;  %v9061_v30 = vmax.f32 %v9037_v0, %v9049_v35 }
 0x46e   :  { %v9074_v47 = vmax.f32 %v9063_v27, %v13724_v26  ;;  %v13735_v57 = vcombine.low %v9068_v46, %v9073_v50  ;;  %9721 = vmatprep.subr.mxu1 %v13881_v41 }
 0x46f   :  { %9722 = vmatpush3.msra.mxu1 %v54_v32 }
 0x470   :  { %v9098_v61 = vcombine.low %v9069_v12, %v9074_v47  ;;  %9726 = vmatprep.subr.mxu1 %v13881_v41  ;;  %v9087_v54 = vrot.slane %v13735_v57, %v10139_v62  ;;  %v66_v57 = vld [vmem:[%s13842_s1 + $0xb8] sm:$0xff] }
 0x472   :  { %v8652_v43 = vpop.f32.mrf.mxu1  ;;  %v9105_v17 = vrot.slane %v9098_v61, %v10139_v62 }
 0x473   :  { %v8653_v46 = vadd.f32 %v13560_v33, %v8652_v43 }
 0x474   :  { %v9699_v45 = vpop.f32.mrf.mxu1  ;;  %v9112_v38 = vrot.slane %v9105_v17, %v10139_v62 }
 0x475   :  { %v8666_v12 = vmax.f32 %v8653_v46, 0.0 }
 0x476   :  { %v8657_v24 = vpop.f32.mrf.mxu1  ;;  %9113 = vrot.lane.b32.xlu0 %v9112_v38, %s9808_s19 }
 0x477   :  { %v8912_v8 = vcombine.high %v8666_v12, %v8666_v12  ;;  %v8919_v4 = vrot.slane %v8666_v12, %v10139_v62  ;;  %v8658_v48 = vadd.f32 %v13560_v33, %v8657_v24 }
 0x478   :  { %v9702_v20 = vpop.f32.mrf.mxu1 }
 0x479   :  { %v8926_v7 = vrot.slane %v8912_v8, %v10139_v62  ;;  %v8927_v40 = vcombine.high %v8919_v4, %v8919_v4  ;;  %v8935_v51 = vrot.slane %v8919_v4, %v10139_v62  ;;  %v8667_v14 = vmax.f32 %v8658_v48, 0.0  ;;  %v68_v48 = vld [vmem:[%s13842_s1 + $0xc8] sm:$0xff]  ;;  %v65_v20 = vld [vmem:[%s13842_s1 + $0xb0] sm:$0xff] }
 0x47b   :  { %v8928_v53 = vcombine.high %v8926_v7, %v8926_v7  ;;  %v8942_v21 = vrot.slane %v8926_v7, %v10139_v62  ;;  %v8949_v9 = vrot.slane %v8927_v40, %v10139_v62  ;;  %v8957_v33 = vcombine.high %v8935_v51, %v8935_v51  ;;  %v9499_v7 = vld [vmem:[%s13842_s1 + $0xa8] ss:$0 sm:$0xff] }
 0x47c   :  { %v9041_v55 = vmax.f32 %v8911_v15, %v8935_v51  ;;  %v8967_v5 = vrot.slane %v8667_v14, %v10139_v62  ;;  %v71_v15 = vld [vmem:[%s13842_s1 + $0xe0] sm:$0xff] }
 0x47d   :  { %v8956_v59 = vrot.slane %v8928_v53, %v10139_v62  ;;  %v8958_v31 = vcombine.high %v8942_v21, %v8942_v21  ;;  %v8959_v39 = vcombine.high %v8949_v9, %v8949_v9  ;;  %v9053_v29 = vmax.f32 %v8949_v9, %v8957_v33  ;;  %v70_v53 = vld [vmem:[%s13842_s1 + $0xd8] sm:$0xff] }
 0x47e   :  { %v8968_v19 = vcombine.high %v8967_v5, %v8967_v5  ;;  %v8975_v36 = vrot.slane %v8967_v5, %v10139_v62  ;;  %v9503_v5 = vld [vmem:[%s13842_s1 + $0xe8] ss:$0 sm:$0xff] }
 0x47f   :  { %v9042_v10 = vmax.f32 %v8959_v39, %v8942_v21  ;;  %v9054_v58 = vmax.f32 %v8956_v59, %v8958_v31  ;;  %v9065_v11 = vmax.f32 %v9041_v55, %v9053_v29  ;;  %v8960_v42 = vcombine.high %v8956_v59, %v8956_v59  ;;  %v9501_v21 = vld [vmem:[%s13842_s1 + $0xd0] ss:$0 sm:$0xff] }
 0x480   :  { %v8982_v25 = vrot.slane %v8968_v19, %v10139_v62  ;;  %v8983_v2 = vcombine.high %v8975_v36, %v8975_v36 }
 0x481   :  { %v9066_v56 = vmax.f32 %v9042_v10, %v9054_v58  ;;  %v9075_v27 = vmax.f32 %v13724_v26, %v9065_v11  ;;  %v9043_v50 = vmax.f32 %v8960_v42, %v8975_v36  ;;  %v9072_v26 = vmax.f32 %v13667_v37, %v9061_v30 }
 0x482   :  { %v9055_v60 = vmax.f32 %v8982_v25, %v8983_v2 }
 0x483   :  { %v9076_v3 = vmax.f32 %v9065_v11, %v9066_v56  ;;  %v9118_v47 = vcombine.low %v9070_v49, %v9075_v27 }
 0x484   :  { %v9067_v63 = vmax.f32 %v9043_v50, %v9055_v60 }
 0x485   :  { %v9125_v61 = vrot.slane %v9118_v47, %v10139_v62  ;;  %v9138_v22 = vcombine.low %v9071_v23, %v9076_v3  ;;  %v9094_v23 = vrot.slane %v9087_v54, %v10139_v62 }
 0x486   :  { %v9077_v28 = vmax.f32 %v9066_v56, %v9067_v63 }
 0x487   :  { %v9132_v43 = vrot.slane %v9125_v61, %v10139_v62  ;;  %v9145_v44 = vrot.slane %v9138_v22, %v10139_v62 }
 0x488   :  { %v9158_v46 = vcombine.low %v9072_v26, %v9077_v28 }
 0x489   :  { %9133 = vrot.lane.b32.xlu1 %v9132_v43, %s9811_s12  ;;  %v9152_v17 = vrot.slane %v9145_v44, %v10139_v62 }
 0x48a   :  { %v9165_v45 = vrot.slane %v9158_v46, %v10139_v62 }
 0x48b   :  { %9153 = vrot.lane.b32.xlu0 %v9152_v17, %s9812_s13 }
 0x48c   :  { %v9172_v52 = vrot.slane %v9165_v45, %v10139_v62  ;;  %v67_v62 = vld [vmem:[%s13842_s1 + $0xc0] sm:$0xff] }
 0x48e   :  { %9173 = vrot.lane.b32.xlu1 %v9172_v52, %s9813_s15 }
 0x4e8   :  { %v9114_v37 = vpop.permute.xlu0 %9113 }
 0x4e9   :  { %v9176_v38 = vsel %vm7842_vm1, %v9094_v23, %v9114_v37 }
 0x4fb   :  { %v9134_v12 = vpop.permute.xlu1 %9133 }
 0x4fc   :  { %v9177_v1 = vsel %vm8546_vm3, %v9176_v38, %v9134_v12 }
 0x4fd   :  { %v9154_v24 = vpop.permute.xlu0 %9153 }
 0x4fe   :  { %v9179_v8 = vsel %vm9178_vm4, %v9177_v1, %v9154_v24 }
 0x500   :  { %v9174_v4 = vpop.permute.xlu1 %9173 }
 0x501   :  { %v9181_v18 = vsel %vm9180_vm5, %v9179_v8, %v9174_v4 }
 0x502   :  { %9724 = vmatmul.mubr.msk.f32.vlgmr.msra.gmra.mxu1 %vm9186_vm6, %v9181_v18 }
 0x503   :  { %9727 = vmatpush3.msra.mxu1 %v68_v48  ;;  %9734 = vmatprep.mubr.msk.f32.mxu1 %vm9806_vm7, %v13881_v41 }
 0x504   :  { %9728 = vmatprep.subr.mxu1 %v13881_v41 }
 0x505   :  { %9729 = vmatpush3.msra.mxu1 %v67_v62 }
 0x506   :  { %9730 = vmatprep.subr.mxu1 %v13881_v41 }
 0x507   :  { %9731 = vmatpush3.msra.mxu1 %v66_v57 }
 0x508   :  { %9732 = vmatprep.subr.mxu1 %v13881_v41 }
 0x509   :  { %9733 = vmatpush3.msra.mxu1 %v65_v20 }
 0x50a   :  { %9737 = vmatprep.subr.mxu1 %v13881_v41 }
 0x5c2   :  { %v9256_v40 = vpop.f32.mrf.mxu1 }
 0x5c3   :  { %v9257_v51 = vadd.f32 %v9499_v7, %v9256_v40 }
 0x5c4   :  { %v9725_v14 = vpop.f32.mrf.mxu1 }
 0x5c5   :  { %v9260_v13 = vmax.f32 %v9257_v51, 0.0 }
 0x5c7   :  { %9735 = vmatmul.mubr.msk.f32.vlgmr.msra.gmra.mxu1 %vm8546_vm3, %v9260_v13 }
 0x5c8   :  { %9741 = vmatprep.mubr.msk.f32.mxu1 %vm9806_vm7, %v13881_v41  ;;  %9738 = vmatpush3.msra.mxu1 %v71_v15  ;;  %vm9417_vm7 = vcmask 1024  }
 0x5c9   :  { %9739 = vmatprep.subr.mxu1 %v13881_v41 }
 0x5ca   :  { %9740 = vmatpush3.msra.mxu1 %v70_v53 }
 0x687   :  { %v9334_v9 = vpop.f32.mrf.mxu1 }
 0x688   :  { %v9335_v33 = vadd.f32 %v9501_v21, %v9334_v9 }
 0x689   :  { %v9736_v6 = vpop.f32.mrf.mxu1 }
 0x68a   :  { %v9338_v55 = vmax.f32 %v9335_v33, 0.0 }
 0x68c   :  { %9742 = vmatmul.mubr.msk.f32.vlgmr.msra.gmra.mxu1 %vm7842_vm1, %v9338_v55 }
 0x74c   :  { %v9412_v59 = vpop.f32.mrf.mxu1 }
 0x74d   :  { %v9413_v31 = vadd.f32 %v9503_v5, %v9412_v59 }
 0x74e   :  { %v9743_v39 = vpop.f32.mrf.mxu1 }
 0x74f   :  { %v9416_v41 = vmax.f32 %v9413_v31, 0.0 }
 0x751   :  { %9418 = vst.msk [vmem:[%s13843_s2] sm:$0x3] %vm9417_vm7, %v9416_v41 }

</bundles_post_ra>
